<compile_context>
chip_gen: v6e
topology: v6e:2x2x1
jax: 0.10.0
libtpu: 0.0.40
codegen_flags: <defaults>
</compile_context>

<pallas_src>
import jax
import jax.numpy as jnp
from jax.experimental import pallas as pl
from jax.experimental.pallas import tpu as pltpu

# ----------------------------- model config (small, synthetic) ----------------
IN_CHANNELS = 4
SEQ_LEN = 32
BATCH = 2
BN_EPS = 1e-5

# per branch: per block: per conv dilation ("scope")
SCOPES = [[[1, 1], [2, 2]], [[1, 1], [4, 4]], [[1, 1], [8, 8]]]
# per branch: per block: number of filters (same for every conv in the block)
NUM_FILTERS = [[8, 16], [8, 16], [8, 16]]
# per branch: per block: kernel size (same for every conv in the block)
FILTER_LENGTHS = [[3, 3], [3, 3], [3, 3]]
# per branch subsample length (int -> repeated for each block, as in the module)
SUBSAMPLE_LENGTHS = [2, 2, 2]

# ----------------------------- derived constants -------------------------------
N_BRANCH = len(SCOPES)
K = FILTER_LENGTHS[0][0]
DS = SUBSAMPLE_LENGTHS[0]
C_BLK0 = NUM_FILTERS[0][0]
C_BLK1 = NUM_FILTERS[0][1]
L0 = SEQ_LEN
L1 = L0 // DS
L2 = L1 // DS
BLOCK1_DILS = tuple(SCOPES[br][1][0] for br in range(N_BRANCH))
MAX_DIL = max(max(max(blk) for blk in br) for br in SCOPES)

# the fused kernel is specialized to this structure; guard the assumptions
assert K % 2 == 1
assert all(FILTER_LENGTHS[br][blk] == K for br in range(N_BRANCH) for blk in range(2))
assert all(SUBSAMPLE_LENGTHS[br] == DS for br in range(N_BRANCH))
assert all(NUM_FILTERS[br] == [C_BLK0, C_BLK1] for br in range(N_BRANCH))
assert all(SCOPES[br][0] == [1, 1] and SCOPES[br][1][0] == SCOPES[br][1][1]
           for br in range(N_BRANCH))
assert L0 % DS == 0 and L1 % DS == 0

# VMEM staging layout: each batch gets a private row band with zero halos
P_OFF = 8                                   # halo rows before/after each live band
assert P_OFF >= MAX_DIL * (K - 1) // 2
ROW_STRIDE = P_OFF + SEQ_LEN + P_OFF        # rows reserved per batch element
C_PAD = max(IN_CHANNELS, C_BLK0, C_BLK1)    # lane width of the staging scratch


# ----------------------------- fused Pallas kernel ------------------------------
def _multi_scopic_kernel(x_ref,
                         w00_ref, b00_ref, w01_ref, b01_ref, s0_ref, t0_ref,
                         w10_ref, b10_ref, w11_ref, b11_ref, s1_ref, t1_ref,
                         o_ref, pad_ref):
    """Single invocation == whole network.  Everything stays in VMEM / vregs."""

    # one-time memset: every halo row starts at zero (the 'same' padding)
    pad_ref[...] = jnp.zeros_like(pad_ref)

    x = x_ref[...]                      # load input once, reused by all 3 branches
    half = (K - 1) // 2

    def conv_relu(act, act_stride, length, dil, w_ref, b_ref, br):
        """Dilated 'same' Conv1d (K taps, stride 1) + bias + ReLU.

        `act` rows for batch b live at [b*act_stride, b*act_stride+length).
        Returns a (band, c_out) f32 value whose batch-b rows live at
        [b*ROW_STRIDE, b*ROW_STRIDE+length); rows in between are don't-care.
        """
        c_in = w_ref.shape[-2]
        # stage the live rows of each batch into its private zero-halo band
        for b in range(BATCH):
            base = b * ROW_STRIDE + P_OFF
            pad_ref[base:base + length, :c_in] = (
                act[b * act_stride:b * act_stride + length, :c_in])
        band = (BATCH - 1) * ROW_STRIDE + length
        acc = None
        for t in range(K):              # K accumulating matmuls, no tap gather
            off = P_OFF + (t - half) * dil
            lhs = pad_ref[off:off + band, :c_in].astype(jnp.bfloat16)
            part = jnp.dot(lhs, w_ref[br, t], preferred_element_type=jnp.float32)
            acc = part if acc is None else acc + part
        return jnp.maximum(acc + b_ref[br], 0.0)

    def bn_maxpool(band_act, length, scale, shift):
        """Eval BatchNorm1d (folded scale/shift) + MaxPool1d(kernel=stride=DS)."""
        outs = []
        for b in range(BATCH):
            z = band_act[b * ROW_STRIDE:b * ROW_STRIDE + length, :] * scale + shift
            outs.append(jnp.max(z.reshape(length // DS, DS, z.shape[-1]), axis=1))
        return jnp.concatenate(outs, axis=0)          # (BATCH*length//DS, c)

    branch_outs = []
    for br in range(N_BRANCH):          # branches statically unrolled (one grid step)
        dil1 = BLOCK1_DILS[br]

        # ---- block 0 (dilation 1 in every branch) ----
        h = conv_relu(x, L0, L0, 1, w00_ref, b00_ref, br)
        h = conv_relu(h, ROW_STRIDE, L0, 1, w01_ref, b01_ref, br)
        h = bn_maxpool(h, L0, s0_ref[br], t0_ref[br])          # (BATCH*L1, C_BLK0)

        # block-0 staged L0 live rows; re-zero the strip that falls inside
        # block-1's right halo (block-1 only overwrites L1 live rows).
        for b in range(BATCH):
            base = b * ROW_STRIDE + P_OFF
            pad_ref[base + L1:base + L1 + P_OFF, :] = (
                jnp.zeros((P_OFF, C_PAD), jnp.float32))

        # ---- block 1 (branch-specific dilation, static per unrolled branch) ----
        g = conv_relu(h, L1, L1, dil1, w10_ref, b10_ref, br)
        g = conv_relu(g, ROW_STRIDE, L1, dil1, w11_ref, b11_ref, br)
        g = bn_maxpool(g, L1, s1_ref[br], t1_ref[br])          # (BATCH*L2, C_BLK1)
        branch_outs.append(g)

    # lane-dense output: channel-concat of the branches on the last axis, one store
    o_ref[...] = jnp.concatenate(branch_outs, axis=-1).astype(o_ref.dtype)


def _fused_forward_2d(x2d, *stacked):
    """x2d: (BATCH*SEQ_LEN, IN_CHANNELS); stacked params have a leading branch dim."""
    return pl.pallas_call(
        _multi_scopic_kernel,
        out_shape=jax.ShapeDtypeStruct((BATCH * L2, N_BRANCH * C_BLK1), jnp.float32),
        scratch_shapes=[
            pltpu.VMEM((BATCH * ROW_STRIDE, C_PAD), jnp.float32),  # zero-halo staging
        ],
    )(x2d, *stacked)


# ----------------------------- parameters ---------------------------------------
def init_params(key):
    params = []
    for br in range(N_BRANCH):
        branch_params = []
        c_in = IN_CHANNELS
        for blk in range(len(SCOPES[br])):
            dilations = SCOPES[br][blk]
            c_out = NUM_FILTERS[br][blk]
            ksize = FILTER_LENGTHS[br][blk]
            convs = []
            for ci in range(len(dilations)):
                key, k_w, k_b = jax.random.split(key, 3)
                fan_in = c_in * ksize
                w = jax.random.normal(k_w, (ksize, c_in, c_out), jnp.float32) \
                    * jnp.sqrt(2.0 / fan_in)
                b = 0.01 * jax.random.normal(k_b, (c_out,), jnp.float32)
                convs.append({"w": w, "b": b, "dilation": dilations[ci]})
                c_in = c_out
            key, k1, k2, k3, k4 = jax.random.split(key, 5)
            bn = {
                "gamma": 1.0 + 0.1 * jax.random.normal(k1, (c_in,), jnp.float32),
                "beta": 0.1 * jax.random.normal(k2, (c_in,), jnp.float32),
                "mean": 0.1 * jax.random.normal(k3, (c_in,), jnp.float32),
                "var": 1.0 + 0.1 * jax.random.uniform(k4, (c_in,), jnp.float32),
            }
            branch_params.append({"convs": convs, "bn": bn,
                                  "ds": SUBSAMPLE_LENGTHS[br]})
        params.append(branch_params)
    return params


# ----------------------------- forward ------------------------------------------
@jax.jit
def multi_scopic_cnn_forward(x_ncl, params):
    """x_ncl: (B, C_in, L) -> (B, sum_branch_Cout, L_out), matching torch NCL."""
    B, C_in, L = x_ncl.shape
    x2d = jnp.transpose(x_ncl, (0, 2, 1)).reshape(B * L, C_in)   # single NCL->NLC

    def conv_params(blk, ci):
        w = jnp.stack([params[br][blk]["convs"][ci]["w"]
                       for br in range(N_BRANCH)])               # (n_br, K, Cin, Cout)
        b = jnp.stack([params[br][blk]["convs"][ci]["b"][None, :]
                       for br in range(N_BRANCH)])               # (n_br, 1, Cout)
        return w.astype(jnp.bfloat16), b                         # weights fed as bf16

    def bn_params(blk):
        scales, shifts = [], []
        for br in range(N_BRANCH):
            bn = params[br][blk]["bn"]
            s = bn["gamma"] * jax.lax.rsqrt(bn["var"] + BN_EPS)
            scales.append(s[None, :])
            shifts.append((bn["beta"] - bn["mean"] * s)[None, :])
        return jnp.stack(scales), jnp.stack(shifts)

    w00, b00 = conv_params(0, 0)
    w01, b01 = conv_params(0, 1)
    w10, b10 = conv_params(1, 0)
    w11, b11 = conv_params(1, 1)
    s0, t0 = bn_params(0)
    s1, t1 = bn_params(1)

    out2d = _fused_forward_2d(x2d, w00, b00, w01, b01, s0, t0,
                              w10, b10, w11, b11, s1, t1)
    # (B*L2, n_br*C) batch-major rows -> torch NCL (B, n_br*C, L2)
    out = out2d.reshape(B, L2, N_BRANCH * C_BLK1)
    return jnp.transpose(out, (0, 2, 1))


# ----------------------------- pure-JAX reference (for sanity check) ------------
def reference_forward(x_ncl, params):
    outs = []
    for branch in params:
        y = jnp.transpose(x_ncl, (0, 2, 1))
        for block in branch:
            for conv in block["convs"]:
                w = conv["w"].astype(jnp.bfloat16)
                b, d = conv["b"], conv["dilation"]
                kk = conv["w"].shape[0]
                p = d * (kk - 1) // 2
                bsz, ln, _ = y.shape
                yp = jnp.pad(y, ((0, 0), (p, p), (0, 0)))
                acc = jnp.zeros((bsz, ln, w.shape[-1]), jnp.float32) + b
                for t in range(kk):
                    acc = acc + jnp.einsum(
                        "blc,cf->blf",
                        yp[:, t * d:t * d + ln, :].astype(jnp.bfloat16), w[t],
                        preferred_element_type=jnp.float32)
                y = jnp.maximum(acc, 0.0)
            bn = block["bn"]
            s = bn["gamma"] * jax.lax.rsqrt(bn["var"] + BN_EPS)
            sh = bn["beta"] - bn["mean"] * s
            y = y * s + sh
            ds = block["ds"]
            bsz, ln, ch = y.shape
            y = y[:, :(ln // ds) * ds, :].reshape(bsz, ln // ds, ds, ch).max(axis=2)
        outs.append(jnp.transpose(y, (0, 2, 1)))
    return jnp.concatenate(outs, axis=1)


if __name__ == "__main__":
    key = jax.random.PRNGKey(0)
    key, k_x = jax.random.split(key)
    x = jax.random.normal(k_x, (BATCH, IN_CHANNELS, SEQ_LEN), jnp.float32)
    params = init_params(key)

    out = multi_scopic_cnn_forward(x, params)
    out = jax.block_until_ready(out)

    expected_c = sum(NUM_FILTERS[b][-1] for b in range(N_BRANCH))
    assert out.shape == (BATCH, expected_c, L2), out.shape

    ref = reference_forward(x, params)
    max_err = float(jnp.max(jnp.abs(out - ref)))
    assert jnp.allclose(out, ref, atol=2e-2, rtol=2e-2), max_err

    print("KERNEL_OK")
</pallas_src>

<mosaic_0001>
module attributes {stable_mosaic.version = 11 : i64} {
  func.func @_multi_scopic_kernel(%arg0: memref<64x4xf32, #tpu.memory_space<vmem>>, %arg1: memref<3x3x4x8xbf16, #tpu.memory_space<vmem>>, %arg2: memref<3x1x8xf32, #tpu.memory_space<vmem>>, %arg3: memref<3x3x8x8xbf16, #tpu.memory_space<vmem>>, %arg4: memref<3x1x8xf32, #tpu.memory_space<vmem>>, %arg5: memref<3x1x8xf32, #tpu.memory_space<vmem>>, %arg6: memref<3x1x8xf32, #tpu.memory_space<vmem>>, %arg7: memref<3x3x8x16xbf16, #tpu.memory_space<vmem>>, %arg8: memref<3x1x16xf32, #tpu.memory_space<vmem>>, %arg9: memref<3x3x16x16xbf16, #tpu.memory_space<vmem>>, %arg10: memref<3x1x16xf32, #tpu.memory_space<vmem>>, %arg11: memref<3x1x16xf32, #tpu.memory_space<vmem>>, %arg12: memref<3x1x16xf32, #tpu.memory_space<vmem>>, %arg13: memref<16x48xf32, #tpu.memory_space<vmem>>, %arg14: memref<96x16xf32, #tpu.memory_space<vmem>>) attributes {dimension_semantics = [], scalar_prefetch = 0 : i64, scratch_operands = 1 : i64, tpu.core_type = #tpu.core_type<tc>} {
    %cst = arith.constant 0.000000e+00 : f32
    %0 = vector.broadcast %cst : f32 to vector<96x16xf32>
    %c0 = arith.constant 0 : index
    %c0_0 = arith.constant 0 : index
    %1 = vector.load %arg14[%c0, %c0_0] : memref<96x16xf32, #tpu.memory_space<vmem>>, vector<96x16xf32>
    tpu.vector_store %arg14[%c0, %c0_0], %0 {strides = array<i32>} : memref<96x16xf32, #tpu.memory_space<vmem>>, vector<96x16xf32>,
    %c0_1 = arith.constant 0 : index
    %c0_2 = arith.constant 0 : index
    %2 = vector.load %arg0[%c0_1, %c0_2] : memref<64x4xf32, #tpu.memory_space<vmem>>, vector<64x4xf32>
    %3 = vector.extract_strided_slice %2 {offsets = [0, 0], sizes = [32, 4], strides = [1, 1]} : vector<64x4xf32> to vector<32x4xf32>
    %c8 = arith.constant 8 : index
    %c0_3 = arith.constant 0 : index
    %4 = vector.load %arg14[%c8, %c0_3] : memref<96x16xf32, #tpu.memory_space<vmem>>, vector<32x4xf32>
    tpu.vector_store %arg14[%c8, %c0_3], %3 {strides = array<i32>} : memref<96x16xf32, #tpu.memory_space<vmem>>, vector<32x4xf32>,
    %5 = vector.extract_strided_slice %2 {offsets = [32, 0], sizes = [32, 4], strides = [1, 1]} : vector<64x4xf32> to vector<32x4xf32>
    %c56 = arith.constant 56 : index
    %c0_4 = arith.constant 0 : index
    %6 = vector.load %arg14[%c56, %c0_4] : memref<96x16xf32, #tpu.memory_space<vmem>>, vector<32x4xf32>
    tpu.vector_store %arg14[%c56, %c0_4], %5 {strides = array<i32>} : memref<96x16xf32, #tpu.memory_space<vmem>>, vector<32x4xf32>,
    %c7 = arith.constant 7 : index
    %c0_5 = arith.constant 0 : index
    %7 = vector.load %arg14[%c7, %c0_5] : memref<96x16xf32, #tpu.memory_space<vmem>>, vector<80x4xf32>
    %8 = arith.truncf %7 : vector<80x4xf32> to vector<80x4xbf16>
    %c0_6 = arith.constant 0 : index
    %c0_7 = arith.constant 0 : index
    %c0_8 = arith.constant 0 : index
    %c0_9 = arith.constant 0 : index
    %9 = vector.load %arg1[%c0_6, %c0_7, %c0_8, %c0_9] : memref<3x3x4x8xbf16, #tpu.memory_space<vmem>>, vector<1x1x4x8xbf16>
    %10 = vector.shape_cast %9 : vector<1x1x4x8xbf16> to vector<4x8xbf16>
    %cst_10 = arith.constant dense<0.000000e+00> : vector<80x8xf32>
    %11 = tpu.matmul %8, %10, %cst_10 {dimension_numbers = #tpu.dot_dimension_numbers<[1], [0], [0], [1], [0, 0, 1, 1], [], []>} : vector<80x4xbf16>, vector<4x8xbf16>, vector<80x8xf32> -> vector<80x8xf32>
    %c8_11 = arith.constant 8 : index
    %c0_12 = arith.constant 0 : index
    %12 = vector.load %arg14[%c8_11, %c0_12] : memref<96x16xf32, #tpu.memory_space<vmem>>, vector<80x4xf32>
    %13 = arith.truncf %12 : vector<80x4xf32> to vector<80x4xbf16>
    %c0_13 = arith.constant 0 : index
    %c1 = arith.constant 1 : index
    %c0_14 = arith.constant 0 : index
    %c0_15 = arith.constant 0 : index
    %14 = vector.load %arg1[%c0_13, %c1, %c0_14, %c0_15] : memref<3x3x4x8xbf16, #tpu.memory_space<vmem>>, vector<1x1x4x8xbf16>
    %15 = vector.shape_cast %14 : vector<1x1x4x8xbf16> to vector<4x8xbf16>
    %cst_16 = arith.constant dense<0.000000e+00> : vector<80x8xf32>
    %16 = tpu.matmul %13, %15, %cst_16 {dimension_numbers = #tpu.dot_dimension_numbers<[1], [0], [0], [1], [0, 0, 1, 1], [], []>} : vector<80x4xbf16>, vector<4x8xbf16>, vector<80x8xf32> -> vector<80x8xf32>
    %17 = arith.addf %11, %16 : vector<80x8xf32>
    %c9 = arith.constant 9 : index
    %c0_17 = arith.constant 0 : index
    %18 = vector.load %arg14[%c9, %c0_17] : memref<96x16xf32, #tpu.memory_space<vmem>>, vector<80x4xf32>
    %19 = arith.truncf %18 : vector<80x4xf32> to vector<80x4xbf16>
    %c0_18 = arith.constant 0 : index
    %c2 = arith.constant 2 : index
    %c0_19 = arith.constant 0 : index
    %c0_20 = arith.constant 0 : index
    %20 = vector.load %arg1[%c0_18, %c2, %c0_19, %c0_20] : memref<3x3x4x8xbf16, #tpu.memory_space<vmem>>, vector<1x1x4x8xbf16>
    %21 = vector.shape_cast %20 : vector<1x1x4x8xbf16> to vector<4x8xbf16>
    %cst_21 = arith.constant dense<0.000000e+00> : vector<80x8xf32>
    %22 = tpu.matmul %19, %21, %cst_21 {dimension_numbers = #tpu.dot_dimension_numbers<[1], [0], [0], [1], [0, 0, 1, 1], [], []>} : vector<80x4xbf16>, vector<4x8xbf16>, vector<80x8xf32> -> vector<80x8xf32>
    %23 = arith.addf %17, %22 : vector<80x8xf32>
    %c0_22 = arith.constant 0 : index
    %c0_23 = arith.constant 0 : index
    %c0_24 = arith.constant 0 : index
    %24 = vector.load %arg2[%c0_22, %c0_23, %c0_24] : memref<3x1x8xf32, #tpu.memory_space<vmem>>, vector<1x1x8xf32>
    %25 = vector.shape_cast %24 : vector<1x1x8xf32> to vector<1x8xf32>
    %26 = vector.broadcast %25 : vector<1x8xf32> to vector<80x8xf32>
    %27 = arith.addf %23, %26 : vector<80x8xf32>
    %cst_25 = arith.constant 0.000000e+00 : f32
    %28 = vector.broadcast %cst_25 : f32 to vector<80x8xf32>
    %29 = arith.maximumf %27, %28 : vector<80x8xf32>
    %30 = vector.extract_strided_slice %29 {offsets = [0, 0], sizes = [32, 8], strides = [1, 1]} : vector<80x8xf32> to vector<32x8xf32>
    %c8_26 = arith.constant 8 : index
    %c0_27 = arith.constant 0 : index
    %31 = vector.load %arg14[%c8_26, %c0_27] : memref<96x16xf32, #tpu.memory_space<vmem>>, vector<32x8xf32>
    tpu.vector_store %arg14[%c8_26, %c0_27], %30 {strides = array<i32>} : memref<96x16xf32, #tpu.memory_space<vmem>>, vector<32x8xf32>,
    %32 = vector.extract_strided_slice %29 {offsets = [48, 0], sizes = [32, 8], strides = [1, 1]} : vector<80x8xf32> to vector<32x8xf32>
    %c56_28 = arith.constant 56 : index
    %c0_29 = arith.constant 0 : index
    %33 = vector.load %arg14[%c56_28, %c0_29] : memref<96x16xf32, #tpu.memory_space<vmem>>, vector<32x8xf32>
    tpu.vector_store %arg14[%c56_28, %c0_29], %32 {strides = array<i32>} : memref<96x16xf32, #tpu.memory_space<vmem>>, vector<32x8xf32>,
    %c7_30 = arith.constant 7 : index
    %c0_31 = arith.constant 0 : index
    %34 = vector.load %arg14[%c7_30, %c0_31] : memref<96x16xf32, #tpu.memory_space<vmem>>, vector<80x8xf32>
    %35 = arith.truncf %34 : vector<80x8xf32> to vector<80x8xbf16>
    %c0_32 = arith.constant 0 : index
    %c0_33 = arith.constant 0 : index
    %c0_34 = arith.constant 0 : index
    %c0_35 = arith.constant 0 : index
    %36 = vector.load %arg3[%c0_32, %c0_33, %c0_34, %c0_35] : memref<3x3x8x8xbf16, #tpu.memory_space<vmem>>, vector<1x1x8x8xbf16>
    %37 = vector.shape_cast %36 : vector<1x1x8x8xbf16> to vector<8x8xbf16>
    %cst_36 = arith.constant dense<0.000000e+00> : vector<80x8xf32>
    %38 = tpu.matmul %35, %37, %cst_36 {dimension_numbers = #tpu.dot_dimension_numbers<[1], [0], [0], [1], [0, 0, 1, 1], [], []>} : vector<80x8xbf16>, vector<8x8xbf16>, vector<80x8xf32> -> vector<80x8xf32>
    %c8_37 = arith.constant 8 : index
    %c0_38 = arith.constant 0 : index
    %39 = vector.load %arg14[%c8_37, %c0_38] : memref<96x16xf32, #tpu.memory_space<vmem>>, vector<80x8xf32>
    %40 = arith.truncf %39 : vector<80x8xf32> to vector<80x8xbf16>
    %c0_39 = arith.constant 0 : index
    %c1_40 = arith.constant 1 : index
    %c0_41 = arith.constant 0 : index
    %c0_42 = arith.constant 0 : index
    %41 = vector.load %arg3[%c0_39, %c1_40, %c0_41, %c0_42] : memref<3x3x8x8xbf16, #tpu.memory_space<vmem>>, vector<1x1x8x8xbf16>
    %42 = vector.shape_cast %41 : vector<1x1x8x8xbf16> to vector<8x8xbf16>
    %cst_43 = arith.constant dense<0.000000e+00> : vector<80x8xf32>
    %43 = tpu.matmul %40, %42, %cst_43 {dimension_numbers = #tpu.dot_dimension_numbers<[1], [0], [0], [1], [0, 0, 1, 1], [], []>} : vector<80x8xbf16>, vector<8x8xbf16>, vector<80x8xf32> -> vector<80x8xf32>
    %44 = arith.addf %38, %43 : vector<80x8xf32>
    %c9_44 = arith.constant 9 : index
    %c0_45 = arith.constant 0 : index
    %45 = vector.load %arg14[%c9_44, %c0_45] : memref<96x16xf32, #tpu.memory_space<vmem>>, vector<80x8xf32>
    %46 = arith.truncf %45 : vector<80x8xf32> to vector<80x8xbf16>
    %c0_46 = arith.constant 0 : index
    %c2_47 = arith.constant 2 : index
    %c0_48 = arith.constant 0 : index
    %c0_49 = arith.constant 0 : index
    %47 = vector.load %arg3[%c0_46, %c2_47, %c0_48, %c0_49] : memref<3x3x8x8xbf16, #tpu.memory_space<vmem>>, vector<1x1x8x8xbf16>
    %48 = vector.shape_cast %47 : vector<1x1x8x8xbf16> to vector<8x8xbf16>
    %cst_50 = arith.constant dense<0.000000e+00> : vector<80x8xf32>
    %49 = tpu.matmul %46, %48, %cst_50 {dimension_numbers = #tpu.dot_dimension_numbers<[1], [0], [0], [1], [0, 0, 1, 1], [], []>} : vector<80x8xbf16>, vector<8x8xbf16>, vector<80x8xf32> -> vector<80x8xf32>
    %50 = arith.addf %44, %49 : vector<80x8xf32>
    %c0_51 = arith.constant 0 : index
    %c0_52 = arith.constant 0 : index
    %c0_53 = arith.constant 0 : index
    %51 = vector.load %arg4[%c0_51, %c0_52, %c0_53] : memref<3x1x8xf32, #tpu.memory_space<vmem>>, vector<1x1x8xf32>
    %52 = vector.shape_cast %51 : vector<1x1x8xf32> to vector<1x8xf32>
    %53 = vector.broadcast %52 : vector<1x8xf32> to vector<80x8xf32>
    %54 = arith.addf %50, %53 : vector<80x8xf32>
    %cst_54 = arith.constant 0.000000e+00 : f32
    %55 = vector.broadcast %cst_54 : f32 to vector<80x8xf32>
    %56 = arith.maximumf %54, %55 : vector<80x8xf32>
    %c0_55 = arith.constant 0 : index
    %c0_56 = arith.constant 0 : index
    %c0_57 = arith.constant 0 : index
    %57 = vector.load %arg5[%c0_55, %c0_56, %c0_57] : memref<3x1x8xf32, #tpu.memory_space<vmem>>, vector<1x1x8xf32>
    %58 = vector.shape_cast %57 : vector<1x1x8xf32> to vector<1x8xf32>
    %c0_58 = arith.constant 0 : index
    %c0_59 = arith.constant 0 : index
    %c0_60 = arith.constant 0 : index
    %59 = vector.load %arg6[%c0_58, %c0_59, %c0_60] : memref<3x1x8xf32, #tpu.memory_space<vmem>>, vector<1x1x8xf32>
    %60 = vector.shape_cast %59 : vector<1x1x8xf32> to vector<1x8xf32>
    %61 = vector.extract_strided_slice %56 {offsets = [0, 0], sizes = [32, 8], strides = [1, 1]} : vector<80x8xf32> to vector<32x8xf32>
    %62 = vector.broadcast %58 : vector<1x8xf32> to vector<32x8xf32>
    %63 = arith.mulf %61, %62 : vector<32x8xf32>
    %64 = vector.broadcast %60 : vector<1x8xf32> to vector<32x8xf32>
    %65 = arith.addf %63, %64 : vector<32x8xf32>
    %66 = vector.shape_cast %65 : vector<32x8xf32> to vector<16x2x8xf32>
    %cst_61 = arith.constant dense<0xFF800000> : vector<16x8xf32>
    %67 = vector.multi_reduction <maximumf>, %66, %cst_61 [1] : vector<16x2x8xf32> to vector<16x8xf32>
    %68 = vector.extract_strided_slice %56 {offsets = [48, 0], sizes = [32, 8], strides = [1, 1]} : vector<80x8xf32> to vector<32x8xf32>
    %69 = vector.broadcast %58 : vector<1x8xf32> to vector<32x8xf32>
    %70 = arith.mulf %68, %69 : vector<32x8xf32>
    %71 = vector.broadcast %60 : vector<1x8xf32> to vector<32x8xf32>
    %72 = arith.addf %70, %71 : vector<32x8xf32>
    %73 = vector.shape_cast %72 : vector<32x8xf32> to vector<16x2x8xf32>
    %cst_62 = arith.constant dense<0xFF800000> : vector<16x8xf32>
    %74 = vector.multi_reduction <maximumf>, %73, %cst_62 [1] : vector<16x2x8xf32> to vector<16x8xf32>
    %75 = tpu.concatenate %67, %74 in 0 : vector<16x8xf32>, vector<16x8xf32> -> vector<32x8xf32>
    %cst_63 = arith.constant 0.000000e+00 : f32
    %76 = vector.broadcast %cst_63 : f32 to vector<8x16xf32>
    %c24 = arith.constant 24 : index
    %c0_64 = arith.constant 0 : index
    %77 = vector.load %arg14[%c24, %c0_64] : memref<96x16xf32, #tpu.memory_space<vmem>>, vector<8x16xf32>
    tpu.vector_store %arg14[%c24, %c0_64], %76 {strides = array<i32>} : memref<96x16xf32, #tpu.memory_space<vmem>>, vector<8x16xf32>,
    %cst_65 = arith.constant 0.000000e+00 : f32
    %78 = vector.broadcast %cst_65 : f32 to vector<8x16xf32>
    %c72 = arith.constant 72 : index
    %c0_66 = arith.constant 0 : index
    %79 = vector.load %arg14[%c72, %c0_66] : memref<96x16xf32, #tpu.memory_space<vmem>>, vector<8x16xf32>
    tpu.vector_store %arg14[%c72, %c0_66], %78 {strides = array<i32>} : memref<96x16xf32, #tpu.memory_space<vmem>>, vector<8x16xf32>,
    %80 = vector.extract_strided_slice %75 {offsets = [0, 0], sizes = [16, 8], strides = [1, 1]} : vector<32x8xf32> to vector<16x8xf32>
    %c8_67 = arith.constant 8 : index
    %c0_68 = arith.constant 0 : index
    %81 = vector.load %arg14[%c8_67, %c0_68] : memref<96x16xf32, #tpu.memory_space<vmem>>, vector<16x8xf32>
    tpu.vector_store %arg14[%c8_67, %c0_68], %80 {strides = array<i32>} : memref<96x16xf32, #tpu.memory_space<vmem>>, vector<16x8xf32>,
    %82 = vector.extract_strided_slice %75 {offsets = [16, 0], sizes = [16, 8], strides = [1, 1]} : vector<32x8xf32> to vector<16x8xf32>
    %c56_69 = arith.constant 56 : index
    %c0_70 = arith.constant 0 : index
    %83 = vector.load %arg14[%c56_69, %c0_70] : memref<96x16xf32, #tpu.memory_space<vmem>>, vector<16x8xf32>
    tpu.vector_store %arg14[%c56_69, %c0_70], %82 {strides = array<i32>} : memref<96x16xf32, #tpu.memory_space<vmem>>, vector<16x8xf32>,
    %c6 = arith.constant 6 : index
    %c0_71 = arith.constant 0 : index
    %84 = vector.load %arg14[%c6, %c0_71] : memref<96x16xf32, #tpu.memory_space<vmem>>, vector<64x8xf32>
    %85 = arith.truncf %84 : vector<64x8xf32> to vector<64x8xbf16>
    %c0_72 = arith.constant 0 : index
    %c0_73 = arith.constant 0 : index
    %c0_74 = arith.constant 0 : index
    %c0_75 = arith.constant 0 : index
    %86 = vector.load %arg7[%c0_72, %c0_73, %c0_74, %c0_75] : memref<3x3x8x16xbf16, #tpu.memory_space<vmem>>, vector<1x1x8x16xbf16>
    %87 = vector.shape_cast %86 : vector<1x1x8x16xbf16> to vector<8x16xbf16>
    %cst_76 = arith.constant dense<0.000000e+00> : vector<64x16xf32>
    %88 = tpu.matmul %85, %87, %cst_76 {dimension_numbers = #tpu.dot_dimension_numbers<[1], [0], [0], [1], [0, 0, 1, 1], [], []>} : vector<64x8xbf16>, vector<8x16xbf16>, vector<64x16xf32> -> vector<64x16xf32>
    %c8_77 = arith.constant 8 : index
    %c0_78 = arith.constant 0 : index
    %89 = vector.load %arg14[%c8_77, %c0_78] : memref<96x16xf32, #tpu.memory_space<vmem>>, vector<64x8xf32>
    %90 = arith.truncf %89 : vector<64x8xf32> to vector<64x8xbf16>
    %c0_79 = arith.constant 0 : index
    %c1_80 = arith.constant 1 : index
    %c0_81 = arith.constant 0 : index
    %c0_82 = arith.constant 0 : index
    %91 = vector.load %arg7[%c0_79, %c1_80, %c0_81, %c0_82] : memref<3x3x8x16xbf16, #tpu.memory_space<vmem>>, vector<1x1x8x16xbf16>
    %92 = vector.shape_cast %91 : vector<1x1x8x16xbf16> to vector<8x16xbf16>
    %cst_83 = arith.constant dense<0.000000e+00> : vector<64x16xf32>
    %93 = tpu.matmul %90, %92, %cst_83 {dimension_numbers = #tpu.dot_dimension_numbers<[1], [0], [0], [1], [0, 0, 1, 1], [], []>} : vector<64x8xbf16>, vector<8x16xbf16>, vector<64x16xf32> -> vector<64x16xf32>
    %94 = arith.addf %88, %93 : vector<64x16xf32>
    %c10 = arith.constant 10 : index
    %c0_84 = arith.constant 0 : index
    %95 = vector.load %arg14[%c10, %c0_84] : memref<96x16xf32, #tpu.memory_space<vmem>>, vector<64x8xf32>
    %96 = arith.truncf %95 : vector<64x8xf32> to vector<64x8xbf16>
    %c0_85 = arith.constant 0 : index
    %c2_86 = arith.constant 2 : index
    %c0_87 = arith.constant 0 : index
    %c0_88 = arith.constant 0 : index
    %97 = vector.load %arg7[%c0_85, %c2_86, %c0_87, %c0_88] : memref<3x3x8x16xbf16, #tpu.memory_space<vmem>>, vector<1x1x8x16xbf16>
    %98 = vector.shape_cast %97 : vector<1x1x8x16xbf16> to vector<8x16xbf16>
    %cst_89 = arith.constant dense<0.000000e+00> : vector<64x16xf32>
    %99 = tpu.matmul %96, %98, %cst_89 {dimension_numbers = #tpu.dot_dimension_numbers<[1], [0], [0], [1], [0, 0, 1, 1], [], []>} : vector<64x8xbf16>, vector<8x16xbf16>, vector<64x16xf32> -> vector<64x16xf32>
    %100 = arith.addf %94, %99 : vector<64x16xf32>
    %c0_90 = arith.constant 0 : index
    %c0_91 = arith.constant 0 : index
    %c0_92 = arith.constant 0 : index
    %101 = vector.load %arg8[%c0_90, %c0_91, %c0_92] : memref<3x1x16xf32, #tpu.memory_space<vmem>>, vector<1x1x16xf32>
    %102 = vector.shape_cast %101 : vector<1x1x16xf32> to vector<1x16xf32>
    %103 = vector.broadcast %102 : vector<1x16xf32> to vector<64x16xf32>
    %104 = arith.addf %100, %103 : vector<64x16xf32>
    %cst_93 = arith.constant 0.000000e+00 : f32
    %105 = vector.broadcast %cst_93 : f32 to vector<64x16xf32>
    %106 = arith.maximumf %104, %105 : vector<64x16xf32>
    %107 = vector.extract_strided_slice %106 {offsets = [0, 0], sizes = [16, 16], strides = [1, 1]} : vector<64x16xf32> to vector<16x16xf32>
    %c8_94 = arith.constant 8 : index
    %c0_95 = arith.constant 0 : index
    %108 = vector.load %arg14[%c8_94, %c0_95] : memref<96x16xf32, #tpu.memory_space<vmem>>, vector<16x16xf32>
    tpu.vector_store %arg14[%c8_94, %c0_95], %107 {strides = array<i32>} : memref<96x16xf32, #tpu.memory_space<vmem>>, vector<16x16xf32>,
    %109 = vector.extract_strided_slice %106 {offsets = [48, 0], sizes = [16, 16], strides = [1, 1]} : vector<64x16xf32> to vector<16x16xf32>
    %c56_96 = arith.constant 56 : index
    %c0_97 = arith.constant 0 : index
    %110 = vector.load %arg14[%c56_96, %c0_97] : memref<96x16xf32, #tpu.memory_space<vmem>>, vector<16x16xf32>
    tpu.vector_store %arg14[%c56_96, %c0_97], %109 {strides = array<i32>} : memref<96x16xf32, #tpu.memory_space<vmem>>, vector<16x16xf32>,
    %c6_98 = arith.constant 6 : index
    %c0_99 = arith.constant 0 : index
    %111 = vector.load %arg14[%c6_98, %c0_99] : memref<96x16xf32, #tpu.memory_space<vmem>>, vector<64x16xf32>
    %112 = arith.truncf %111 : vector<64x16xf32> to vector<64x16xbf16>
    %c0_100 = arith.constant 0 : index
    %c0_101 = arith.constant 0 : index
    %c0_102 = arith.constant 0 : index
    %c0_103 = arith.constant 0 : index
    %113 = vector.load %arg9[%c0_100, %c0_101, %c0_102, %c0_103] : memref<3x3x16x16xbf16, #tpu.memory_space<vmem>>, vector<1x1x16x16xbf16>
    %114 = vector.shape_cast %113 : vector<1x1x16x16xbf16> to vector<16x16xbf16>
    %cst_104 = arith.constant dense<0.000000e+00> : vector<64x16xf32>
    %115 = tpu.matmul %112, %114, %cst_104 {dimension_numbers = #tpu.dot_dimension_numbers<[1], [0], [0], [1], [0, 0, 1, 1], [], []>} : vector<64x16xbf16>, vector<16x16xbf16>, vector<64x16xf32> -> vector<64x16xf32>
    %c8_105 = arith.constant 8 : index
    %c0_106 = arith.constant 0 : index
    %116 = vector.load %arg14[%c8_105, %c0_106] : memref<96x16xf32, #tpu.memory_space<vmem>>, vector<64x16xf32>
    %117 = arith.truncf %116 : vector<64x16xf32> to vector<64x16xbf16>
    %c0_107 = arith.constant 0 : index
    %c1_108 = arith.constant 1 : index
    %c0_109 = arith.constant 0 : index
    %c0_110 = arith.constant 0 : index
    %118 = vector.load %arg9[%c0_107, %c1_108, %c0_109, %c0_110] : memref<3x3x16x16xbf16, #tpu.memory_space<vmem>>, vector<1x1x16x16xbf16>
    %119 = vector.shape_cast %118 : vector<1x1x16x16xbf16> to vector<16x16xbf16>
    %cst_111 = arith.constant dense<0.000000e+00> : vector<64x16xf32>
    %120 = tpu.matmul %117, %119, %cst_111 {dimension_numbers = #tpu.dot_dimension_numbers<[1], [0], [0], [1], [0, 0, 1, 1], [], []>} : vector<64x16xbf16>, vector<16x16xbf16>, vector<64x16xf32> -> vector<64x16xf32>
    %121 = arith.addf %115, %120 : vector<64x16xf32>
    %c10_112 = arith.constant 10 : index
    %c0_113 = arith.constant 0 : index
    %122 = vector.load %arg14[%c10_112, %c0_113] : memref<96x16xf32, #tpu.memory_space<vmem>>, vector<64x16xf32>
    %123 = arith.truncf %122 : vector<64x16xf32> to vector<64x16xbf16>
    %c0_114 = arith.constant 0 : index
    %c2_115 = arith.constant 2 : index
    %c0_116 = arith.constant 0 : index
    %c0_117 = arith.constant 0 : index
    %124 = vector.load %arg9[%c0_114, %c2_115, %c0_116, %c0_117] : memref<3x3x16x16xbf16, #tpu.memory_space<vmem>>, vector<1x1x16x16xbf16>
    %125 = vector.shape_cast %124 : vector<1x1x16x16xbf16> to vector<16x16xbf16>
    %cst_118 = arith.constant dense<0.000000e+00> : vector<64x16xf32>
    %126 = tpu.matmul %123, %125, %cst_118 {dimension_numbers = #tpu.dot_dimension_numbers<[1], [0], [0], [1], [0, 0, 1, 1], [], []>} : vector<64x16xbf16>, vector<16x16xbf16>, vector<64x16xf32> -> vector<64x16xf32>
    %127 = arith.addf %121, %126 : vector<64x16xf32>
    %c0_119 = arith.constant 0 : index
    %c0_120 = arith.constant 0 : index
    %c0_121 = arith.constant 0 : index
    %128 = vector.load %arg10[%c0_119, %c0_120, %c0_121] : memref<3x1x16xf32, #tpu.memory_space<vmem>>, vector<1x1x16xf32>
    %129 = vector.shape_cast %128 : vector<1x1x16xf32> to vector<1x16xf32>
    %130 = vector.broadcast %129 : vector<1x16xf32> to vector<64x16xf32>
    %131 = arith.addf %127, %130 : vector<64x16xf32>
    %cst_122 = arith.constant 0.000000e+00 : f32
    %132 = vector.broadcast %cst_122 : f32 to vector<64x16xf32>
    %133 = arith.maximumf %131, %132 : vector<64x16xf32>
    %c0_123 = arith.constant 0 : index
    %c0_124 = arith.constant 0 : index
    %c0_125 = arith.constant 0 : index
    %134 = vector.load %arg11[%c0_123, %c0_124, %c0_125] : memref<3x1x16xf32, #tpu.memory_space<vmem>>, vector<1x1x16xf32>
    %135 = vector.shape_cast %134 : vector<1x1x16xf32> to vector<1x16xf32>
    %c0_126 = arith.constant 0 : index
    %c0_127 = arith.constant 0 : index
    %c0_128 = arith.constant 0 : index
    %136 = vector.load %arg12[%c0_126, %c0_127, %c0_128] : memref<3x1x16xf32, #tpu.memory_space<vmem>>, vector<1x1x16xf32>
    %137 = vector.shape_cast %136 : vector<1x1x16xf32> to vector<1x16xf32>
    %138 = vector.extract_strided_slice %133 {offsets = [0, 0], sizes = [16, 16], strides = [1, 1]} : vector<64x16xf32> to vector<16x16xf32>
    %139 = vector.broadcast %135 : vector<1x16xf32> to vector<16x16xf32>
    %140 = arith.mulf %138, %139 : vector<16x16xf32>
    %141 = vector.broadcast %137 : vector<1x16xf32> to vector<16x16xf32>
    %142 = arith.addf %140, %141 : vector<16x16xf32>
    %143 = vector.shape_cast %142 : vector<16x16xf32> to vector<8x2x16xf32>
    %cst_129 = arith.constant dense<0xFF800000> : vector<8x16xf32>
    %144 = vector.multi_reduction <maximumf>, %143, %cst_129 [1] : vector<8x2x16xf32> to vector<8x16xf32>
    %145 = vector.extract_strided_slice %133 {offsets = [48, 0], sizes = [16, 16], strides = [1, 1]} : vector<64x16xf32> to vector<16x16xf32>
    %146 = vector.broadcast %135 : vector<1x16xf32> to vector<16x16xf32>
    %147 = arith.mulf %145, %146 : vector<16x16xf32>
    %148 = vector.broadcast %137 : vector<1x16xf32> to vector<16x16xf32>
    %149 = arith.addf %147, %148 : vector<16x16xf32>
    %150 = vector.shape_cast %149 : vector<16x16xf32> to vector<8x2x16xf32>
    %cst_130 = arith.constant dense<0xFF800000> : vector<8x16xf32>
    %151 = vector.multi_reduction <maximumf>, %150, %cst_130 [1] : vector<8x2x16xf32> to vector<8x16xf32>
    %152 = tpu.concatenate %144, %151 in 0 : vector<8x16xf32>, vector<8x16xf32> -> vector<16x16xf32>
    %153 = vector.extract_strided_slice %2 {offsets = [0, 0], sizes = [32, 4], strides = [1, 1]} : vector<64x4xf32> to vector<32x4xf32>
    %c8_131 = arith.constant 8 : index
    %c0_132 = arith.constant 0 : index
    %154 = vector.load %arg14[%c8_131, %c0_132] : memref<96x16xf32, #tpu.memory_space<vmem>>, vector<32x4xf32>
    tpu.vector_store %arg14[%c8_131, %c0_132], %153 {strides = array<i32>} : memref<96x16xf32, #tpu.memory_space<vmem>>, vector<32x4xf32>,
    %155 = vector.extract_strided_slice %2 {offsets = [32, 0], sizes = [32, 4], strides = [1, 1]} : vector<64x4xf32> to vector<32x4xf32>
    %c56_133 = arith.constant 56 : index
    %c0_134 = arith.constant 0 : index
    %156 = vector.load %arg14[%c56_133, %c0_134] : memref<96x16xf32, #tpu.memory_space<vmem>>, vector<32x4xf32>
    tpu.vector_store %arg14[%c56_133, %c0_134], %155 {strides = array<i32>} : memref<96x16xf32, #tpu.memory_space<vmem>>, vector<32x4xf32>,
    %c7_135 = arith.constant 7 : index
    %c0_136 = arith.constant 0 : index
    %157 = vector.load %arg14[%c7_135, %c0_136] : memref<96x16xf32, #tpu.memory_space<vmem>>, vector<80x4xf32>
    %158 = arith.truncf %157 : vector<80x4xf32> to vector<80x4xbf16>
    %c1_137 = arith.constant 1 : index
    %c0_138 = arith.constant 0 : index
    %c0_139 = arith.constant 0 : index
    %c0_140 = arith.constant 0 : index
    %159 = vector.load %arg1[%c1_137, %c0_138, %c0_139, %c0_140] : memref<3x3x4x8xbf16, #tpu.memory_space<vmem>>, vector<1x1x4x8xbf16>
    %160 = vector.shape_cast %159 : vector<1x1x4x8xbf16> to vector<4x8xbf16>
    %cst_141 = arith.constant dense<0.000000e+00> : vector<80x8xf32>
    %161 = tpu.matmul %158, %160, %cst_141 {dimension_numbers = #tpu.dot_dimension_numbers<[1], [0], [0], [1], [0, 0, 1, 1], [], []>} : vector<80x4xbf16>, vector<4x8xbf16>, vector<80x8xf32> -> vector<80x8xf32>
    %c8_142 = arith.constant 8 : index
    %c0_143 = arith.constant 0 : index
    %162 = vector.load %arg14[%c8_142, %c0_143] : memref<96x16xf32, #tpu.memory_space<vmem>>, vector<80x4xf32>
    %163 = arith.truncf %162 : vector<80x4xf32> to vector<80x4xbf16>
    %c1_144 = arith.constant 1 : index
    %c1_145 = arith.constant 1 : index
    %c0_146 = arith.constant 0 : index
    %c0_147 = arith.constant 0 : index
    %164 = vector.load %arg1[%c1_144, %c1_145, %c0_146, %c0_147] : memref<3x3x4x8xbf16, #tpu.memory_space<vmem>>, vector<1x1x4x8xbf16>
    %165 = vector.shape_cast %164 : vector<1x1x4x8xbf16> to vector<4x8xbf16>
    %cst_148 = arith.constant dense<0.000000e+00> : vector<80x8xf32>
    %166 = tpu.matmul %163, %165, %cst_148 {dimension_numbers = #tpu.dot_dimension_numbers<[1], [0], [0], [1], [0, 0, 1, 1], [], []>} : vector<80x4xbf16>, vector<4x8xbf16>, vector<80x8xf32> -> vector<80x8xf32>
    %167 = arith.addf %161, %166 : vector<80x8xf32>
    %c9_149 = arith.constant 9 : index
    %c0_150 = arith.constant 0 : index
    %168 = vector.load %arg14[%c9_149, %c0_150] : memref<96x16xf32, #tpu.memory_space<vmem>>, vector<80x4xf32>
    %169 = arith.truncf %168 : vector<80x4xf32> to vector<80x4xbf16>
    %c1_151 = arith.constant 1 : index
    %c2_152 = arith.constant 2 : index
    %c0_153 = arith.constant 0 : index
    %c0_154 = arith.constant 0 : index
    %170 = vector.load %arg1[%c1_151, %c2_152, %c0_153, %c0_154] : memref<3x3x4x8xbf16, #tpu.memory_space<vmem>>, vector<1x1x4x8xbf16>
    %171 = vector.shape_cast %170 : vector<1x1x4x8xbf16> to vector<4x8xbf16>
    %cst_155 = arith.constant dense<0.000000e+00> : vector<80x8xf32>
    %172 = tpu.matmul %169, %171, %cst_155 {dimension_numbers = #tpu.dot_dimension_numbers<[1], [0], [0], [1], [0, 0, 1, 1], [], []>} : vector<80x4xbf16>, vector<4x8xbf16>, vector<80x8xf32> -> vector<80x8xf32>
    %173 = arith.addf %167, %172 : vector<80x8xf32>
    %c1_156 = arith.constant 1 : index
    %c0_157 = arith.constant 0 : index
    %c0_158 = arith.constant 0 : index
    %174 = vector.load %arg2[%c1_156, %c0_157, %c0_158] : memref<3x1x8xf32, #tpu.memory_space<vmem>>, vector<1x1x8xf32>
    %175 = vector.shape_cast %174 : vector<1x1x8xf32> to vector<1x8xf32>
    %176 = vector.broadcast %175 : vector<1x8xf32> to vector<80x8xf32>
    %177 = arith.addf %173, %176 : vector<80x8xf32>
    %cst_159 = arith.constant 0.000000e+00 : f32
    %178 = vector.broadcast %cst_159 : f32 to vector<80x8xf32>
    %179 = arith.maximumf %177, %178 : vector<80x8xf32>
    %180 = vector.extract_strided_slice %179 {offsets = [0, 0], sizes = [32, 8], strides = [1, 1]} : vector<80x8xf32> to vector<32x8xf32>
    %c8_160 = arith.constant 8 : index
    %c0_161 = arith.constant 0 : index
    %181 = vector.load %arg14[%c8_160, %c0_161] : memref<96x16xf32, #tpu.memory_space<vmem>>, vector<32x8xf32>
    tpu.vector_store %arg14[%c8_160, %c0_161], %180 {strides = array<i32>} : memref<96x16xf32, #tpu.memory_space<vmem>>, vector<32x8xf32>,
    %182 = vector.extract_strided_slice %179 {offsets = [48, 0], sizes = [32, 8], strides = [1, 1]} : vector<80x8xf32> to vector<32x8xf32>
    %c56_162 = arith.constant 56 : index
    %c0_163 = arith.constant 0 : index
    %183 = vector.load %arg14[%c56_162, %c0_163] : memref<96x16xf32, #tpu.memory_space<vmem>>, vector<32x8xf32>
    tpu.vector_store %arg14[%c56_162, %c0_163], %182 {strides = array<i32>} : memref<96x16xf32, #tpu.memory_space<vmem>>, vector<32x8xf32>,
    %c7_164 = arith.constant 7 : index
    %c0_165 = arith.constant 0 : index
    %184 = vector.load %arg14[%c7_164, %c0_165] : memref<96x16xf32, #tpu.memory_space<vmem>>, vector<80x8xf32>
    %185 = arith.truncf %184 : vector<80x8xf32> to vector<80x8xbf16>
    %c1_166 = arith.constant 1 : index
    %c0_167 = arith.constant 0 : index
    %c0_168 = arith.constant 0 : index
    %c0_169 = arith.constant 0 : index
    %186 = vector.load %arg3[%c1_166, %c0_167, %c0_168, %c0_169] : memref<3x3x8x8xbf16, #tpu.memory_space<vmem>>, vector<1x1x8x8xbf16>
    %187 = vector.shape_cast %186 : vector<1x1x8x8xbf16> to vector<8x8xbf16>
    %cst_170 = arith.constant dense<0.000000e+00> : vector<80x8xf32>
    %188 = tpu.matmul %185, %187, %cst_170 {dimension_numbers = #tpu.dot_dimension_numbers<[1], [0], [0], [1], [0, 0, 1, 1], [], []>} : vector<80x8xbf16>, vector<8x8xbf16>, vector<80x8xf32> -> vector<80x8xf32>
    %c8_171 = arith.constant 8 : index
    %c0_172 = arith.constant 0 : index
    %189 = vector.load %arg14[%c8_171, %c0_172] : memref<96x16xf32, #tpu.memory_space<vmem>>, vector<80x8xf32>
    %190 = arith.truncf %189 : vector<80x8xf32> to vector<80x8xbf16>
    %c1_173 = arith.constant 1 : index
    %c1_174 = arith.constant 1 : index
    %c0_175 = arith.constant 0 : index
    %c0_176 = arith.constant 0 : index
    %191 = vector.load %arg3[%c1_173, %c1_174, %c0_175, %c0_176] : memref<3x3x8x8xbf16, #tpu.memory_space<vmem>>, vector<1x1x8x8xbf16>
    %192 = vector.shape_cast %191 : vector<1x1x8x8xbf16> to vector<8x8xbf16>
    %cst_177 = arith.constant dense<0.000000e+00> : vector<80x8xf32>
    %193 = tpu.matmul %190, %192, %cst_177 {dimension_numbers = #tpu.dot_dimension_numbers<[1], [0], [0], [1], [0, 0, 1, 1], [], []>} : vector<80x8xbf16>, vector<8x8xbf16>, vector<80x8xf32> -> vector<80x8xf32>
    %194 = arith.addf %188, %193 : vector<80x8xf32>
    %c9_178 = arith.constant 9 : index
    %c0_179 = arith.constant 0 : index
    %195 = vector.load %arg14[%c9_178, %c0_179] : memref<96x16xf32, #tpu.memory_space<vmem>>, vector<80x8xf32>
    %196 = arith.truncf %195 : vector<80x8xf32> to vector<80x8xbf16>
    %c1_180 = arith.constant 1 : index
    %c2_181 = arith.constant 2 : index
    %c0_182 = arith.constant 0 : index
    %c0_183 = arith.constant 0 : index
    %197 = vector.load %arg3[%c1_180, %c2_181, %c0_182, %c0_183] : memref<3x3x8x8xbf16, #tpu.memory_space<vmem>>, vector<1x1x8x8xbf16>
    %198 = vector.shape_cast %197 : vector<1x1x8x8xbf16> to vector<8x8xbf16>
    %cst_184 = arith.constant dense<0.000000e+00> : vector<80x8xf32>
    %199 = tpu.matmul %196, %198, %cst_184 {dimension_numbers = #tpu.dot_dimension_numbers<[1], [0], [0], [1], [0, 0, 1, 1], [], []>} : vector<80x8xbf16>, vector<8x8xbf16>, vector<80x8xf32> -> vector<80x8xf32>
    %200 = arith.addf %194, %199 : vector<80x8xf32>
    %c1_185 = arith.constant 1 : index
    %c0_186 = arith.constant 0 : index
    %c0_187 = arith.constant 0 : index
    %201 = vector.load %arg4[%c1_185, %c0_186, %c0_187] : memref<3x1x8xf32, #tpu.memory_space<vmem>>, vector<1x1x8xf32>
    %202 = vector.shape_cast %201 : vector<1x1x8xf32> to vector<1x8xf32>
    %203 = vector.broadcast %202 : vector<1x8xf32> to vector<80x8xf32>
    %204 = arith.addf %200, %203 : vector<80x8xf32>
    %cst_188 = arith.constant 0.000000e+00 : f32
    %205 = vector.broadcast %cst_188 : f32 to vector<80x8xf32>
    %206 = arith.maximumf %204, %205 : vector<80x8xf32>
    %c1_189 = arith.constant 1 : index
    %c0_190 = arith.constant 0 : index
    %c0_191 = arith.constant 0 : index
    %207 = vector.load %arg5[%c1_189, %c0_190, %c0_191] : memref<3x1x8xf32, #tpu.memory_space<vmem>>, vector<1x1x8xf32>
    %208 = vector.shape_cast %207 : vector<1x1x8xf32> to vector<1x8xf32>
    %c1_192 = arith.constant 1 : index
    %c0_193 = arith.constant 0 : index
    %c0_194 = arith.constant 0 : index
    %209 = vector.load %arg6[%c1_192, %c0_193, %c0_194] : memref<3x1x8xf32, #tpu.memory_space<vmem>>, vector<1x1x8xf32>
    %210 = vector.shape_cast %209 : vector<1x1x8xf32> to vector<1x8xf32>
    %211 = vector.extract_strided_slice %206 {offsets = [0, 0], sizes = [32, 8], strides = [1, 1]} : vector<80x8xf32> to vector<32x8xf32>
    %212 = vector.broadcast %208 : vector<1x8xf32> to vector<32x8xf32>
    %213 = arith.mulf %211, %212 : vector<32x8xf32>
    %214 = vector.broadcast %210 : vector<1x8xf32> to vector<32x8xf32>
    %215 = arith.addf %213, %214 : vector<32x8xf32>
    %216 = vector.shape_cast %215 : vector<32x8xf32> to vector<16x2x8xf32>
    %cst_195 = arith.constant dense<0xFF800000> : vector<16x8xf32>
    %217 = vector.multi_reduction <maximumf>, %216, %cst_195 [1] : vector<16x2x8xf32> to vector<16x8xf32>
    %218 = vector.extract_strided_slice %206 {offsets = [48, 0], sizes = [32, 8], strides = [1, 1]} : vector<80x8xf32> to vector<32x8xf32>
    %219 = vector.broadcast %208 : vector<1x8xf32> to vector<32x8xf32>
    %220 = arith.mulf %218, %219 : vector<32x8xf32>
    %221 = vector.broadcast %210 : vector<1x8xf32> to vector<32x8xf32>
    %222 = arith.addf %220, %221 : vector<32x8xf32>
    %223 = vector.shape_cast %222 : vector<32x8xf32> to vector<16x2x8xf32>
    %cst_196 = arith.constant dense<0xFF800000> : vector<16x8xf32>
    %224 = vector.multi_reduction <maximumf>, %223, %cst_196 [1] : vector<16x2x8xf32> to vector<16x8xf32>
    %225 = tpu.concatenate %217, %224 in 0 : vector<16x8xf32>, vector<16x8xf32> -> vector<32x8xf32>
    %cst_197 = arith.constant 0.000000e+00 : f32
    %226 = vector.broadcast %cst_197 : f32 to vector<8x16xf32>
    %c24_198 = arith.constant 24 : index
    %c0_199 = arith.constant 0 : index
    %227 = vector.load %arg14[%c24_198, %c0_199] : memref<96x16xf32, #tpu.memory_space<vmem>>, vector<8x16xf32>
    tpu.vector_store %arg14[%c24_198, %c0_199], %226 {strides = array<i32>} : memref<96x16xf32, #tpu.memory_space<vmem>>, vector<8x16xf32>,
    %cst_200 = arith.constant 0.000000e+00 : f32
    %228 = vector.broadcast %cst_200 : f32 to vector<8x16xf32>
    %c72_201 = arith.constant 72 : index
    %c0_202 = arith.constant 0 : index
    %229 = vector.load %arg14[%c72_201, %c0_202] : memref<96x16xf32, #tpu.memory_space<vmem>>, vector<8x16xf32>
    tpu.vector_store %arg14[%c72_201, %c0_202], %228 {strides = array<i32>} : memref<96x16xf32, #tpu.memory_space<vmem>>, vector<8x16xf32>,
    %230 = vector.extract_strided_slice %225 {offsets = [0, 0], sizes = [16, 8], strides = [1, 1]} : vector<32x8xf32> to vector<16x8xf32>
    %c8_203 = arith.constant 8 : index
    %c0_204 = arith.constant 0 : index
    %231 = vector.load %arg14[%c8_203, %c0_204] : memref<96x16xf32, #tpu.memory_space<vmem>>, vector<16x8xf32>
    tpu.vector_store %arg14[%c8_203, %c0_204], %230 {strides = array<i32>} : memref<96x16xf32, #tpu.memory_space<vmem>>, vector<16x8xf32>,
    %232 = vector.extract_strided_slice %225 {offsets = [16, 0], sizes = [16, 8], strides = [1, 1]} : vector<32x8xf32> to vector<16x8xf32>
    %c56_205 = arith.constant 56 : index
    %c0_206 = arith.constant 0 : index
    %233 = vector.load %arg14[%c56_205, %c0_206] : memref<96x16xf32, #tpu.memory_space<vmem>>, vector<16x8xf32>
    tpu.vector_store %arg14[%c56_205, %c0_206], %232 {strides = array<i32>} : memref<96x16xf32, #tpu.memory_space<vmem>>, vector<16x8xf32>,
    %c4 = arith.constant 4 : index
    %c0_207 = arith.constant 0 : index
    %234 = vector.load %arg14[%c4, %c0_207] : memref<96x16xf32, #tpu.memory_space<vmem>>, vector<64x8xf32>
    %235 = arith.truncf %234 : vector<64x8xf32> to vector<64x8xbf16>
    %c1_208 = arith.constant 1 : index
    %c0_209 = arith.constant 0 : index
    %c0_210 = arith.constant 0 : index
    %c0_211 = arith.constant 0 : index
    %236 = vector.load %arg7[%c1_208, %c0_209, %c0_210, %c0_211] : memref<3x3x8x16xbf16, #tpu.memory_space<vmem>>, vector<1x1x8x16xbf16>
    %237 = vector.shape_cast %236 : vector<1x1x8x16xbf16> to vector<8x16xbf16>
    %cst_212 = arith.constant dense<0.000000e+00> : vector<64x16xf32>
    %238 = tpu.matmul %235, %237, %cst_212 {dimension_numbers = #tpu.dot_dimension_numbers<[1], [0], [0], [1], [0, 0, 1, 1], [], []>} : vector<64x8xbf16>, vector<8x16xbf16>, vector<64x16xf32> -> vector<64x16xf32>
    %c8_213 = arith.constant 8 : index
    %c0_214 = arith.constant 0 : index
    %239 = vector.load %arg14[%c8_213, %c0_214] : memref<96x16xf32, #tpu.memory_space<vmem>>, vector<64x8xf32>
    %240 = arith.truncf %239 : vector<64x8xf32> to vector<64x8xbf16>
    %c1_215 = arith.constant 1 : index
    %c1_216 = arith.constant 1 : index
    %c0_217 = arith.constant 0 : index
    %c0_218 = arith.constant 0 : index
    %241 = vector.load %arg7[%c1_215, %c1_216, %c0_217, %c0_218] : memref<3x3x8x16xbf16, #tpu.memory_space<vmem>>, vector<1x1x8x16xbf16>
    %242 = vector.shape_cast %241 : vector<1x1x8x16xbf16> to vector<8x16xbf16>
    %cst_219 = arith.constant dense<0.000000e+00> : vector<64x16xf32>
    %243 = tpu.matmul %240, %242, %cst_219 {dimension_numbers = #tpu.dot_dimension_numbers<[1], [0], [0], [1], [0, 0, 1, 1], [], []>} : vector<64x8xbf16>, vector<8x16xbf16>, vector<64x16xf32> -> vector<64x16xf32>
    %244 = arith.addf %238, %243 : vector<64x16xf32>
    %c12 = arith.constant 12 : index
    %c0_220 = arith.constant 0 : index
    %245 = vector.load %arg14[%c12, %c0_220] : memref<96x16xf32, #tpu.memory_space<vmem>>, vector<64x8xf32>
    %246 = arith.truncf %245 : vector<64x8xf32> to vector<64x8xbf16>
    %c1_221 = arith.constant 1 : index
    %c2_222 = arith.constant 2 : index
    %c0_223 = arith.constant 0 : index
    %c0_224 = arith.constant 0 : index
    %247 = vector.load %arg7[%c1_221, %c2_222, %c0_223, %c0_224] : memref<3x3x8x16xbf16, #tpu.memory_space<vmem>>, vector<1x1x8x16xbf16>
    %248 = vector.shape_cast %247 : vector<1x1x8x16xbf16> to vector<8x16xbf16>
    %cst_225 = arith.constant dense<0.000000e+00> : vector<64x16xf32>
    %249 = tpu.matmul %246, %248, %cst_225 {dimension_numbers = #tpu.dot_dimension_numbers<[1], [0], [0], [1], [0, 0, 1, 1], [], []>} : vector<64x8xbf16>, vector<8x16xbf16>, vector<64x16xf32> -> vector<64x16xf32>
    %250 = arith.addf %244, %249 : vector<64x16xf32>
    %c1_226 = arith.constant 1 : index
    %c0_227 = arith.constant 0 : index
    %c0_228 = arith.constant 0 : index
    %251 = vector.load %arg8[%c1_226, %c0_227, %c0_228] : memref<3x1x16xf32, #tpu.memory_space<vmem>>, vector<1x1x16xf32>
    %252 = vector.shape_cast %251 : vector<1x1x16xf32> to vector<1x16xf32>
    %253 = vector.broadcast %252 : vector<1x16xf32> to vector<64x16xf32>
    %254 = arith.addf %250, %253 : vector<64x16xf32>
    %cst_229 = arith.constant 0.000000e+00 : f32
    %255 = vector.broadcast %cst_229 : f32 to vector<64x16xf32>
    %256 = arith.maximumf %254, %255 : vector<64x16xf32>
    %257 = vector.extract_strided_slice %256 {offsets = [0, 0], sizes = [16, 16], strides = [1, 1]} : vector<64x16xf32> to vector<16x16xf32>
    %c8_230 = arith.constant 8 : index
    %c0_231 = arith.constant 0 : index
    %258 = vector.load %arg14[%c8_230, %c0_231] : memref<96x16xf32, #tpu.memory_space<vmem>>, vector<16x16xf32>
    tpu.vector_store %arg14[%c8_230, %c0_231], %257 {strides = array<i32>} : memref<96x16xf32, #tpu.memory_space<vmem>>, vector<16x16xf32>,
    %259 = vector.extract_strided_slice %256 {offsets = [48, 0], sizes = [16, 16], strides = [1, 1]} : vector<64x16xf32> to vector<16x16xf32>
    %c56_232 = arith.constant 56 : index
    %c0_233 = arith.constant 0 : index
    %260 = vector.load %arg14[%c56_232, %c0_233] : memref<96x16xf32, #tpu.memory_space<vmem>>, vector<16x16xf32>
    tpu.vector_store %arg14[%c56_232, %c0_233], %259 {strides = array<i32>} : memref<96x16xf32, #tpu.memory_space<vmem>>, vector<16x16xf32>,
    %c4_234 = arith.constant 4 : index
    %c0_235 = arith.constant 0 : index
    %261 = vector.load %arg14[%c4_234, %c0_235] : memref<96x16xf32, #tpu.memory_space<vmem>>, vector<64x16xf32>
    %262 = arith.truncf %261 : vector<64x16xf32> to vector<64x16xbf16>
    %c1_236 = arith.constant 1 : index
    %c0_237 = arith.constant 0 : index
    %c0_238 = arith.constant 0 : index
    %c0_239 = arith.constant 0 : index
    %263 = vector.load %arg9[%c1_236, %c0_237, %c0_238, %c0_239] : memref<3x3x16x16xbf16, #tpu.memory_space<vmem>>, vector<1x1x16x16xbf16>
    %264 = vector.shape_cast %263 : vector<1x1x16x16xbf16> to vector<16x16xbf16>
    %cst_240 = arith.constant dense<0.000000e+00> : vector<64x16xf32>
    %265 = tpu.matmul %262, %264, %cst_240 {dimension_numbers = #tpu.dot_dimension_numbers<[1], [0], [0], [1], [0, 0, 1, 1], [], []>} : vector<64x16xbf16>, vector<16x16xbf16>, vector<64x16xf32> -> vector<64x16xf32>
    %c8_241 = arith.constant 8 : index
    %c0_242 = arith.constant 0 : index
    %266 = vector.load %arg14[%c8_241, %c0_242] : memref<96x16xf32, #tpu.memory_space<vmem>>, vector<64x16xf32>
    %267 = arith.truncf %266 : vector<64x16xf32> to vector<64x16xbf16>
    %c1_243 = arith.constant 1 : index
    %c1_244 = arith.constant 1 : index
    %c0_245 = arith.constant 0 : index
    %c0_246 = arith.constant 0 : index
    %268 = vector.load %arg9[%c1_243, %c1_244, %c0_245, %c0_246] : memref<3x3x16x16xbf16, #tpu.memory_space<vmem>>, vector<1x1x16x16xbf16>
    %269 = vector.shape_cast %268 : vector<1x1x16x16xbf16> to vector<16x16xbf16>
    %cst_247 = arith.constant dense<0.000000e+00> : vector<64x16xf32>
    %270 = tpu.matmul %267, %269, %cst_247 {dimension_numbers = #tpu.dot_dimension_numbers<[1], [0], [0], [1], [0, 0, 1, 1], [], []>} : vector<64x16xbf16>, vector<16x16xbf16>, vector<64x16xf32> -> vector<64x16xf32>
    %271 = arith.addf %265, %270 : vector<64x16xf32>
    %c12_248 = arith.constant 12 : index
    %c0_249 = arith.constant 0 : index
    %272 = vector.load %arg14[%c12_248, %c0_249] : memref<96x16xf32, #tpu.memory_space<vmem>>, vector<64x16xf32>
    %273 = arith.truncf %272 : vector<64x16xf32> to vector<64x16xbf16>
    %c1_250 = arith.constant 1 : index
    %c2_251 = arith.constant 2 : index
    %c0_252 = arith.constant 0 : index
    %c0_253 = arith.constant 0 : index
    %274 = vector.load %arg9[%c1_250, %c2_251, %c0_252, %c0_253] : memref<3x3x16x16xbf16, #tpu.memory_space<vmem>>, vector<1x1x16x16xbf16>
    %275 = vector.shape_cast %274 : vector<1x1x16x16xbf16> to vector<16x16xbf16>
    %cst_254 = arith.constant dense<0.000000e+00> : vector<64x16xf32>
    %276 = tpu.matmul %273, %275, %cst_254 {dimension_numbers = #tpu.dot_dimension_numbers<[1], [0], [0], [1], [0, 0, 1, 1], [], []>} : vector<64x16xbf16>, vector<16x16xbf16>, vector<64x16xf32> -> vector<64x16xf32>
    %277 = arith.addf %271, %276 : vector<64x16xf32>
    %c1_255 = arith.constant 1 : index
    %c0_256 = arith.constant 0 : index
    %c0_257 = arith.constant 0 : index
    %278 = vector.load %arg10[%c1_255, %c0_256, %c0_257] : memref<3x1x16xf32, #tpu.memory_space<vmem>>, vector<1x1x16xf32>
    %279 = vector.shape_cast %278 : vector<1x1x16xf32> to vector<1x16xf32>
    %280 = vector.broadcast %279 : vector<1x16xf32> to vector<64x16xf32>
    %281 = arith.addf %277, %280 : vector<64x16xf32>
    %cst_258 = arith.constant 0.000000e+00 : f32
    %282 = vector.broadcast %cst_258 : f32 to vector<64x16xf32>
    %283 = arith.maximumf %281, %282 : vector<64x16xf32>
    %c1_259 = arith.constant 1 : index
    %c0_260 = arith.constant 0 : index
    %c0_261 = arith.constant 0 : index
    %284 = vector.load %arg11[%c1_259, %c0_260, %c0_261] : memref<3x1x16xf32, #tpu.memory_space<vmem>>, vector<1x1x16xf32>
    %285 = vector.shape_cast %284 : vector<1x1x16xf32> to vector<1x16xf32>
    %c1_262 = arith.constant 1 : index
    %c0_263 = arith.constant 0 : index
    %c0_264 = arith.constant 0 : index
    %286 = vector.load %arg12[%c1_262, %c0_263, %c0_264] : memref<3x1x16xf32, #tpu.memory_space<vmem>>, vector<1x1x16xf32>
    %287 = vector.shape_cast %286 : vector<1x1x16xf32> to vector<1x16xf32>
    %288 = vector.extract_strided_slice %283 {offsets = [0, 0], sizes = [16, 16], strides = [1, 1]} : vector<64x16xf32> to vector<16x16xf32>
    %289 = vector.broadcast %285 : vector<1x16xf32> to vector<16x16xf32>
    %290 = arith.mulf %288, %289 : vector<16x16xf32>
    %291 = vector.broadcast %287 : vector<1x16xf32> to vector<16x16xf32>
    %292 = arith.addf %290, %291 : vector<16x16xf32>
    %293 = vector.shape_cast %292 : vector<16x16xf32> to vector<8x2x16xf32>
    %cst_265 = arith.constant dense<0xFF800000> : vector<8x16xf32>
    %294 = vector.multi_reduction <maximumf>, %293, %cst_265 [1] : vector<8x2x16xf32> to vector<8x16xf32>
    %295 = vector.extract_strided_slice %283 {offsets = [48, 0], sizes = [16, 16], strides = [1, 1]} : vector<64x16xf32> to vector<16x16xf32>
    %296 = vector.broadcast %285 : vector<1x16xf32> to vector<16x16xf32>
    %297 = arith.mulf %295, %296 : vector<16x16xf32>
    %298 = vector.broadcast %287 : vector<1x16xf32> to vector<16x16xf32>
    %299 = arith.addf %297, %298 : vector<16x16xf32>
    %300 = vector.shape_cast %299 : vector<16x16xf32> to vector<8x2x16xf32>
    %cst_266 = arith.constant dense<0xFF800000> : vector<8x16xf32>
    %301 = vector.multi_reduction <maximumf>, %300, %cst_266 [1] : vector<8x2x16xf32> to vector<8x16xf32>
    %302 = tpu.concatenate %294, %301 in 0 : vector<8x16xf32>, vector<8x16xf32> -> vector<16x16xf32>
    %303 = vector.extract_strided_slice %2 {offsets = [0, 0], sizes = [32, 4], strides = [1, 1]} : vector<64x4xf32> to vector<32x4xf32>
    %c8_267 = arith.constant 8 : index
    %c0_268 = arith.constant 0 : index
    %304 = vector.load %arg14[%c8_267, %c0_268] : memref<96x16xf32, #tpu.memory_space<vmem>>, vector<32x4xf32>
    tpu.vector_store %arg14[%c8_267, %c0_268], %303 {strides = array<i32>} : memref<96x16xf32, #tpu.memory_space<vmem>>, vector<32x4xf32>,
    %305 = vector.extract_strided_slice %2 {offsets = [32, 0], sizes = [32, 4], strides = [1, 1]} : vector<64x4xf32> to vector<32x4xf32>
    %c56_269 = arith.constant 56 : index
    %c0_270 = arith.constant 0 : index
    %306 = vector.load %arg14[%c56_269, %c0_270] : memref<96x16xf32, #tpu.memory_space<vmem>>, vector<32x4xf32>
    tpu.vector_store %arg14[%c56_269, %c0_270], %305 {strides = array<i32>} : memref<96x16xf32, #tpu.memory_space<vmem>>, vector<32x4xf32>,
    %c7_271 = arith.constant 7 : index
    %c0_272 = arith.constant 0 : index
    %307 = vector.load %arg14[%c7_271, %c0_272] : memref<96x16xf32, #tpu.memory_space<vmem>>, vector<80x4xf32>
    %308 = arith.truncf %307 : vector<80x4xf32> to vector<80x4xbf16>
    %c2_273 = arith.constant 2 : index
    %c0_274 = arith.constant 0 : index
    %c0_275 = arith.constant 0 : index
    %c0_276 = arith.constant 0 : index
    %309 = vector.load %arg1[%c2_273, %c0_274, %c0_275, %c0_276] : memref<3x3x4x8xbf16, #tpu.memory_space<vmem>>, vector<1x1x4x8xbf16>
    %310 = vector.shape_cast %309 : vector<1x1x4x8xbf16> to vector<4x8xbf16>
    %cst_277 = arith.constant dense<0.000000e+00> : vector<80x8xf32>
    %311 = tpu.matmul %308, %310, %cst_277 {dimension_numbers = #tpu.dot_dimension_numbers<[1], [0], [0], [1], [0, 0, 1, 1], [], []>} : vector<80x4xbf16>, vector<4x8xbf16>, vector<80x8xf32> -> vector<80x8xf32>
    %c8_278 = arith.constant 8 : index
    %c0_279 = arith.constant 0 : index
    %312 = vector.load %arg14[%c8_278, %c0_279] : memref<96x16xf32, #tpu.memory_space<vmem>>, vector<80x4xf32>
    %313 = arith.truncf %312 : vector<80x4xf32> to vector<80x4xbf16>
    %c2_280 = arith.constant 2 : index
    %c1_281 = arith.constant 1 : index
    %c0_282 = arith.constant 0 : index
    %c0_283 = arith.constant 0 : index
    %314 = vector.load %arg1[%c2_280, %c1_281, %c0_282, %c0_283] : memref<3x3x4x8xbf16, #tpu.memory_space<vmem>>, vector<1x1x4x8xbf16>
    %315 = vector.shape_cast %314 : vector<1x1x4x8xbf16> to vector<4x8xbf16>
    %cst_284 = arith.constant dense<0.000000e+00> : vector<80x8xf32>
    %316 = tpu.matmul %313, %315, %cst_284 {dimension_numbers = #tpu.dot_dimension_numbers<[1], [0], [0], [1], [0, 0, 1, 1], [], []>} : vector<80x4xbf16>, vector<4x8xbf16>, vector<80x8xf32> -> vector<80x8xf32>
    %317 = arith.addf %311, %316 : vector<80x8xf32>
    %c9_285 = arith.constant 9 : index
    %c0_286 = arith.constant 0 : index
    %318 = vector.load %arg14[%c9_285, %c0_286] : memref<96x16xf32, #tpu.memory_space<vmem>>, vector<80x4xf32>
    %319 = arith.truncf %318 : vector<80x4xf32> to vector<80x4xbf16>
    %c2_287 = arith.constant 2 : index
    %c2_288 = arith.constant 2 : index
    %c0_289 = arith.constant 0 : index
    %c0_290 = arith.constant 0 : index
    %320 = vector.load %arg1[%c2_287, %c2_288, %c0_289, %c0_290] : memref<3x3x4x8xbf16, #tpu.memory_space<vmem>>, vector<1x1x4x8xbf16>
    %321 = vector.shape_cast %320 : vector<1x1x4x8xbf16> to vector<4x8xbf16>
    %cst_291 = arith.constant dense<0.000000e+00> : vector<80x8xf32>
    %322 = tpu.matmul %319, %321, %cst_291 {dimension_numbers = #tpu.dot_dimension_numbers<[1], [0], [0], [1], [0, 0, 1, 1], [], []>} : vector<80x4xbf16>, vector<4x8xbf16>, vector<80x8xf32> -> vector<80x8xf32>
    %323 = arith.addf %317, %322 : vector<80x8xf32>
    %c2_292 = arith.constant 2 : index
    %c0_293 = arith.constant 0 : index
    %c0_294 = arith.constant 0 : index
    %324 = vector.load %arg2[%c2_292, %c0_293, %c0_294] : memref<3x1x8xf32, #tpu.memory_space<vmem>>, vector<1x1x8xf32>
    %325 = vector.shape_cast %324 : vector<1x1x8xf32> to vector<1x8xf32>
    %326 = vector.broadcast %325 : vector<1x8xf32> to vector<80x8xf32>
    %327 = arith.addf %323, %326 : vector<80x8xf32>
    %cst_295 = arith.constant 0.000000e+00 : f32
    %328 = vector.broadcast %cst_295 : f32 to vector<80x8xf32>
    %329 = arith.maximumf %327, %328 : vector<80x8xf32>
    %330 = vector.extract_strided_slice %329 {offsets = [0, 0], sizes = [32, 8], strides = [1, 1]} : vector<80x8xf32> to vector<32x8xf32>
    %c8_296 = arith.constant 8 : index
    %c0_297 = arith.constant 0 : index
    %331 = vector.load %arg14[%c8_296, %c0_297] : memref<96x16xf32, #tpu.memory_space<vmem>>, vector<32x8xf32>
    tpu.vector_store %arg14[%c8_296, %c0_297], %330 {strides = array<i32>} : memref<96x16xf32, #tpu.memory_space<vmem>>, vector<32x8xf32>,
    %332 = vector.extract_strided_slice %329 {offsets = [48, 0], sizes = [32, 8], strides = [1, 1]} : vector<80x8xf32> to vector<32x8xf32>
    %c56_298 = arith.constant 56 : index
    %c0_299 = arith.constant 0 : index
    %333 = vector.load %arg14[%c56_298, %c0_299] : memref<96x16xf32, #tpu.memory_space<vmem>>, vector<32x8xf32>
    tpu.vector_store %arg14[%c56_298, %c0_299], %332 {strides = array<i32>} : memref<96x16xf32, #tpu.memory_space<vmem>>, vector<32x8xf32>,
    %c7_300 = arith.constant 7 : index
    %c0_301 = arith.constant 0 : index
    %334 = vector.load %arg14[%c7_300, %c0_301] : memref<96x16xf32, #tpu.memory_space<vmem>>, vector<80x8xf32>
    %335 = arith.truncf %334 : vector<80x8xf32> to vector<80x8xbf16>
    %c2_302 = arith.constant 2 : index
    %c0_303 = arith.constant 0 : index
    %c0_304 = arith.constant 0 : index
    %c0_305 = arith.constant 0 : index
    %336 = vector.load %arg3[%c2_302, %c0_303, %c0_304, %c0_305] : memref<3x3x8x8xbf16, #tpu.memory_space<vmem>>, vector<1x1x8x8xbf16>
    %337 = vector.shape_cast %336 : vector<1x1x8x8xbf16> to vector<8x8xbf16>
    %cst_306 = arith.constant dense<0.000000e+00> : vector<80x8xf32>
    %338 = tpu.matmul %335, %337, %cst_306 {dimension_numbers = #tpu.dot_dimension_numbers<[1], [0], [0], [1], [0, 0, 1, 1], [], []>} : vector<80x8xbf16>, vector<8x8xbf16>, vector<80x8xf32> -> vector<80x8xf32>
    %c8_307 = arith.constant 8 : index
    %c0_308 = arith.constant 0 : index
    %339 = vector.load %arg14[%c8_307, %c0_308] : memref<96x16xf32, #tpu.memory_space<vmem>>, vector<80x8xf32>
    %340 = arith.truncf %339 : vector<80x8xf32> to vector<80x8xbf16>
    %c2_309 = arith.constant 2 : index
    %c1_310 = arith.constant 1 : index
    %c0_311 = arith.constant 0 : index
    %c0_312 = arith.constant 0 : index
    %341 = vector.load %arg3[%c2_309, %c1_310, %c0_311, %c0_312] : memref<3x3x8x8xbf16, #tpu.memory_space<vmem>>, vector<1x1x8x8xbf16>
    %342 = vector.shape_cast %341 : vector<1x1x8x8xbf16> to vector<8x8xbf16>
    %cst_313 = arith.constant dense<0.000000e+00> : vector<80x8xf32>
    %343 = tpu.matmul %340, %342, %cst_313 {dimension_numbers = #tpu.dot_dimension_numbers<[1], [0], [0], [1], [0, 0, 1, 1], [], []>} : vector<80x8xbf16>, vector<8x8xbf16>, vector<80x8xf32> -> vector<80x8xf32>
    %344 = arith.addf %338, %343 : vector<80x8xf32>
    %c9_314 = arith.constant 9 : index
    %c0_315 = arith.constant 0 : index
    %345 = vector.load %arg14[%c9_314, %c0_315] : memref<96x16xf32, #tpu.memory_space<vmem>>, vector<80x8xf32>
    %346 = arith.truncf %345 : vector<80x8xf32> to vector<80x8xbf16>
    %c2_316 = arith.constant 2 : index
    %c2_317 = arith.constant 2 : index
    %c0_318 = arith.constant 0 : index
    %c0_319 = arith.constant 0 : index
    %347 = vector.load %arg3[%c2_316, %c2_317, %c0_318, %c0_319] : memref<3x3x8x8xbf16, #tpu.memory_space<vmem>>, vector<1x1x8x8xbf16>
    %348 = vector.shape_cast %347 : vector<1x1x8x8xbf16> to vector<8x8xbf16>
    %cst_320 = arith.constant dense<0.000000e+00> : vector<80x8xf32>
    %349 = tpu.matmul %346, %348, %cst_320 {dimension_numbers = #tpu.dot_dimension_numbers<[1], [0], [0], [1], [0, 0, 1, 1], [], []>} : vector<80x8xbf16>, vector<8x8xbf16>, vector<80x8xf32> -> vector<80x8xf32>
    %350 = arith.addf %344, %349 : vector<80x8xf32>
    %c2_321 = arith.constant 2 : index
    %c0_322 = arith.constant 0 : index
    %c0_323 = arith.constant 0 : index
    %351 = vector.load %arg4[%c2_321, %c0_322, %c0_323] : memref<3x1x8xf32, #tpu.memory_space<vmem>>, vector<1x1x8xf32>
    %352 = vector.shape_cast %351 : vector<1x1x8xf32> to vector<1x8xf32>
    %353 = vector.broadcast %352 : vector<1x8xf32> to vector<80x8xf32>
    %354 = arith.addf %350, %353 : vector<80x8xf32>
    %cst_324 = arith.constant 0.000000e+00 : f32
    %355 = vector.broadcast %cst_324 : f32 to vector<80x8xf32>
    %356 = arith.maximumf %354, %355 : vector<80x8xf32>
    %c2_325 = arith.constant 2 : index
    %c0_326 = arith.constant 0 : index
    %c0_327 = arith.constant 0 : index
    %357 = vector.load %arg5[%c2_325, %c0_326, %c0_327] : memref<3x1x8xf32, #tpu.memory_space<vmem>>, vector<1x1x8xf32>
    %358 = vector.shape_cast %357 : vector<1x1x8xf32> to vector<1x8xf32>
    %c2_328 = arith.constant 2 : index
    %c0_329 = arith.constant 0 : index
    %c0_330 = arith.constant 0 : index
    %359 = vector.load %arg6[%c2_328, %c0_329, %c0_330] : memref<3x1x8xf32, #tpu.memory_space<vmem>>, vector<1x1x8xf32>
    %360 = vector.shape_cast %359 : vector<1x1x8xf32> to vector<1x8xf32>
    %361 = vector.extract_strided_slice %356 {offsets = [0, 0], sizes = [32, 8], strides = [1, 1]} : vector<80x8xf32> to vector<32x8xf32>
    %362 = vector.broadcast %358 : vector<1x8xf32> to vector<32x8xf32>
    %363 = arith.mulf %361, %362 : vector<32x8xf32>
    %364 = vector.broadcast %360 : vector<1x8xf32> to vector<32x8xf32>
    %365 = arith.addf %363, %364 : vector<32x8xf32>
    %366 = vector.shape_cast %365 : vector<32x8xf32> to vector<16x2x8xf32>
    %cst_331 = arith.constant dense<0xFF800000> : vector<16x8xf32>
    %367 = vector.multi_reduction <maximumf>, %366, %cst_331 [1] : vector<16x2x8xf32> to vector<16x8xf32>
    %368 = vector.extract_strided_slice %356 {offsets = [48, 0], sizes = [32, 8], strides = [1, 1]} : vector<80x8xf32> to vector<32x8xf32>
    %369 = vector.broadcast %358 : vector<1x8xf32> to vector<32x8xf32>
    %370 = arith.mulf %368, %369 : vector<32x8xf32>
    %371 = vector.broadcast %360 : vector<1x8xf32> to vector<32x8xf32>
    %372 = arith.addf %370, %371 : vector<32x8xf32>
    %373 = vector.shape_cast %372 : vector<32x8xf32> to vector<16x2x8xf32>
    %cst_332 = arith.constant dense<0xFF800000> : vector<16x8xf32>
    %374 = vector.multi_reduction <maximumf>, %373, %cst_332 [1] : vector<16x2x8xf32> to vector<16x8xf32>
    %375 = tpu.concatenate %367, %374 in 0 : vector<16x8xf32>, vector<16x8xf32> -> vector<32x8xf32>
    %cst_333 = arith.constant 0.000000e+00 : f32
    %376 = vector.broadcast %cst_333 : f32 to vector<8x16xf32>
    %c24_334 = arith.constant 24 : index
    %c0_335 = arith.constant 0 : index
    %377 = vector.load %arg14[%c24_334, %c0_335] : memref<96x16xf32, #tpu.memory_space<vmem>>, vector<8x16xf32>
    tpu.vector_store %arg14[%c24_334, %c0_335], %376 {strides = array<i32>} : memref<96x16xf32, #tpu.memory_space<vmem>>, vector<8x16xf32>,
    %cst_336 = arith.constant 0.000000e+00 : f32
    %378 = vector.broadcast %cst_336 : f32 to vector<8x16xf32>
    %c72_337 = arith.constant 72 : index
    %c0_338 = arith.constant 0 : index
    %379 = vector.load %arg14[%c72_337, %c0_338] : memref<96x16xf32, #tpu.memory_space<vmem>>, vector<8x16xf32>
    tpu.vector_store %arg14[%c72_337, %c0_338], %378 {strides = array<i32>} : memref<96x16xf32, #tpu.memory_space<vmem>>, vector<8x16xf32>,
    %380 = vector.extract_strided_slice %375 {offsets = [0, 0], sizes = [16, 8], strides = [1, 1]} : vector<32x8xf32> to vector<16x8xf32>
    %c8_339 = arith.constant 8 : index
    %c0_340 = arith.constant 0 : index
    %381 = vector.load %arg14[%c8_339, %c0_340] : memref<96x16xf32, #tpu.memory_space<vmem>>, vector<16x8xf32>
    tpu.vector_store %arg14[%c8_339, %c0_340], %380 {strides = array<i32>} : memref<96x16xf32, #tpu.memory_space<vmem>>, vector<16x8xf32>,
    %382 = vector.extract_strided_slice %375 {offsets = [16, 0], sizes = [16, 8], strides = [1, 1]} : vector<32x8xf32> to vector<16x8xf32>
    %c56_341 = arith.constant 56 : index
    %c0_342 = arith.constant 0 : index
    %383 = vector.load %arg14[%c56_341, %c0_342] : memref<96x16xf32, #tpu.memory_space<vmem>>, vector<16x8xf32>
    tpu.vector_store %arg14[%c56_341, %c0_342], %382 {strides = array<i32>} : memref<96x16xf32, #tpu.memory_space<vmem>>, vector<16x8xf32>,
    %c0_343 = arith.constant 0 : index
    %c0_344 = arith.constant 0 : index
    %384 = vector.load %arg14[%c0_343, %c0_344] : memref<96x16xf32, #tpu.memory_space<vmem>>, vector<64x8xf32>
    %385 = arith.truncf %384 : vector<64x8xf32> to vector<64x8xbf16>
    %c2_345 = arith.constant 2 : index
    %c0_346 = arith.constant 0 : index
    %c0_347 = arith.constant 0 : index
    %c0_348 = arith.constant 0 : index
    %386 = vector.load %arg7[%c2_345, %c0_346, %c0_347, %c0_348] : memref<3x3x8x16xbf16, #tpu.memory_space<vmem>>, vector<1x1x8x16xbf16>
    %387 = vector.shape_cast %386 : vector<1x1x8x16xbf16> to vector<8x16xbf16>
    %cst_349 = arith.constant dense<0.000000e+00> : vector<64x16xf32>
    %388 = tpu.matmul %385, %387, %cst_349 {dimension_numbers = #tpu.dot_dimension_numbers<[1], [0], [0], [1], [0, 0, 1, 1], [], []>} : vector<64x8xbf16>, vector<8x16xbf16>, vector<64x16xf32> -> vector<64x16xf32>
    %c8_350 = arith.constant 8 : index
    %c0_351 = arith.constant 0 : index
    %389 = vector.load %arg14[%c8_350, %c0_351] : memref<96x16xf32, #tpu.memory_space<vmem>>, vector<64x8xf32>
    %390 = arith.truncf %389 : vector<64x8xf32> to vector<64x8xbf16>
    %c2_352 = arith.constant 2 : index
    %c1_353 = arith.constant 1 : index
    %c0_354 = arith.constant 0 : index
    %c0_355 = arith.constant 0 : index
    %391 = vector.load %arg7[%c2_352, %c1_353, %c0_354, %c0_355] : memref<3x3x8x16xbf16, #tpu.memory_space<vmem>>, vector<1x1x8x16xbf16>
    %392 = vector.shape_cast %391 : vector<1x1x8x16xbf16> to vector<8x16xbf16>
    %cst_356 = arith.constant dense<0.000000e+00> : vector<64x16xf32>
    %393 = tpu.matmul %390, %392, %cst_356 {dimension_numbers = #tpu.dot_dimension_numbers<[1], [0], [0], [1], [0, 0, 1, 1], [], []>} : vector<64x8xbf16>, vector<8x16xbf16>, vector<64x16xf32> -> vector<64x16xf32>
    %394 = arith.addf %388, %393 : vector<64x16xf32>
    %c16 = arith.constant 16 : index
    %c0_357 = arith.constant 0 : index
    %395 = vector.load %arg14[%c16, %c0_357] : memref<96x16xf32, #tpu.memory_space<vmem>>, vector<64x8xf32>
    %396 = arith.truncf %395 : vector<64x8xf32> to vector<64x8xbf16>
    %c2_358 = arith.constant 2 : index
    %c2_359 = arith.constant 2 : index
    %c0_360 = arith.constant 0 : index
    %c0_361 = arith.constant 0 : index
    %397 = vector.load %arg7[%c2_358, %c2_359, %c0_360, %c0_361] : memref<3x3x8x16xbf16, #tpu.memory_space<vmem>>, vector<1x1x8x16xbf16>
    %398 = vector.shape_cast %397 : vector<1x1x8x16xbf16> to vector<8x16xbf16>
    %cst_362 = arith.constant dense<0.000000e+00> : vector<64x16xf32>
    %399 = tpu.matmul %396, %398, %cst_362 {dimension_numbers = #tpu.dot_dimension_numbers<[1], [0], [0], [1], [0, 0, 1, 1], [], []>} : vector<64x8xbf16>, vector<8x16xbf16>, vector<64x16xf32> -> vector<64x16xf32>
    %400 = arith.addf %394, %399 : vector<64x16xf32>
    %c2_363 = arith.constant 2 : index
    %c0_364 = arith.constant 0 : index
    %c0_365 = arith.constant 0 : index
    %401 = vector.load %arg8[%c2_363, %c0_364, %c0_365] : memref<3x1x16xf32, #tpu.memory_space<vmem>>, vector<1x1x16xf32>
    %402 = vector.shape_cast %401 : vector<1x1x16xf32> to vector<1x16xf32>
    %403 = vector.broadcast %402 : vector<1x16xf32> to vector<64x16xf32>
    %404 = arith.addf %400, %403 : vector<64x16xf32>
    %cst_366 = arith.constant 0.000000e+00 : f32
    %405 = vector.broadcast %cst_366 : f32 to vector<64x16xf32>
    %406 = arith.maximumf %404, %405 : vector<64x16xf32>
    %407 = vector.extract_strided_slice %406 {offsets = [0, 0], sizes = [16, 16], strides = [1, 1]} : vector<64x16xf32> to vector<16x16xf32>
    %c8_367 = arith.constant 8 : index
    %c0_368 = arith.constant 0 : index
    %408 = vector.load %arg14[%c8_367, %c0_368] : memref<96x16xf32, #tpu.memory_space<vmem>>, vector<16x16xf32>
    tpu.vector_store %arg14[%c8_367, %c0_368], %407 {strides = array<i32>} : memref<96x16xf32, #tpu.memory_space<vmem>>, vector<16x16xf32>,
    %409 = vector.extract_strided_slice %406 {offsets = [48, 0], sizes = [16, 16], strides = [1, 1]} : vector<64x16xf32> to vector<16x16xf32>
    %c56_369 = arith.constant 56 : index
    %c0_370 = arith.constant 0 : index
    %410 = vector.load %arg14[%c56_369, %c0_370] : memref<96x16xf32, #tpu.memory_space<vmem>>, vector<16x16xf32>
    tpu.vector_store %arg14[%c56_369, %c0_370], %409 {strides = array<i32>} : memref<96x16xf32, #tpu.memory_space<vmem>>, vector<16x16xf32>,
    %c0_371 = arith.constant 0 : index
    %c0_372 = arith.constant 0 : index
    %411 = vector.load %arg14[%c0_371, %c0_372] : memref<96x16xf32, #tpu.memory_space<vmem>>, vector<64x16xf32>
    %412 = arith.truncf %411 : vector<64x16xf32> to vector<64x16xbf16>
    %c2_373 = arith.constant 2 : index
    %c0_374 = arith.constant 0 : index
    %c0_375 = arith.constant 0 : index
    %c0_376 = arith.constant 0 : index
    %413 = vector.load %arg9[%c2_373, %c0_374, %c0_375, %c0_376] : memref<3x3x16x16xbf16, #tpu.memory_space<vmem>>, vector<1x1x16x16xbf16>
    %414 = vector.shape_cast %413 : vector<1x1x16x16xbf16> to vector<16x16xbf16>
    %cst_377 = arith.constant dense<0.000000e+00> : vector<64x16xf32>
    %415 = tpu.matmul %412, %414, %cst_377 {dimension_numbers = #tpu.dot_dimension_numbers<[1], [0], [0], [1], [0, 0, 1, 1], [], []>} : vector<64x16xbf16>, vector<16x16xbf16>, vector<64x16xf32> -> vector<64x16xf32>
    %c8_378 = arith.constant 8 : index
    %c0_379 = arith.constant 0 : index
    %416 = vector.load %arg14[%c8_378, %c0_379] : memref<96x16xf32, #tpu.memory_space<vmem>>, vector<64x16xf32>
    %417 = arith.truncf %416 : vector<64x16xf32> to vector<64x16xbf16>
    %c2_380 = arith.constant 2 : index
    %c1_381 = arith.constant 1 : index
    %c0_382 = arith.constant 0 : index
    %c0_383 = arith.constant 0 : index
    %418 = vector.load %arg9[%c2_380, %c1_381, %c0_382, %c0_383] : memref<3x3x16x16xbf16, #tpu.memory_space<vmem>>, vector<1x1x16x16xbf16>
    %419 = vector.shape_cast %418 : vector<1x1x16x16xbf16> to vector<16x16xbf16>
    %cst_384 = arith.constant dense<0.000000e+00> : vector<64x16xf32>
    %420 = tpu.matmul %417, %419, %cst_384 {dimension_numbers = #tpu.dot_dimension_numbers<[1], [0], [0], [1], [0, 0, 1, 1], [], []>} : vector<64x16xbf16>, vector<16x16xbf16>, vector<64x16xf32> -> vector<64x16xf32>
    %421 = arith.addf %415, %420 : vector<64x16xf32>
    %c16_385 = arith.constant 16 : index
    %c0_386 = arith.constant 0 : index
    %422 = vector.load %arg14[%c16_385, %c0_386] : memref<96x16xf32, #tpu.memory_space<vmem>>, vector<64x16xf32>
    %423 = arith.truncf %422 : vector<64x16xf32> to vector<64x16xbf16>
    %c2_387 = arith.constant 2 : index
    %c2_388 = arith.constant 2 : index
    %c0_389 = arith.constant 0 : index
    %c0_390 = arith.constant 0 : index
    %424 = vector.load %arg9[%c2_387, %c2_388, %c0_389, %c0_390] : memref<3x3x16x16xbf16, #tpu.memory_space<vmem>>, vector<1x1x16x16xbf16>
    %425 = vector.shape_cast %424 : vector<1x1x16x16xbf16> to vector<16x16xbf16>
    %cst_391 = arith.constant dense<0.000000e+00> : vector<64x16xf32>
    %426 = tpu.matmul %423, %425, %cst_391 {dimension_numbers = #tpu.dot_dimension_numbers<[1], [0], [0], [1], [0, 0, 1, 1], [], []>} : vector<64x16xbf16>, vector<16x16xbf16>, vector<64x16xf32> -> vector<64x16xf32>
    %427 = arith.addf %421, %426 : vector<64x16xf32>
    %c2_392 = arith.constant 2 : index
    %c0_393 = arith.constant 0 : index
    %c0_394 = arith.constant 0 : index
    %428 = vector.load %arg10[%c2_392, %c0_393, %c0_394] : memref<3x1x16xf32, #tpu.memory_space<vmem>>, vector<1x1x16xf32>
    %429 = vector.shape_cast %428 : vector<1x1x16xf32> to vector<1x16xf32>
    %430 = vector.broadcast %429 : vector<1x16xf32> to vector<64x16xf32>
    %431 = arith.addf %427, %430 : vector<64x16xf32>
    %cst_395 = arith.constant 0.000000e+00 : f32
    %432 = vector.broadcast %cst_395 : f32 to vector<64x16xf32>
    %433 = arith.maximumf %431, %432 : vector<64x16xf32>
    %c2_396 = arith.constant 2 : index
    %c0_397 = arith.constant 0 : index
    %c0_398 = arith.constant 0 : index
    %434 = vector.load %arg11[%c2_396, %c0_397, %c0_398] : memref<3x1x16xf32, #tpu.memory_space<vmem>>, vector<1x1x16xf32>
    %435 = vector.shape_cast %434 : vector<1x1x16xf32> to vector<1x16xf32>
    %c2_399 = arith.constant 2 : index
    %c0_400 = arith.constant 0 : index
    %c0_401 = arith.constant 0 : index
    %436 = vector.load %arg12[%c2_399, %c0_400, %c0_401] : memref<3x1x16xf32, #tpu.memory_space<vmem>>, vector<1x1x16xf32>
    %437 = vector.shape_cast %436 : vector<1x1x16xf32> to vector<1x16xf32>
    %438 = vector.extract_strided_slice %433 {offsets = [0, 0], sizes = [16, 16], strides = [1, 1]} : vector<64x16xf32> to vector<16x16xf32>
    %439 = vector.broadcast %435 : vector<1x16xf32> to vector<16x16xf32>
    %440 = arith.mulf %438, %439 : vector<16x16xf32>
    %441 = vector.broadcast %437 : vector<1x16xf32> to vector<16x16xf32>
    %442 = arith.addf %440, %441 : vector<16x16xf32>
    %443 = vector.shape_cast %442 : vector<16x16xf32> to vector<8x2x16xf32>
    %cst_402 = arith.constant dense<0xFF800000> : vector<8x16xf32>
    %444 = vector.multi_reduction <maximumf>, %443, %cst_402 [1] : vector<8x2x16xf32> to vector<8x16xf32>
    %445 = vector.extract_strided_slice %433 {offsets = [48, 0], sizes = [16, 16], strides = [1, 1]} : vector<64x16xf32> to vector<16x16xf32>
    %446 = vector.broadcast %435 : vector<1x16xf32> to vector<16x16xf32>
    %447 = arith.mulf %445, %446 : vector<16x16xf32>
    %448 = vector.broadcast %437 : vector<1x16xf32> to vector<16x16xf32>
    %449 = arith.addf %447, %448 : vector<16x16xf32>
    %450 = vector.shape_cast %449 : vector<16x16xf32> to vector<8x2x16xf32>
    %cst_403 = arith.constant dense<0xFF800000> : vector<8x16xf32>
    %451 = vector.multi_reduction <maximumf>, %450, %cst_403 [1] : vector<8x2x16xf32> to vector<8x16xf32>
    %452 = tpu.concatenate %444, %451 in 0 : vector<8x16xf32>, vector<8x16xf32> -> vector<16x16xf32>
    %453 = tpu.concatenate %152, %302, %452 in 1 : vector<16x16xf32>, vector<16x16xf32>, vector<16x16xf32> -> vector<16x48xf32>
    %c0_404 = arith.constant 0 : index
    %c0_405 = arith.constant 0 : index
    %454 = vector.load %arg13[%c0_404, %c0_405] : memref<16x48xf32, #tpu.memory_space<vmem>>, vector<16x48xf32>
    tpu.vector_store %arg13[%c0_404, %c0_405], %453 {strides = array<i32>} : memref<16x48xf32, #tpu.memory_space<vmem>>, vector<16x48xf32>,
    return
  }
}

</mosaic_0001>

<bundles_post_ra>
// kernel: multi_scopic_cnn_forward.1
= control target key start
LH: loop header
LB: loop body
LE: loop exit
PB: predicated region body
PF: predicated region fallthrough
CT: control target
= control target key end

     0   :  { %vm124_vm0 = vcmask 1041408   ;;  %v7372_v2 = vmov 0.0   ;;  %vm46_vm1 = vcmask 130048   ;;  %vm67_vm2 = vcmask 31744   ;;  %s9127_s0 = inlined_call_operand.vmem [shape: f32[64,4], index: 0, kind: input, shape index: {}]   ;;  %s9128_s1 = inlined_call_operand.vmem [shape: bf16[3,3,4,8], index: 1, kind: input, shape index: {}]   ;;  %s9129_s2 = inlined_call_operand.vmem [shape: f32[3,1,8], index: 2, kind: input, shape index: {}]   ;;  %s9130_s3 = inlined_call_operand.vmem [shape: bf16[3,3,8,8], index: 3, kind: input, shape index: {}]   ;;  %s9131_s4 = inlined_call_operand.vmem [shape: f32[3,1,8], index: 4, kind: input, shape index: {}]   ;;  %s9132_s5 = inlined_call_operand.vmem [shape: f32[3,1,8], index: 5, kind: input, shape index: {}]   ;;  %s9133_s6 = inlined_call_operand.vmem [shape: f32[3,1,8], index: 6, kind: input, shape index: {}]   ;;  %s9134_s7 = inlined_call_operand.vmem [shape: bf16[3,3,8,16], index: 7, kind: input, shape index: {}]   ;;  %s9135_s8 = inlined_call_operand.vmem [shape: f32[3,1,16], index: 8, kind: input, shape index: {}]   ;;  %s9136_s9 = inlined_call_operand.vmem [shape: bf16[3,3,16,16], index: 9, kind: input, shape index: {}]   ;;  %s9137_s10 = inlined_call_operand.vmem [shape: f32[3,1,16], index: 10, kind: input, shape index: {}]   ;;  %s9138_s11 = inlined_call_operand.vmem [shape: f32[3,1,16], index: 11, kind: input, shape index: {}]   ;;  %s9139_s12 = inlined_call_operand.vmem [shape: f32[3,1,16], index: 12, kind: input, shape index: {}]   ;;  %s9140_s13 = inlined_call_operand.hbm [shape: f32[16,48], index: 13, kind: output, shape index: {}]  }
   0x1   :  { %v6296_v0 = vld [vmem:[%s9128_s1 + $0x2] sm:$0x3]  ;;  %v91_v1 = vld [vmem:[%s9128_s1] sm:$0x3]  ;;  %6745 = vmatprep.subr.bf16.mxu0 %v7372_v2  ;;  %6767 = vmatprep.subr.bf16.mxu1 %v7372_v2  ;;  %v7468_v6 = vld [vmem:[%s9127_s0 + $0x8] sm:$0xff]  ;;  %48 = vst.msk [vmem:[#allocation2 + $0x8] sm:$0xff] %vm46_vm1, %v7372_v2 }
   0x2   :  { %v126_v3 = vsel %vm124_vm0, %v6296_v0, 0  ;;  %v215_v4 = vsel %vm124_vm0, %v91_v1, 0  ;;  %v7463_v5 = vld [vmem:[%s9127_s0] sm:$0xff]  ;;  %49 = vst.msk [vmem:[#allocation2 + $0x10] sm:$0xff] %vm46_vm1, %v7372_v2  ;;  %47 = vst.msk [vmem:[#allocation2] sm:$0xff] %vm46_vm1, %v7372_v2  ;;  %v7497_v7 = vld [vmem:[%s9127_s0 + $0x10] sm:$0xff] }
   0x3   :  { %6746 = vmatpush3.bf16.msra.mxu0 %v126_v3  ;;  %6768 = vmatpush3.bf16.msra.mxu1 %v215_v4  ;;  %50 = vst.msk [vmem:[#allocation2 + $0x18] sm:$0xff] %vm46_vm1, %v7372_v2  ;;  %51 = vst.msk [vmem:[#allocation2 + $0x20] sm:$0xff] %vm46_vm1, %v7372_v2  ;;  %v7502_v8 = vld [vmem:[%s9127_s0 + $0x18] sm:$0xff]  ;;  %vm7373_vm3 = vmmov 0   ;;  %v7519_v9 = vld [vmem:[%s9127_s0 + $0x20] sm:$0xff] }
   0x4   :  { %52 = vst.msk [vmem:[#allocation2 + $0x28] sm:$0xff] %vm46_vm1, %v7372_v2  ;;  %53 = vst.msk [vmem:[#allocation2 + $0x30] sm:$0xff] %vm46_vm1, %v7372_v2  ;;  %6747 = vmatprep.mubr.msk.bf16.mxu0 %vm7373_vm3, %v7372_v2  ;;  %6769 = vmatprep.mubr.msk.bf16.mxu1 %vm7373_vm3, %v7372_v2  ;;  %v7524_v10 = vld [vmem:[%s9127_s0 + $0x28] sm:$0xff]  ;;  %v7529_v11 = vld [vmem:[%s9127_s0 + $0x30] sm:$0xff] }
   0x5   :  { %54 = vst.msk [vmem:[#allocation2 + $0x38] sm:$0xff] %vm46_vm1, %v7372_v2  ;;  %55 = vst.msk [vmem:[#allocation2 + $0x40] sm:$0xff] %vm46_vm1, %v7372_v2  ;;  %6789 = vmatprep.subr.bf16.mxu0 %v7372_v2  ;;  %v7539_v12 = vld [vmem:[%s9127_s0 + $0x38] sm:$0xff]  ;;  %6811 = vmatprep.subr.bf16.mxu1 %v7372_v2  ;;  %v6307_v13 = vld [vmem:[%s9128_s1 + $0x4] sm:$0x3] }
   0x6   :  { %56 = vst.msk [vmem:[#allocation2 + $0x48] sm:$0xff] %vm46_vm1, %v7372_v2  ;;  %57 = vst.msk [vmem:[#allocation2 + $0x50] sm:$0xff] %vm46_vm1, %v7372_v2  ;;  %v321_v19 = vsel %vm124_vm0, %v6307_v13, 0 }
   0x7   :  { %58 = vst.msk [vmem:[#allocation2 + $0x58] sm:$0xff] %vm46_vm1, %v7372_v2 }
   0x8   :  { %68 = vst.msk [vmem:[#allocation2 + $0x8] sm:$0xff] %vm67_vm2, %v7463_v5  ;;  %69 = vst.msk [vmem:[#allocation2 + $0x10] sm:$0xff] %vm67_vm2, %v7468_v6 }
   0x9   :  { %70 = vst.msk [vmem:[#allocation2 + $0x18] sm:$0xff] %vm67_vm2, %v7497_v7  ;;  %71 = vst.msk [vmem:[#allocation2 + $0x20] sm:$0xff] %vm67_vm2, %v7502_v8 }
   0xa   :  { %72 = vst.msk [vmem:[#allocation2 + $0x38] sm:$0xff] %vm67_vm2, %v7519_v9  ;;  %73 = vst.msk [vmem:[#allocation2 + $0x40] sm:$0xff] %vm67_vm2, %v7524_v10 }
   0xb   :  { %74 = vst.msk [vmem:[#allocation2 + $0x48] sm:$0xff] %vm67_vm2, %v7529_v11  ;;  %75 = vst.msk [vmem:[#allocation2 + $0x50] sm:$0xff] %vm67_vm2, %v7539_v12 }
   0xf   :  { %v77_v14 = vld [vmem:[#allocation2 + $0xf] sm:$0xff]  ;;  %v76_v18 = vld [vmem:[#allocation2 + $0x7] sm:$0xff] }
  0x10   :  { %v92_v15 = vld [vmem:[#allocation2 + $0x8] sm:$0xff]  ;;  %v93_v16 = vld [vmem:[#allocation2 + $0x10] sm:$0xff]  ;;  %v86_v20 = vpack.c.bf16 %v77_v14, %v76_v18  ;;  %v94_v21 = vld [vmem:[#allocation2 + $0x18] sm:$0xff] }
  0x11   :  { %v102_v17 = vpack.c.bf16 %v93_v16, %v92_v15  ;;  %v95_v22 = vld [vmem:[#allocation2 + $0x20] sm:$0xff]  ;;  %v78_v23 = vld [vmem:[#allocation2 + $0x17] sm:$0xff] }
  0x12   :  { %6770 = vmatmul.mubr.msk.bf16.vlgmr.msra.gmra.mxu1 %vm67_vm2, %v86_v20  ;;  %v79_v24 = vld [vmem:[#allocation2 + $0x1f] sm:$0xff]  ;;  %v103_v25 = vpack.c.bf16 %v95_v22, %v94_v21 }
  0x13   :  { %6748 = vmatmul.mubr.msk.bf16.vlgmr.msra.gmra.mxu0 %vm67_vm2, %v102_v17  ;;  %6773 = vmatprep.mubr.msk.bf16.mxu1 %vm7373_vm3, %v7372_v2  ;;  %v87_v26 = vpack.c.bf16 %v79_v24, %v78_v23 }
  0x14   :  { %6790 = vmatpush3.bf16.msra.mxu0 %v321_v19  ;;  %6751 = vmatprep.mubr.msk.bf16.mxu0 %vm7373_vm3, %v7372_v2 }
  0x15   :  { %6833 = vmatprep.subr.bf16.mxu0 %v7372_v2 }
  0x16   :  { %18 = vsyncpa [#allocation4], 0  ;;  %v96_v27 = vld [vmem:[#allocation2 + $0x28] sm:$0xff]  ;;  %v97_v28 = vld [vmem:[#allocation2 + $0x30] sm:$0xff]  ;;  %vm482_vm4 = vcmask 1043456   ;;  %vm425_vm5 = vcmask 64512  }
  0x17   :  { %v80_v29 = vld [vmem:[#allocation2 + $0x27] sm:$0xff]  ;;  %v7563_v30 = vld [vmem:[#allocation2 + $0x2f] sm:$0xff]  ;;  %v7565_v31 = vpack.c.bf16 %v97_v28, %v96_v27  ;;  %v98_v33 = vld [vmem:[#allocation2 + $0x38] sm:$0xff]  ;;  %vm893_vm6 = vcmask 58368   ;;  %vm1230_vm7 = vcmask 1041409   ;;  %vm1232_vm8 = vcmask 1042434  }
  0x18   :  { %v88_v32 = vpack.c.bf16 %v7563_v30, %v80_v29  ;;  %v99_v34 = vld [vmem:[#allocation2 + $0x40] sm:$0xff]  ;;  %v82_v36 = vld [vmem:[#allocation2 + $0x37] sm:$0xff]  ;;  %v100_v39 = vld [vmem:[#allocation2 + $0x48] sm:$0xff]  ;;  %vm1234_vm9 = vcmask 1043459   ;;  %vm1236_vm10 = vcmask 1044484   ;;  %vm1238_vm11 = vcmask 1045509  }
  0x19   :  { %v83_v35 = vld [vmem:[#allocation2 + $0x3f] sm:$0xff]  ;;  %v105_v37 = vpack.c.bf16 %v99_v34, %v98_v33  ;;  %v101_v40 = vld [vmem:[#allocation2 + $0x50] sm:$0xff]  ;;  %v84_v41 = vld [vmem:[#allocation2 + $0x47] sm:$0xff]  ;;  %vm1240_vm12 = vcmask 1046534   ;;  %vm1242_vm13 = vcmask 1047559   ;;  %vm1945_vm14 = vcmask 123904  }
  0x1a   :  { %6774 = vmatmul.mubr.msk.bf16.gmra.mxu1 %vm67_vm2, %v87_v26  ;;  %v89_v38 = vpack.c.bf16 %v83_v35, %v82_v36  ;;  %v85_v42 = vld [vmem:[#allocation2 + $0x4f] sm:$0xff]  ;;  %v106_v43 = vpack.c.bf16 %v101_v40, %v100_v39  ;;  %v290_v48 = vld [vmem:[#allocation2 + $0x19] sm:$0xff]  ;;  %v291_v49 = vld [vmem:[#allocation2 + $0x21] sm:$0xff]  ;;  %s7376_s26 = smov 32   ;;  %vm6274_vm15 = vcmask 261120  }
  0x1b   :  { %6752 = vmatmul.mubr.msk.bf16.gmra.mxu0 %vm67_vm2, %v103_v25  ;;  %6777 = vmatprep.mubr.msk.bf16.mxu1 %vm7373_vm3, %v7372_v2  ;;  %v90_v44 = vpack.c.bf16 %v85_v42, %v84_v41  ;;  %v288_v45 = vld [vmem:[#allocation2 + $0x9] sm:$0xff]  ;;  %v289_v46 = vld [vmem:[#allocation2 + $0x11] sm:$0xff]  ;;  %v299_v50 = vpack.c.bf16 %v291_v49, %v290_v48  ;;  %v294_v54 = vld [vmem:[#allocation2 + $0x39] sm:$0xff] }
  0x1c   :  { %6755 = vmatprep.mubr.msk.bf16.mxu0 %vm7373_vm3, %v7372_v2  ;;  %v298_v47 = vpack.c.bf16 %v289_v46, %v288_v45  ;;  %v7593_v51 = vld [vmem:[#allocation2 + $0x29] sm:$0xff]  ;;  %v293_v52 = vld [vmem:[#allocation2 + $0x31] sm:$0xff]  ;;  %v295_v55 = vld [vmem:[#allocation2 + $0x41] sm:$0xff] }
  0x1d   :  { %v300_v53 = vpack.c.bf16 %v293_v52, %v7593_v51  ;;  %v301_v56 = vpack.c.bf16 %v295_v55, %v294_v54  ;;  %v296_v57 = vld [vmem:[#allocation2 + $0x49] sm:$0xff]  ;;  %v297_v58 = vld [vmem:[#allocation2 + $0x51] sm:$0xff]  ;;  %v6314_v60 = vld [vmem:[%s9130_s3 + $0x4] sm:$0xf] }
  0x1e   :  { %v302_v59 = vpack.c.bf16 %v297_v58, %v296_v57  ;;  %v484_v61 = vsel %vm482_vm4, %v6314_v60, 0  ;;  %v449_v62 = vld [vmem:[%s9130_s3] sm:$0xf] }
  0x1f   :  { %6812 = vmatpush3.bf16.msra.mxu1 %v484_v61  ;;  %v573_v63 = vsel %vm482_vm4, %v449_v62, 0  ;;  %v7629_v54 = vld [vmem:[%s9129_s2] ss:$0 sm:$0xff] }
  0x20   :  { %6855 = vmatprep.subr.bf16.mxu1 %v7372_v2 }
  0x22   :  { %6778 = vmatmul.mubr.msk.bf16.gmra.mxu1 %vm67_vm2, %v88_v32 }
  0x23   :  { %6756 = vmatmul.mubr.msk.bf16.gmra.mxu0 %vm67_vm2, %v7565_v31  ;;  %6781 = vmatprep.mubr.msk.bf16.mxu1 %vm7373_vm3, %v7372_v2 }
  0x24   :  { %6759 = vmatprep.mubr.msk.bf16.mxu0 %vm7373_vm3, %v7372_v2 }
  0x2a   :  { %6782 = vmatmul.mubr.msk.bf16.gmra.mxu1 %vm67_vm2, %v89_v38 }
  0x2b   :  { %6760 = vmatmul.mubr.msk.bf16.gmra.mxu0 %vm67_vm2, %v105_v37  ;;  %6785 = vmatprep.mubr.msk.bf16.mxu1 %vm7373_vm3, %v7372_v2 }
  0x2c   :  { %6763 = vmatprep.mubr.msk.bf16.mxu0 %vm7373_vm3, %v7372_v2 }
  0x32   :  { %6786 = vmatmul.mubr.msk.bf16.gmra.mxu1 %vm67_vm2, %v90_v44 }
  0x33   :  { %6764 = vmatmul.mubr.msk.bf16.gmra.mxu0 %vm67_vm2, %v106_v43  ;;  %6813 = vmatprep.mubr.msk.bf16.mxu1 %vm7373_vm3, %v7372_v2 }
  0x34   :  { %6791 = vmatprep.mubr.msk.bf16.mxu0 %vm7373_vm3, %v7372_v2 }
  0x3b   :  { %6792 = vmatmul.mubr.msk.bf16.vlgmr.msra.gmra.mxu0 %vm67_vm2, %v298_v47 }
  0x3c   :  { %6795 = vmatprep.mubr.msk.bf16.mxu0 %vm7373_vm3, %v7372_v2  ;;  %6834 = vmatpush3.bf16.msra.mxu0 %v573_v63 }
  0x43   :  { %6796 = vmatmul.mubr.msk.bf16.gmra.mxu0 %vm67_vm2, %v299_v50 }
  0x44   :  { %6799 = vmatprep.mubr.msk.bf16.mxu0 %vm7373_vm3, %v7372_v2 }
  0x4b   :  { %6800 = vmatmul.mubr.msk.bf16.gmra.mxu0 %vm67_vm2, %v300_v53 }
  0x4c   :  { %6803 = vmatprep.mubr.msk.bf16.mxu0 %vm7373_vm3, %v7372_v2 }
  0x53   :  { %6804 = vmatmul.mubr.msk.bf16.gmra.mxu0 %vm67_vm2, %v301_v56 }
  0x54   :  { %6807 = vmatprep.mubr.msk.bf16.mxu0 %vm7373_vm3, %v7372_v2 }
  0x5b   :  { %6808 = vmatmul.mubr.msk.bf16.gmra.mxu0 %vm67_vm2, %v302_v59 }
  0x5c   :  { %6835 = vmatprep.mubr.msk.bf16.mxu0 %vm7373_vm3, %v7372_v2 }
  0xd2   :  { %v251_v1 = vpop.f32.mrf.mxu1 }
  0xd3   :  { %v162_v0 = vpop.f32.mrf.mxu0 }
  0xd4   :  { %v6771_v4 = vpop.f32.mrf.mxu1  ;;  %v252_v50 = vadd.f32 %v251_v1, %v162_v0 }
  0xd5   :  { %v6749_v3 = vpop.f32.mrf.mxu0 }
  0xd6   :  { %v254_v14 = vpop.f32.mrf.mxu1 }
  0xd7   :  { %v165_v13 = vpop.f32.mrf.mxu0 }
  0xd8   :  { %v6772_v16 = vpop.f32.mrf.mxu1  ;;  %v255_v57 = vadd.f32 %v254_v14, %v165_v13 }
  0xd9   :  { %v6750_v15 = vpop.f32.mrf.mxu0 }
  0xda   :  { %v259_v18 = vpop.f32.mrf.mxu1 }
  0xdb   :  { %v170_v17 = vpop.f32.mrf.mxu0 }
  0xdc   :  { %v6775_v20 = vpop.f32.mrf.mxu1  ;;  %v260_v63 = vadd.f32 %v259_v18, %v170_v17 }
  0xdd   :  { %v6753_v19 = vpop.f32.mrf.mxu0 }
  0xde   :  { %v262_v22 = vpop.f32.mrf.mxu1 }
  0xdf   :  { %v173_v21 = vpop.f32.mrf.mxu0 }
  0xe0   :  { %v6776_v24 = vpop.f32.mrf.mxu1  ;;  %v263_v16 = vadd.f32 %v262_v22, %v173_v21 }
  0xe1   :  { %v6754_v23 = vpop.f32.mrf.mxu0  ;;  %v6325_v24 = vld [vmem:[%s9130_s3 + $0x8] sm:$0xf] }
  0xe2   :  { %v267_v26 = vpop.f32.mrf.mxu1 }
  0xe3   :  { %v178_v25 = vpop.f32.mrf.mxu0 }
  0xe4   :  { %v6779_v28 = vpop.f32.mrf.mxu1 }
  0xe5   :  { %v6757_v27 = vpop.f32.mrf.mxu0 }
  0xe6   :  { %v269_v32 = vpop.f32.mrf.mxu1 }
  0xe7   :  { %v180_v29 = vpop.f32.mrf.mxu0 }
  0xe8   :  { %v6780_v34 = vpop.f32.mrf.mxu1 }
  0xe9   :  { %v6758_v33 = vpop.f32.mrf.mxu0 }
  0xea   :  { %v273_v36 = vpop.f32.mrf.mxu1  ;;  %v679_v33 = vsel %vm482_vm4, %v6325_v24, 0 }
  0xeb   :  { %v184_v35 = vpop.f32.mrf.mxu0 }
  0xec   :  { %v6783_v38 = vpop.f32.mrf.mxu1 }
  0xed   :  { %v6761_v37 = vpop.f32.mrf.mxu0  ;;  %v274_v38 = vadd.f32 %v273_v36, %v184_v35 }
  0xee   :  { %v7616_v40 = vpop.f32.mrf.mxu1 }
  0xef   :  { %v7614_v39 = vpop.f32.mrf.mxu0 }
  0xf0   :  { %v6784_v42 = vpop.f32.mrf.mxu1 }
  0xf1   :  { %v6762_v41 = vpop.f32.mrf.mxu0 }
  0xf2   :  { %v7620_v44 = vpop.f32.mrf.mxu1 }
  0xf3   :  { %v7618_v43 = vpop.f32.mrf.mxu0 }
  0xf4   :  { %v6787_v46 = vpop.f32.mrf.mxu1 }
  0xf5   :  { %v6765_v45 = vpop.f32.mrf.mxu0 }
  0xf6   :  { %v7624_v48 = vpop.f32.mrf.mxu1 }
  0xf7   :  { %v7622_v47 = vpop.f32.mrf.mxu0 }
  0xf8   :  { %v6788_v52 = vpop.f32.mrf.mxu1 }
  0xf9   :  { %v6766_v49 = vpop.f32.mrf.mxu0 }
  0xfb   :  { %v357_v53 = vpop.f32.mrf.mxu0 }
  0xfc   :  { %v394_v55 = vadd.f32 %v357_v53, %v252_v50  ;;  %v277_v53 = vadd.f32 %v7616_v40, %v7614_v39  ;;  %v282_v39 = vadd.f32 %v7620_v44, %v7618_v43 }
  0xfd   :  { %v6793_v56 = vpop.f32.mrf.mxu0 }
  0xfe   :  { %v409_v58 = vadd.f32 %v7629_v54, %v394_v55 }
  0xff   :  { %v360_v59 = vpop.f32.mrf.mxu0 }
 0x100   :  { %v417_v60 = vmax.f32 %v409_v58, 0.0  ;;  %v395_v61 = vadd.f32 %v360_v59, %v255_v57 }
 0x101   :  { %v6794_v62 = vpop.f32.mrf.mxu0 }
 0x102   :  { %426 = vst.msk [vmem:[#allocation2 + $0x8] sm:$0xff] %vm425_vm5, %v417_v60  ;;  %v410_v0 = vadd.f32 %v7629_v54, %v395_v61 }
 0x103   :  { %v365_v1 = vpop.f32.mrf.mxu0 }
 0x104   :  { %v418_v3 = vmax.f32 %v410_v0, 0.0  ;;  %v396_v4 = vadd.f32 %v365_v1, %v260_v63 }
 0x105   :  { %v6797_v15 = vpop.f32.mrf.mxu0 }
 0x106   :  { %427 = vst.msk [vmem:[#allocation2 + $0x10] sm:$0xff] %vm425_vm5, %v418_v3  ;;  %v411_v13 = vadd.f32 %v7629_v54, %v396_v4 }
 0x107   :  { %v368_v14 = vpop.f32.mrf.mxu0 }
 0x108   :  { %v419_v19 = vmax.f32 %v411_v13, 0.0  ;;  %v397_v20 = vadd.f32 %v368_v14, %v263_v16  ;;  %v285_v13 = vadd.f32 %v7624_v48, %v7622_v47 }
 0x109   :  { %v6798_v23 = vpop.f32.mrf.mxu0  ;;  %v450_v26 = vld [vmem:[#allocation2 + $0x8] sm:$0xff] }
 0x10a   :  { %428 = vst.msk [vmem:[#allocation2 + $0x18] sm:$0xff] %vm425_vm5, %v419_v19  ;;  %v412_v17 = vadd.f32 %v7629_v54, %v397_v20  ;;  %v434_v28 = vld [vmem:[#allocation2 + $0x7] sm:$0xff] }
 0x10b   :  { %v373_v18 = vpop.f32.mrf.mxu0 }
 0x10c   :  { %v420_v25 = vmax.f32 %v412_v17, 0.0 }
 0x10d   :  { %v435_v21 = vld [vmem:[#allocation2 + $0xf] sm:$0xff]  ;;  %v6801_v22 = vpop.f32.mrf.mxu0 }
 0x10e   :  { %v451_v27 = vld [vmem:[#allocation2 + $0x10] sm:$0xff]  ;;  %429 = vst.msk [vmem:[#allocation2 + $0x20] sm:$0xff] %vm425_vm5, %v420_v25  ;;  %v444_v32 = vpack.c.bf16 %v435_v21, %v434_v28 }
 0x10f   :  { %v460_v29 = vpack.c.bf16 %v451_v27, %v450_v26  ;;  %v375_v34 = vpop.f32.mrf.mxu0 }
 0x110   :  { %6836 = vmatmul.mubr.msk.bf16.vlgmr.msra.gmra.mxu0 %vm425_vm5, %v444_v32 }
 0x111   :  { %6814 = vmatmul.mubr.msk.bf16.vlgmr.msra.gmra.mxu1 %vm425_vm5, %v460_v29  ;;  %v6802_v37 = vpop.f32.mrf.mxu0  ;;  %6839 = vmatprep.mubr.msk.bf16.mxu0 %vm7373_vm3, %v7372_v2  ;;  %v436_v42 = vld [vmem:[#allocation2 + $0x17] sm:$0xff] }
 0x112   :  { %6856 = vmatpush3.bf16.msra.mxu1 %v679_v33  ;;  %6817 = vmatprep.mubr.msk.bf16.mxu1 %vm7373_vm3, %v7372_v2  ;;  %v452_v49 = vld [vmem:[#allocation2 + $0x18] sm:$0xff] }
 0x113   :  { %v379_v41 = vpop.f32.mrf.mxu0  ;;  %v7651_v55 = vld [vmem:[#allocation2 + $0x11] sm:$0xff] }
 0x114   :  { %v398_v45 = vadd.f32 %v379_v41, %v274_v38  ;;  %v646_v41 = vld [vmem:[#allocation2 + $0x9] sm:$0xff] }
 0x115   :  { %v6805_v46 = vpop.f32.mrf.mxu0  ;;  %v453_v50 = vld [vmem:[#allocation2 + $0x20] sm:$0xff] }
 0x116   :  { %v437_v52 = vld [vmem:[#allocation2 + $0x1f] sm:$0xff]  ;;  %v413_v56 = vadd.f32 %v7629_v54, %v398_v45  ;;  %v461_v57 = vpack.c.bf16 %v453_v50, %v452_v49  ;;  %v438_v63 = vld [vmem:[#allocation2 + $0x27] sm:$0xff] }
 0x117   :  { %v445_v58 = vpack.c.bf16 %v437_v52, %v436_v42  ;;  %v7654_v35 = vld [vmem:[#allocation2 + $0x19] sm:$0xff]  ;;  %v382_v36 = vpop.f32.mrf.mxu0  ;;  %v649_v4 = vld [vmem:[#allocation2 + $0x21] sm:$0xff]  ;;  %v446_v44 = vpack.c.bf16 %v7563_v30, %v438_v63  ;;  %v656_v42 = vpack.c.bf16 %v7651_v55, %v646_v41 }
 0x118   :  { %1285 = vst.msk [vmem:[#allocation2 + $0x18] sm:$0xff] %vm46_vm1, %v7372_v2  ;;  %v421_v59 = vmax.f32 %v413_v56, 0.0  ;;  %v399_v60 = vadd.f32 %v382_v36, %v277_v53  ;;  %v7668_v15 = vld [vmem:[#allocation2 + $0x20] sm:$0xff]  ;;  %v657_v45 = vpack.c.bf16 %v649_v4, %v7654_v35 }
 0x119   :  { %6818 = vmatmul.mubr.msk.bf16.gmra.mxu1 %vm425_vm5, %v461_v57  ;;  %6840 = vmatmul.mubr.msk.bf16.gmra.mxu0 %vm425_vm5, %v445_v58  ;;  %v6806_v61 = vpop.f32.mrf.mxu0  ;;  %v7670_v16 = vld [vmem:[#allocation2 + $0x26] sm:$0xff]  ;;  %v1303_v56 = vld [vmem:[%s9134_s7] sm:$0xf] }
 0x11a   :  { %6821 = vmatprep.mubr.msk.bf16.mxu1 %vm7373_vm3, %v7372_v2  ;;  %6843 = vmatprep.mubr.msk.bf16.mxu0 %vm7373_vm3, %v7372_v2  ;;  %430 = vst.msk [vmem:[#allocation2 + $0x38] sm:$0xff] %vm425_vm5, %v421_v59  ;;  %v414_v40 = vadd.f32 %v7629_v54, %v399_v60  ;;  %v7681_v20 = vld [vmem:[#allocation2 + $0x22] sm:$0xff]  ;;  %v1407_v57 = vsel %vm482_vm4, %v1303_v56, 0 }
 0x11b   :  { %v387_v62 = vpop.f32.mrf.mxu0  ;;  %v6334_v55 = vld [vmem:[%s9134_s7 + $0x4] sm:$0xf]  ;;  %7322 = vmatprep.subr.msk.bf16.mxu1 %vm482_vm4, %v1303_v56  ;;  %v7753_v56 = vld [vmem:[%s9131_s4] ss:$0 sm:$0xff] }
 0x11c   :  { %v422_v0 = vmax.f32 %v414_v40, 0.0  ;;  %v400_v1 = vadd.f32 %v387_v62, %v282_v39  ;;  %7321 = vmatprep.subr.msk.bf16.mxu0 %vm482_vm4, %v6334_v55 }
 0x11d   :  { %v6809_v3 = vpop.f32.mrf.mxu0 }
 0x11e   :  { %431 = vst.msk [vmem:[#allocation2 + $0x40] sm:$0xff] %vm425_vm5, %v422_v0  ;;  %v415_v43 = vadd.f32 %v7629_v54, %v400_v1  ;;  %v7738_v3 = vld [vmem:[%s9134_s7 + $0x8] sm:$0xf] }
 0x11f   :  { %v7677_v14 = vld [vmem:[#allocation2 + $0x1e] sm:$0xff]  ;;  %v390_v23 = vpop.f32.mrf.mxu0 }
 0x120   :  { %v7679_v19 = vld [vmem:[#allocation2 + $0x1a] sm:$0xff]  ;;  %v423_v17 = vmax.f32 %v415_v43, 0.0  ;;  %v401_v18 = vadd.f32 %v390_v23, %v285_v13 }
 0x121   :  { %2141 = vst.msk [vmem:[#allocation2 + $0x20] sm:$0xff] %vm67_vm2, %v7502_v8  ;;  %6822 = vmatmul.mubr.msk.bf16.gmra.mxu1 %vm425_vm5, %v7565_v31  ;;  %6844 = vmatmul.mubr.msk.bf16.gmra.mxu0 %vm425_vm5, %v446_v44  ;;  %v6810_v47 = vpop.f32.mrf.mxu0  ;;  %v456_v24 = vld [vmem:[#allocation2 + $0x38] sm:$0xff] }
 0x122   :  { %6825 = vmatprep.mubr.msk.bf16.mxu1 %vm7373_vm3, %v7372_v2  ;;  %6847 = vmatprep.mubr.msk.bf16.mxu0 %vm7373_vm3, %v7372_v2  ;;  %432 = vst.msk [vmem:[#allocation2 + $0x48] sm:$0xff] %vm425_vm5, %v423_v17  ;;  %v416_v30 = vadd.f32 %v7629_v54, %v401_v18  ;;  %v440_v21 = vld [vmem:[#allocation2 + $0x37] sm:$0xff] }
 0x123   :  { %v651_v46 = vld [vmem:[#allocation2 + $0x31] sm:$0xff] }
 0x124   :  { %v424_v48 = vmax.f32 %v416_v30, 0.0  ;;  %v658_v49 = vpack.c.bf16 %v651_v46, %v7593_v51  ;;  %v1331_v51 = vsel %vm482_vm4, %v6334_v55, 0  ;;  %v813_v55 = vlaneseq }
 0x125   :  { %v441_v25 = vld [vmem:[#allocation2 + $0x3f] sm:$0xff]  ;;  %6878 = vmatpush3.bf16.msra.mxu0 %v1331_v51 }
 0x126   :  { %v457_v26 = vld [vmem:[#allocation2 + $0x40] sm:$0xff]  ;;  %433 = vst.msk [vmem:[#allocation2 + $0x50] sm:$0xff] %vm425_vm5, %v424_v48  ;;  %v447_v22 = vpack.c.bf16 %v441_v25, %v440_v21  ;;  %7323 = vmatprep.subr.msk.bf16.mxu0 %vm482_vm4, %v7738_v3 }
 0x127   :  { %v463_v31 = vpack.c.bf16 %v457_v26, %v456_v24  ;;  %v652_v50 = vld [vmem:[#allocation2 + $0x39] sm:$0xff] }
 0x129   :  { %6826 = vmatmul.mubr.msk.bf16.gmra.mxu1 %vm425_vm5, %v463_v31  ;;  %6848 = vmatmul.mubr.msk.bf16.gmra.mxu0 %vm425_vm5, %v447_v22  ;;  %v442_v54 = vld [vmem:[#allocation2 + $0x47] sm:$0xff] }
 0x12a   :  { %6829 = vmatprep.mubr.msk.bf16.mxu1 %vm7373_vm3, %v7372_v2  ;;  %6851 = vmatprep.mubr.msk.bf16.mxu0 %vm7373_vm3, %v7372_v2  ;;  %v653_v27 = vld [vmem:[#allocation2 + $0x41] sm:$0xff] }
 0x12b   :  { %v458_v28 = vld [vmem:[#allocation2 + $0x48] sm:$0xff]  ;;  %v659_v52 = vpack.c.bf16 %v653_v27, %v652_v50 }
 0x12d   :  { %v459_v29 = vld [vmem:[#allocation2 + $0x50] sm:$0xff] }
 0x12e   :  { %v443_v32 = vld [vmem:[#allocation2 + $0x4f] sm:$0xff]  ;;  %v464_v34 = vpack.c.bf16 %v459_v29, %v458_v28 }
 0x12f   :  { %v654_v33 = vld [vmem:[#allocation2 + $0x49] sm:$0xff]  ;;  %v448_v37 = vpack.c.bf16 %v443_v32, %v442_v54  ;;  %v655_v38 = vld [vmem:[#allocation2 + $0x51] sm:$0xff] }
 0x130   :  { %1286 = vst.msk [vmem:[#allocation2 + $0x48] sm:$0xff] %vm46_vm1, %v7372_v2  ;;  %v660_v53 = vpack.c.bf16 %v655_v38, %v654_v33 }
 0x131   :  { %2145 = vst.msk [vmem:[#allocation2 + $0x50] sm:$0xff] %vm67_vm2, %v7539_v12  ;;  %6830 = vmatmul.mubr.msk.bf16.gmra.mxu1 %vm425_vm5, %v464_v34  ;;  %6852 = vmatmul.mubr.msk.bf16.gmra.mxu0 %vm425_vm5, %v448_v37 }
 0x132   :  { %6857 = vmatprep.mubr.msk.bf16.mxu1 %vm7373_vm3, %v7372_v2 }
 0x139   :  { %6858 = vmatmul.mubr.msk.bf16.vlgmr.msra.gmra.mxu1 %vm425_vm5, %v656_v42 }
 0x13a   :  { %6861 = vmatprep.mubr.msk.bf16.mxu1 %vm7373_vm3, %v7372_v2  ;;  %6888 = vmatpush3.bf16.msra.mxu1 %v1407_v57 }
 0x141   :  { %6862 = vmatmul.mubr.msk.bf16.gmra.mxu1 %vm425_vm5, %v657_v45 }
 0x142   :  { %6865 = vmatprep.mubr.msk.bf16.mxu1 %vm7373_vm3, %v7372_v2 }
 0x149   :  { %6866 = vmatmul.mubr.msk.bf16.gmra.mxu1 %vm425_vm5, %v658_v49 }
 0x14a   :  { %6869 = vmatprep.mubr.msk.bf16.mxu1 %vm7373_vm3, %v7372_v2 }
 0x151   :  { %6870 = vmatmul.mubr.msk.bf16.gmra.mxu1 %vm425_vm5, %v659_v52  ;;  %v7374_v52 = vmov 1983009808  }
 0x152   :  { %6873 = vmatprep.mubr.msk.bf16.mxu1 %vm7373_vm3, %v7372_v2 }
 0x159   :  { %6874 = vmatmul.mubr.msk.bf16.gmra.mxu1 %vm425_vm5, %v660_v53  ;;  %v811_v53 = vunpack.c.l.s4 %v7374_v52 }
 0x1d0   :  { %v609_v35 = vpop.f32.mrf.mxu0 }
 0x1d1   :  { %v520_v58 = vpop.f32.mrf.mxu1 }
 0x1d2   :  { %v6837_v59 = vpop.f32.mrf.mxu0  ;;  %v610_v50 = vadd.f32 %v609_v35, %v520_v58  ;;  %v7759_v58 = vld [vmem:[%s9132_s5] ss:$0 sm:$0xff] }
 0x1d3   :  { %v6815_v36 = vpop.f32.mrf.mxu1 }
 0x1d4   :  { %v612_v61 = vpop.f32.mrf.mxu0 }
 0x1d5   :  { %v523_v60 = vpop.f32.mrf.mxu1 }
 0x1d6   :  { %v6838_v40 = vpop.f32.mrf.mxu0  ;;  %v613_v59 = vadd.f32 %v612_v61, %v523_v60 }
 0x1d7   :  { %v6816_v39 = vpop.f32.mrf.mxu1  ;;  %v812_v40 = vunpack.c.0.s8 %v811_v53 }
 0x1d9   :  { %v528_v62 = vpop.f32.mrf.mxu1  ;;  %v617_v63 = vpop.f32.mrf.mxu0 }
 0x1db   :  { %v6819_v0 = vpop.f32.mrf.mxu1  ;;  %v6841_v1 = vpop.f32.mrf.mxu0 }
 0x1dc   :  { %v814_v0 = vshrl.u32 %v813_v55, 7 }
 0x1dd   :  { %v7740_v4 = vpop.f32.mrf.mxu1  ;;  %v7742_v13 = vpop.f32.mrf.mxu0 }
 0x1de   :  { %v7767_v61 = vsub.s32 %v812_v40, %v814_v0 }
 0x1df   :  { %v6820_v43 = vpop.f32.mrf.mxu1  ;;  %v6842_v44 = vpop.f32.mrf.mxu0 }
 0x1e0   :  { %v7764_v44 = vld [vmem:[%s9133_s6] ss:$0 sm:$0xff] }
 0x1e1   :  { %v536_v23 = vpop.f32.mrf.mxu1  ;;  %v625_v17 = vpop.f32.mrf.mxu0 }
 0x1e2   :  { %v618_v17 = vadd.f32 %v617_v63, %v528_v62 }
 0x1e3   :  { %v6823_v18 = vpop.f32.mrf.mxu1  ;;  %v6845_v47 = vpop.f32.mrf.mxu0 }
 0x1e4   :  { %v1296_v47 = vld [vmem:[#allocation2 + $0x2e] sm:$0xff] }
 0x1e5   :  { %v538_v30 = vpop.f32.mrf.mxu1  ;;  %v627_v48 = vpop.f32.mrf.mxu0 }
 0x1e7   :  { %v6824_v24 = vpop.f32.mrf.mxu1  ;;  %v6846_v25 = vpop.f32.mrf.mxu0 }
 0x1e9   :  { %v542_v26 = vpop.f32.mrf.mxu1  ;;  %v631_v21 = vpop.f32.mrf.mxu0 }
 0x1eb   :  { %v6827_v31 = vpop.f32.mrf.mxu1  ;;  %v6849_v22 = vpop.f32.mrf.mxu0 }
 0x1ec   :  { %v1306_v31 = vld [vmem:[#allocation2 + $0x18] sm:$0xff] }
 0x1ed   :  { %v545_v54 = vpop.f32.mrf.mxu1  ;;  %v634_v27 = vpop.f32.mrf.mxu0 }
 0x1ee   :  { %v7791_v52 = vadd.f32 %v634_v27, %v545_v54 }
 0x1ef   :  { %v6828_v28 = vpop.f32.mrf.mxu1  ;;  %v6850_v29 = vpop.f32.mrf.mxu0 }
 0x1f0   :  { %v7772_v28 = vpack.c.bf16 %v1296_v47, %v7670_v16  ;;  %v7786_v16 = vsel %vm482_vm4, %v7738_v3, 0 }
 0x1f1   :  { %v550_v32 = vpop.f32.mrf.mxu1  ;;  %v639_v33 = vpop.f32.mrf.mxu0 }
 0x1f2   :  { %v7746_v34 = vadd.f32 %v639_v33, %v550_v32  ;;  %v621_v33 = vadd.f32 %v7742_v13, %v7740_v4 }
 0x1f3   :  { %v6831_v37 = vpop.f32.mrf.mxu1  ;;  %v6853_v38 = vpop.f32.mrf.mxu0 }
 0x1f4   :  { %v7779_v37 = vadd.f32 %v631_v21, %v542_v26 }
 0x1f5   :  { %v553_v41 = vpop.f32.mrf.mxu1  ;;  %v642_v42 = vpop.f32.mrf.mxu0 }
 0x1f6   :  { %v7748_v45 = vadd.f32 %v642_v42, %v553_v41  ;;  %v7782_v41 = vpack.c.bf16 %v7668_v15, %v1306_v31 }
 0x1f7   :  { %v6832_v46 = vpop.f32.mrf.mxu1  ;;  %v6854_v49 = vpop.f32.mrf.mxu0 }
 0x1f9   :  { %v715_v51 = vpop.f32.mrf.mxu1 }
 0x1fa   :  { %v752_v57 = vadd.f32 %v715_v51, %v610_v50 }
 0x1fb   :  { %v6859_v36 = vpop.f32.mrf.mxu1 }
 0x1fc   :  { %v767_v39 = vadd.f32 %v7753_v56, %v752_v57 }
 0x1fd   :  { %v718_v35 = vpop.f32.mrf.mxu1 }
 0x1fe   :  { %v775_v1 = vmax.f32 %v767_v39, 0.0  ;;  %v753_v43 = vadd.f32 %v718_v35, %v613_v59 }
 0x1ff   :  { %v6860_v23 = vpop.f32.mrf.mxu1 }
 0x200   :  { %v791_v60 = vmul.f32 %v7759_v58, %v775_v1  ;;  %v768_v18 = vadd.f32 %v7753_v56, %v753_v43 }
 0x201   :  { %v723_v30 = vpop.f32.mrf.mxu1 }
 0x202   :  { %v801_v48 = vadd.f32 %v7764_v44, %v791_v60  ;;  %v776_v24 = vmax.f32 %v768_v18, 0.0  ;;  %v754_v25 = vadd.f32 %v723_v30, %v618_v17 }
 0x203   :  { %v6863_v22 = vpop.f32.mrf.mxu1 }
 0x204   :  { %v809_v29 = vcombine.high %v801_v48, %v801_v48  ;;  %v816_v62 = vrot.slane %v801_v48, %v7767_v61  ;;  %v792_v63 = vmul.f32 %v7759_v58, %v776_v24  ;;  %v769_v32 = vadd.f32 %v7753_v56, %v754_v25 }
 0x205   :  { %v726_v38 = vpop.f32.mrf.mxu1 }
 0x206   :  { %v823_v42 = vrot.slane %v809_v29, %v7767_v61  ;;  %v824_v46 = vcombine.high %v816_v62, %v816_v62  ;;  %v894_v49 = vsel %vm893_vm6, %v816_v62, -inf  ;;  %v802_v50 = vadd.f32 %v7764_v44, %v792_v63 }
 0x207   :  { %v895_v4 = vrot.slane %v894_v49, 4  ;;  %v777_v13 = vmax.f32 %v769_v32, 0.0  ;;  %v755_v26 = vadd.f32 %v726_v38, %v621_v33  ;;  %v6864_v21 = vpop.f32.mrf.mxu1 }
 0x208   :  { %v825_v53 = vcombine.high %v823_v42, %v823_v42  ;;  %v901_v15 = vsel %vm893_vm6, %v824_v46, -inf  ;;  %v908_v55 = vsel %vm893_vm6, %v823_v42, -inf  ;;  %v826_v3 = vcombine.high %v802_v50, %v802_v50 }
 0x209   :  { %v896_v51 = vmax.f32 %v894_v49, %v895_v4  ;;  %v902_v57 = vrot.slane %v901_v15, 4  ;;  %v909_v36 = vrot.slane %v908_v55, 4  ;;  %v833_v59 = vrot.slane %v802_v50, %v7767_v61  ;;  %v731_v39 = vpop.f32.mrf.mxu1 }
 0x20a   :  { %v915_v40 = vsel %vm893_vm6, %v825_v53, -inf  ;;  %v840_v54 = vrot.slane %v826_v3, %v7767_v61  ;;  %v793_v27 = vmul.f32 %v7759_v58, %v777_v13  ;;  %v7800_v0 = vadd.f32 %v7753_v56, %v755_v26 }
 0x20b   :  { %v897_v35 = vrot.slane %v896_v51, 2  ;;  %v903_v1 = vmax.f32 %v901_v15, %v902_v57  ;;  %v910_v43 = vmax.f32 %v908_v55, %v909_v36  ;;  %v916_v23 = vrot.slane %v915_v40, 4  ;;  %v6867_v17 = vpop.f32.mrf.mxu1 }
 0x20c   :  { %v841_v60 = vcombine.high %v833_v59, %v833_v59  ;;  %v842_v18 = vcombine.high %v840_v54, %v840_v54  ;;  %v922_v47 = vsel %vm893_vm6, %v833_v59, -inf  ;;  %v936_v30 = vsel %vm893_vm6, %v840_v54, -inf }
 0x20d   :  { %v898_v48 = vmax.f32 %v896_v51, %v897_v35  ;;  %v904_v24 = vrot.slane %v903_v1, 2  ;;  %v911_v25 = vrot.slane %v910_v43, 2  ;;  %v917_v31 = vmax.f32 %v915_v40, %v916_v23  ;;  %v733_v22 = vpop.f32.mrf.mxu1 }
 0x20e   :  { %v923_v29 = vrot.slane %v922_v47, 4  ;;  %v929_v62 = vsel %vm893_vm6, %v841_v60, -inf  ;;  %v937_v63 = vrot.slane %v936_v30, 4  ;;  %v943_v32 = vsel %vm893_vm6, %v842_v18, -inf }
 0x20f   :  { %v899_v33 = vrot.slane %v898_v48, 1  ;;  %v905_v38 = vmax.f32 %v903_v1, %v904_v24  ;;  %v912_v42 = vmax.f32 %v910_v43, %v911_v25  ;;  %v918_v46 = vrot.slane %v917_v31, 2  ;;  %v6868_v49 = vpop.f32.mrf.mxu1 }
 0x210   :  { %v924_v50 = vmax.f32 %v922_v47, %v923_v29  ;;  %v930_v4 = vrot.slane %v929_v62, 4  ;;  %v938_v13 = vmax.f32 %v936_v30, %v937_v63  ;;  %v944_v26 = vrot.slane %v943_v32, 4 }
 0x211   :  { %v900_v21 = vmax.f32 %v898_v48, %v899_v33  ;;  %v906_v53 = vrot.slane %v905_v38, 1  ;;  %v913_v15 = vrot.slane %v912_v42, 1  ;;  %v919_v55 = vmax.f32 %v917_v31, %v918_v46  ;;  %v737_v3 = vpop.f32.mrf.mxu1 }
 0x212   :  { %v925_v51 = vrot.slane %v924_v50, 2  ;;  %v931_v57 = vmax.f32 %v929_v62, %v930_v4  ;;  %v939_v36 = vrot.slane %v938_v13, 2  ;;  %v945_v59 = vmax.f32 %v943_v32, %v944_v26 }
 0x213   :  { %v907_v39 = vmax.f32 %v905_v38, %v906_v53  ;;  %v914_v40 = vmax.f32 %v912_v42, %v913_v15  ;;  %v920_v54 = vrot.slane %v919_v55, 1  ;;  %v803_v35 = vadd.f32 %v7764_v44, %v793_v27  ;;  %v6871_v1 = vpop.f32.mrf.mxu1 }
 0x214   :  { %v926_v43 = vmax.f32 %v924_v50, %v925_v51  ;;  %v932_v23 = vrot.slane %v931_v57, 2  ;;  %v940_v17 = vmax.f32 %v938_v13, %v939_v36  ;;  %v946_v60 = vrot.slane %v945_v59, 2 }
 0x215   :  { %v921_v18 = vmax.f32 %v919_v55, %v920_v54  ;;  %v1231_v47 = vsel %vm1230_vm7, %v907_v39, %v900_v21  ;;  %v843_v30 = vcombine.high %v803_v35, %v803_v35  ;;  %v850_v48 = vrot.slane %v803_v35, %v7767_v61  ;;  %v740_v24 = vpop.f32.mrf.mxu1 }
 0x216   :  { %v1233_v25 = vsel %vm1232_vm8, %v914_v40, %v1231_v47  ;;  %v927_v31 = vrot.slane %v926_v43, 1  ;;  %v933_v22 = vmax.f32 %v931_v57, %v932_v23  ;;  %v941_v29 = vrot.slane %v940_v17, 1 }
 0x217   :  { %v947_v62 = vmax.f32 %v945_v59, %v946_v60  ;;  %v1235_v27 = vsel %vm1234_vm9, %v921_v18, %v1233_v25  ;;  %v857_v63 = vrot.slane %v843_v30, %v7767_v61  ;;  %v858_v32 = vcombine.high %v850_v48, %v850_v48  ;;  %v6872_v33 = vpop.f32.mrf.mxu1 }
 0x218   :  { %v928_v38 = vmax.f32 %v926_v43, %v927_v31  ;;  %v934_v42 = vrot.slane %v933_v22, 1  ;;  %v942_v46 = vmax.f32 %v940_v17, %v941_v29  ;;  %v950_v49 = vsel %vm893_vm6, %v850_v48, -inf }
 0x219   :  { %v948_v50 = vrot.slane %v947_v62, 1  ;;  %v859_v4 = vcombine.high %v857_v63, %v857_v63  ;;  %v951_v13 = vrot.slane %v950_v49, 4  ;;  %v957_v26 = vsel %vm893_vm6, %v858_v32, -inf  ;;  %v745_v21 = vpop.f32.mrf.mxu1 }
 0x21a   :  { %v935_v53 = vmax.f32 %v933_v22, %v934_v42  ;;  %v1237_v15 = vsel %vm1236_vm10, %v928_v38, %v1235_v27  ;;  %v958_v55 = vrot.slane %v957_v26, 4  ;;  %v964_v51 = vsel %vm893_vm6, %v857_v63, -inf }
 0x21b   :  { %v949_v57 = vmax.f32 %v947_v62, %v948_v50  ;;  %v952_v36 = vmax.f32 %v950_v49, %v951_v13  ;;  %v965_v59 = vrot.slane %v964_v51, 4  ;;  %v971_v39 = vsel %vm893_vm6, %v859_v4, -inf  ;;  %v6875_v40 = vpop.f32.mrf.mxu1 }
 0x21c   :  { %v1239_v54 = vsel %vm1238_vm11, %v935_v53, %v1237_v15  ;;  %v959_v35 = vmax.f32 %v957_v26, %v958_v55  ;;  %v972_v1 = vrot.slane %v971_v39, 4  ;;  %v778_v43 = vmax.f32 %v7800_v0, 0.0 }
 0x21d   :  { %v1241_v23 = vsel %vm1240_vm12, %v942_v46, %v1239_v54  ;;  %v953_v17 = vrot.slane %v952_v36, 2  ;;  %v966_v60 = vmax.f32 %v964_v51, %v965_v59  ;;  %v756_v18 = vadd.f32 %v737_v3, %v7779_v37  ;;  %v7821_v47 = vpop.f32.mrf.mxu1 }
 0x21e   :  { %v1243_v30 = vsel %vm1242_vm13, %v949_v57, %v1241_v23  ;;  %v960_v48 = vrot.slane %v959_v35, 2  ;;  %v973_v25 = vmax.f32 %v971_v39, %v972_v1  ;;  %v794_v31 = vmul.f32 %v7759_v58, %v778_v43 }
 0x21f   :  { %1287 = vst.msk [vmem:[#allocation2 + $0x8] sm:$0xff] %vm425_vm5, %v1243_v30  ;;  %v954_v22 = vmax.f32 %v952_v36, %v953_v17  ;;  %v967_v29 = vrot.slane %v966_v60, 2  ;;  %v771_v0 = vadd.f32 %v7753_v56, %v756_v18  ;;  %v757_v62 = vadd.f32 %v740_v24, %v7791_v52  ;;  %v6876_v27 = vpop.f32.mrf.mxu1 }
 0x220   :  { %v961_v63 = vmax.f32 %v959_v35, %v960_v48  ;;  %v974_v32 = vrot.slane %v973_v25, 2  ;;  %v804_v37 = vadd.f32 %v7764_v44, %v794_v31  ;;  %v7830_v3 = vadd.f32 %v745_v21, %v7746_v34 }
 0x221   :  { %v955_v33 = vrot.slane %v954_v22, 1  ;;  %v968_v38 = vmax.f32 %v966_v60, %v967_v29  ;;  %v779_v42 = vmax.f32 %v771_v0, 0.0  ;;  %v772_v46 = vadd.f32 %v7753_v56, %v757_v62 }
 0x222   :  { %v962_v49 = vrot.slane %v961_v63, 1  ;;  %v975_v50 = vmax.f32 %v973_v25, %v974_v32  ;;  %v860_v4 = vcombine.high %v804_v37, %v804_v37  ;;  %v867_v13 = vrot.slane %v804_v37, %v7767_v61 }
 0x223   :  { %v956_v26 = vmax.f32 %v954_v22, %v955_v33  ;;  %v969_v52 = vrot.slane %v968_v38, 1  ;;  %v1006_v24 = vmul.f32 %v7759_v58, %v779_v42  ;;  %v780_v53 = vmax.f32 %v772_v46, 0.0 }
 0x224   :  { %v963_v15 = vmax.f32 %v961_v63, %v962_v49  ;;  %v976_v55 = vrot.slane %v975_v50, 1  ;;  %v874_v34 = vrot.slane %v860_v4, %v7767_v61  ;;  %v875_v21 = vcombine.high %v867_v13, %v867_v13 }
 0x225   :  { %v970_v51 = vmax.f32 %v968_v38, %v969_v52  ;;  %v978_v57 = vsel %vm893_vm6, %v867_v13, -inf  ;;  %v1010_v36 = vadd.f32 %v7764_v44, %v1006_v24  ;;  %v1007_v59 = vmul.f32 %v7759_v58, %v780_v53 }
 0x226   :  { %v977_v39 = vmax.f32 %v975_v50, %v976_v55  ;;  %v1244_v40 = vsel %vm1230_vm7, %v963_v15, %v956_v26  ;;  %v876_v54 = vcombine.high %v874_v34, %v874_v34  ;;  %v979_v35 = vrot.slane %v978_v57, 4 }
 0x227   :  { %v1245_v1 = vsel %vm1232_vm8, %v970_v51, %v1244_v40  ;;  %v985_v43 = vsel %vm893_vm6, %v875_v21, -inf  ;;  %v992_v23 = vsel %vm893_vm6, %v874_v34, -inf  ;;  %v1018_v17 = vcombine.high %v1010_v36, %v1010_v36 }
 0x228   :  { %v980_v60 = vmax.f32 %v978_v57, %v979_v35  ;;  %v986_v18 = vrot.slane %v985_v43, 4  ;;  %v993_v30 = vrot.slane %v992_v23, 4  ;;  %v999_v48 = vsel %vm893_vm6, %v876_v54, -inf }
 0x229   :  { %v1000_v25 = vrot.slane %v999_v48, 4  ;;  %v1246_v31 = vsel %vm1234_vm9, %v977_v39, %v1245_v1  ;;  %v1025_v22 = vrot.slane %v1010_v36, %v7767_v61  ;;  %v1032_v29 = vrot.slane %v1018_v17, %v7767_v61 }
 0x22a   :  { %v981_v0 = vrot.slane %v980_v60, 2  ;;  %v987_v62 = vmax.f32 %v985_v43, %v986_v18  ;;  %v994_v27 = vmax.f32 %v992_v23, %v993_v30  ;;  %v1011_v63 = vadd.f32 %v7764_v44, %v1007_v59 }
 0x22b   :  { %v1001_v32 = vmax.f32 %v999_v48, %v1000_v25  ;;  %v1033_v37 = vcombine.high %v1025_v22, %v1025_v22  ;;  %v1034_v33 = vcombine.high %v1032_v29, %v1032_v29  ;;  %v1102_v38 = vsel %vm893_vm6, %v1025_v22, -inf }
 0x22c   :  { %v982_v42 = vmax.f32 %v980_v60, %v981_v0  ;;  %v988_v46 = vrot.slane %v987_v62, 2  ;;  %v995_v49 = vrot.slane %v994_v27, 2  ;;  %v1103_v50 = vrot.slane %v1102_v38, 4 }
 0x22d   :  { %v1002_v4 = vrot.slane %v1001_v32, 2  ;;  %v1109_v13 = vsel %vm893_vm6, %v1033_v37, -inf  ;;  %v1116_v26 = vsel %vm893_vm6, %v1032_v29, -inf  ;;  %v1123_v52 = vsel %vm893_vm6, %v1034_v33, -inf }
 0x22e   :  { %v983_v24 = vrot.slane %v982_v42, 1  ;;  %v989_v53 = vmax.f32 %v987_v62, %v988_v46  ;;  %v996_v15 = vmax.f32 %v994_v27, %v995_v49  ;;  %v1104_v55 = vmax.f32 %v1102_v38, %v1103_v50 }
 0x22f   :  { %v1003_v34 = vmax.f32 %v1001_v32, %v1002_v4  ;;  %v1110_v21 = vrot.slane %v1109_v13, 4  ;;  %v1117_v51 = vrot.slane %v1116_v26, 4  ;;  %v1124_v57 = vrot.slane %v1123_v52, 4 }
 0x230   :  { %v984_v36 = vmax.f32 %v982_v42, %v983_v24  ;;  %v990_v59 = vrot.slane %v989_v53, 1  ;;  %v997_v39 = vrot.slane %v996_v15, 1  ;;  %v1105_v40 = vrot.slane %v1104_v55, 2 }
 0x231   :  { %v1004_v54 = vrot.slane %v1003_v34, 1  ;;  %v1111_v35 = vmax.f32 %v1109_v13, %v1110_v21  ;;  %v1118_v1 = vmax.f32 %v1116_v26, %v1117_v51  ;;  %v1125_v43 = vmax.f32 %v1123_v52, %v1124_v57 }
 0x232   :  { %v991_v23 = vmax.f32 %v989_v53, %v990_v59  ;;  %v998_v17 = vmax.f32 %v996_v15, %v997_v39  ;;  %v1247_v60 = vsel %vm1236_vm10, %v984_v36, %v1246_v31  ;;  %v1106_v18 = vmax.f32 %v1104_v55, %v1105_v40  ;;  %v1308_v39 = vld [vmem:[#allocation2 + $0x28] sm:$0xff]  ;;  %v1309_v40 = vld [vmem:[#allocation2 + $0x30] sm:$0xff] }
 0x233   :  { %v1005_v30 = vmax.f32 %v1003_v34, %v1004_v54  ;;  %v1112_v48 = vrot.slane %v1111_v35, 2  ;;  %v1119_v25 = vrot.slane %v1118_v1, 2  ;;  %v1126_v22 = vrot.slane %v1125_v43, 2 }
 0x234   :  { %v1248_v29 = vsel %vm1238_vm11, %v991_v23, %v1247_v60  ;;  %v1107_v0 = vrot.slane %v1106_v18, 1  ;;  %v1035_v62 = vcombine.high %v1011_v63, %v1011_v63  ;;  %v1042_v27 = vrot.slane %v1011_v63, %v7767_v61 }
 0x235   :  { %v1249_v32 = vsel %vm1240_vm12, %v998_v17, %v1248_v29  ;;  %v1113_v37 = vmax.f32 %v1111_v35, %v1112_v48  ;;  %v1120_v33 = vmax.f32 %v1118_v1, %v1119_v25  ;;  %v1127_v38 = vmax.f32 %v1125_v43, %v1126_v22 }
 0x236   :  { %v1250_v42 = vsel %vm1242_vm13, %v1005_v30, %v1249_v32  ;;  %v1108_v46 = vmax.f32 %v1106_v18, %v1107_v0  ;;  %v1049_v31 = vrot.slane %v1035_v62, %v7767_v61  ;;  %v1050_v49 = vcombine.high %v1042_v27, %v1042_v27  ;;  %v1304_v32 = vld [vmem:[#allocation2 + $0x8] sm:$0xff] }
 0x237   :  { %1288 = vst.msk [vmem:[#allocation2 + $0x10] sm:$0xff] %vm425_vm5, %v1250_v42  ;;  %v1114_v50 = vrot.slane %v1113_v37, 1  ;;  %v1121_v4 = vrot.slane %v1120_v33, 1  ;;  %v1128_v13 = vrot.slane %v1127_v38, 1  ;;  %v1130_v26 = vsel %vm893_vm6, %v1042_v27, -inf  ;;  %v1291_v42 = vld [vmem:[#allocation2 + $0x6] sm:$0xff] }
 0x238   :  { %v1051_v52 = vcombine.high %v1049_v31, %v1049_v31  ;;  %v1131_v63 = vrot.slane %v1130_v26, 4  ;;  %v1137_v24 = vsel %vm893_vm6, %v1050_v49, -inf  ;;  %v1144_v53 = vsel %vm893_vm6, %v1049_v31, -inf }
 0x239   :  { %v1115_v15 = vmax.f32 %v1113_v37, %v1114_v50  ;;  %v1122_v55 = vmax.f32 %v1120_v33, %v1121_v4  ;;  %v1129_v34 = vmax.f32 %v1127_v38, %v1128_v13  ;;  %v1138_v21 = vrot.slane %v1137_v24, 4 }
 0x23a   :  { %v1132_v51 = vmax.f32 %v1130_v26, %v1131_v63  ;;  %v1145_v57 = vrot.slane %v1144_v53, 4  ;;  %v1151_v36 = vsel %vm893_vm6, %v1051_v52, -inf  ;;  %v773_v59 = vadd.f32 %v7753_v56, %v7830_v3 }
 0x23b   :  { %v1269_v54 = vsel %vm1230_vm7, %v1115_v15, %v1108_v46  ;;  %v1139_v35 = vmax.f32 %v1137_v24, %v1138_v21  ;;  %v1152_v1 = vrot.slane %v1151_v36, 4  ;;  %v759_v43 = vadd.f32 %v7821_v47, %v7748_v45 }
 0x23c   :  { %v1270_v23 = vsel %vm1232_vm8, %v1122_v55, %v1269_v54  ;;  %v1133_v17 = vrot.slane %v1132_v51, 2  ;;  %v1146_v60 = vmax.f32 %v1144_v53, %v1145_v57  ;;  %v781_v18 = vmax.f32 %v773_v59, 0.0 }
 0x23d   :  { %v1140_v30 = vrot.slane %v1139_v35, 2  ;;  %v1153_v48 = vmax.f32 %v1151_v36, %v1152_v1  ;;  %v774_v25 = vadd.f32 %v7753_v56, %v759_v43  ;;  %v7870_v22 = vpack.c.bf16 %v1309_v40, %v1308_v39 }
 0x23e   :  { %v1134_v3 = vmax.f32 %v1132_v51, %v1133_v17  ;;  %v1147_v29 = vrot.slane %v1146_v60, 2  ;;  %v1271_v0 = vsel %vm1234_vm9, %v1129_v34, %v1270_v23  ;;  %v1008_v62 = vmul.f32 %v7759_v58, %v781_v18  ;;  %v1292_v27 = vld [vmem:[#allocation2 + $0xe] sm:$0xff]  ;;  %v1293_v46 = vld [vmem:[#allocation2 + $0x16] sm:$0xff] }
 0x23f   :  { %v1305_v45 = vld [vmem:[#allocation2 + $0x10] sm:$0xff]  ;;  %v1141_v47 = vmax.f32 %v1139_v35, %v1140_v30  ;;  %v1154_v37 = vrot.slane %v1153_v48, 2  ;;  %v782_v33 = vmax.f32 %v774_v25, 0.0  ;;  %v1299_v50 = vpack.c.bf16 %v1292_v27, %v1291_v42 }
 0x240   :  { %v1312_v38 = vpack.c.bf16 %v1305_v45, %v1304_v32  ;;  %v1135_v31 = vrot.slane %v1134_v3, 1  ;;  %v1148_v49 = vmax.f32 %v1146_v60, %v1147_v29  ;;  %v1012_v56 = vadd.f32 %v7764_v44, %v1008_v62 }
 0x241   :  { %v1142_v4 = vrot.slane %v1141_v47, 1  ;;  %v1155_v13 = vmax.f32 %v1153_v48, %v1154_v37  ;;  %v1009_v26 = vmul.f32 %v7759_v58, %v782_v33  ;;  %v1300_v52 = vpack.c.bf16 %v7677_v14, %v1293_v46  ;;  %6889 = vmatprep.mubr.msk.bf16.mxu1 %vm425_vm5, %v1299_v50 }
 0x242   :  { %6879 = vmatprep.mubr.msk.bf16.mxu0 %vm425_vm5, %v1312_v38  ;;  %v1136_v63 = vmax.f32 %v1134_v3, %v1135_v31  ;;  %v1149_v24 = vrot.slane %v1148_v49, 1  ;;  %v1052_v53 = vcombine.high %v1012_v56, %v1012_v56  ;;  %v1059_v15 = vrot.slane %v1012_v56, %v7767_v61 }
 0x243   :  { %6880 = vmatmul.mubr.msk.bf16.vlgmr.msra.gmra.mxu0 %vm425_vm5, %v7782_v41  ;;  %v1143_v55 = vmax.f32 %v1141_v47, %v1142_v4  ;;  %v1156_v34 = vrot.slane %v1155_v13, 1  ;;  %v1013_v21 = vadd.f32 %v7764_v44, %v1009_v26  ;;  %6890 = vmatmul.mubr.msk.bf16.vlgmr.msra.gmra.mxu1 %vm425_vm5, %v1300_v52 }
 0x244   :  { %6898 = vmatpush3.bf16.msra.mxu0 %v7786_v16  ;;  %v1150_v58 = vmax.f32 %v1148_v49, %v1149_v24  ;;  %v1272_v51 = vsel %vm1236_vm10, %v1136_v63, %v1271_v0  ;;  %v1066_v57 = vrot.slane %v1052_v53, %v7767_v61  ;;  %v1067_v36 = vcombine.high %v1059_v15, %v1059_v15 }
 0x245   :  { %6893 = vmatprep.mubr.msk.bf16.mxu1 %vm425_vm5, %v7772_v28  ;;  %v1157_v59 = vmax.f32 %v1155_v13, %v1156_v34  ;;  %v1273_v39 = vsel %vm1238_vm11, %v1143_v55, %v1272_v51  ;;  %v1158_v40 = vsel %vm893_vm6, %v1059_v15, -inf  ;;  %v1069_v54 = vcombine.high %v1013_v21, %v1013_v21  ;;  %6883 = vmatprep.mubr.msk.bf16.mxu0 %vm425_vm5, %v7870_v22 }
 0x246   :  { %v1274_v44 = vsel %vm1240_vm12, %v1150_v58, %v1273_v39  ;;  %v1068_v16 = vcombine.high %v1066_v57, %v1066_v57  ;;  %v1159_v35 = vrot.slane %v1158_v40, 4  ;;  %v1165_v1 = vsel %vm893_vm6, %v1067_v36, -inf }
 0x247   :  { %v1275_v43 = vsel %vm1242_vm13, %v1157_v59, %v1274_v44  ;;  %v1166_v23 = vrot.slane %v1165_v1, 4  ;;  %v1172_v17 = vsel %vm893_vm6, %v1066_v57, -inf  ;;  %v1076_v60 = vrot.slane %v1013_v21, %v7767_v61 }
 0x248   :  { %1289 = vst.msk [vmem:[#allocation2 + $0x38] sm:$0xff] %vm425_vm5, %v1275_v43  ;;  %v1160_v18 = vmax.f32 %v1158_v40, %v1159_v35  ;;  %v1173_v30 = vrot.slane %v1172_v17, 4  ;;  %v1179_v48 = vsel %vm893_vm6, %v1068_v16, -inf  ;;  %v1083_v25 = vrot.slane %v1069_v54, %v7767_v61 }
 0x249   :  { %v1167_v3 = vmax.f32 %v1165_v1, %v1166_v23  ;;  %v1180_v29 = vrot.slane %v1179_v48, 4  ;;  %v1084_v0 = vcombine.high %v1076_v60, %v1076_v60  ;;  %v1186_v62 = vsel %vm893_vm6, %v1076_v60, -inf }
 0x24a   :  { %v1161_v27 = vrot.slane %v1160_v18, 2  ;;  %v1174_v32 = vmax.f32 %v1172_v17, %v1173_v30  ;;  %v1085_v45 = vcombine.high %v1083_v25, %v1083_v25  ;;  %v1187_v47 = vrot.slane %v1186_v62, 4 }
 0x24b   :  { %v1168_v37 = vrot.slane %v1167_v3, 2  ;;  %v1181_v33 = vmax.f32 %v1179_v48, %v1180_v29  ;;  %v1193_v38 = vsel %vm893_vm6, %v1084_v0, -inf  ;;  %v1200_v42 = vsel %vm893_vm6, %v1083_v25, -inf }
 0x24c   :  { %v1162_v46 = vmax.f32 %v1160_v18, %v1161_v27  ;;  %v1175_v31 = vrot.slane %v1174_v32, 2  ;;  %v1188_v49 = vmax.f32 %v1186_v62, %v1187_v47  ;;  %v1194_v56 = vrot.slane %v1193_v38, 4 }
 0x24d   :  { %v1169_v50 = vmax.f32 %v1167_v3, %v1168_v37  ;;  %v1182_v4 = vrot.slane %v1181_v33, 2  ;;  %v1201_v13 = vrot.slane %v1200_v42, 4  ;;  %v1207_v26 = vsel %vm893_vm6, %v1085_v45, -inf }
 0x24e   :  { %v1163_v52 = vrot.slane %v1162_v46, 1  ;;  %v1176_v63 = vmax.f32 %v1174_v32, %v1175_v31  ;;  %v1189_v24 = vrot.slane %v1188_v49, 2  ;;  %v1195_v53 = vmax.f32 %v1193_v38, %v1194_v56 }
 0x24f   :  { %v1170_v15 = vrot.slane %v1169_v50, 1  ;;  %v1183_v55 = vmax.f32 %v1181_v33, %v1182_v4  ;;  %v1202_v34 = vmax.f32 %v1200_v42, %v1201_v13  ;;  %v1208_v21 = vrot.slane %v1207_v26, 4  ;;  %v1470_v33 = vld [vmem:[#allocation2 + $0xa] sm:$0xff]  ;;  %v1310_v38 = vld [vmem:[#allocation2 + $0x38] sm:$0xff] }
 0x250   :  { %v1164_v58 = vmax.f32 %v1162_v46, %v1163_v52  ;;  %v1177_v51 = vrot.slane %v1176_v63, 1  ;;  %v1190_v57 = vmax.f32 %v1188_v49, %v1189_v24  ;;  %v1196_v36 = vrot.slane %v1195_v53, 2  ;;  %v1471_v42 = vld [vmem:[#allocation2 + $0x12] sm:$0xff]  ;;  %v7916_v13 = vld [vmem:[#allocation2 + $0x2a] sm:$0xff] }
 0x251   :  { %v1171_v59 = vmax.f32 %v1169_v50, %v1170_v15  ;;  %v1184_v39 = vrot.slane %v1183_v55, 1  ;;  %v1203_v40 = vrot.slane %v1202_v34, 2  ;;  %v1209_v54 = vmax.f32 %v1207_v26, %v1208_v21  ;;  %v1297_v49 = vld [vmem:[#allocation2 + $0x36] sm:$0xff] }
 0x252   :  { %v1178_v44 = vmax.f32 %v1176_v63, %v1177_v51  ;;  %v1191_v16 = vrot.slane %v1190_v57, 1  ;;  %v1197_v35 = vmax.f32 %v1195_v53, %v1196_v36  ;;  %v1478_v4 = vpack.c.bf16 %v1471_v42, %v1470_v33  ;;  %v1475_v26 = vld [vmem:[#allocation2 + $0x32] sm:$0xff] }
 0x253   :  { %v1185_v1 = vmax.f32 %v1183_v55, %v1184_v39  ;;  %v1276_v43 = vsel %vm1230_vm7, %v1171_v59, %v1164_v58  ;;  %v1204_v23 = vmax.f32 %v1202_v34, %v1203_v40  ;;  %v1210_v17 = vrot.slane %v1209_v54, 2  ;;  %v7338_v55 = vld [vmem:[%s9136_s9] sm:$0xff]  }
 0x254   :  { %v1277_v60 = vsel %vm1232_vm8, %v1178_v44, %v1276_v43  ;;  %v1192_v18 = vmax.f32 %v1190_v57, %v1191_v16  ;;  %v1198_v30 = vrot.slane %v1197_v35, 1  ;;  %v7920_v52 = vpack.c.bf16 %v7681_v20, %v7679_v19  ;;  %6917 = vmatprep.subr.bf16.mxu0 %v7338_v55  ;;  %v7339_v19 = vld [vmem:[%s9136_s9 + $0x8] sm:$0xff]   ;;  %v7937_v20 = vld [vmem:[%s9136_s9 + $0x10] sm:$0xff]  }
 0x255   :  { %v1205_v48 = vrot.slane %v1204_v23, 1  ;;  %v1211_v25 = vmax.f32 %v1209_v54, %v1210_v17  ;;  %v1278_v3 = vsel %vm1234_vm9, %v1185_v1, %v1277_v60  ;;  %v1480_v63 = vpack.c.bf16 %v1475_v26, %v7916_v13  ;;  %6907 = vmatprep.subr.bf16.mxu1 %v7339_v19 }
 0x256   :  { %v1199_v29 = vmax.f32 %v1197_v35, %v1198_v30  ;;  %v1279_v0 = vsel %vm1236_vm10, %v1192_v18, %v1278_v3  ;;  %6908 = vmatpush3.bf16.msra.mxu1 %v7339_v19  ;;  %v6348_v30 = vld [vmem:[%s9135_s8] ss:$0 sm:$0xff] }
 0x257   :  { %v1206_v62 = vmax.f32 %v1204_v23, %v1205_v48  ;;  %v1212_v27 = vrot.slane %v1211_v25, 1  ;;  %6927 = vmatprep.subr.bf16.mxu1 %v7937_v20 }
 0x258   :  { %v1280_v32 = vsel %vm1238_vm11, %v1199_v29, %v1279_v0 }
 0x259   :  { %v1213_v45 = vmax.f32 %v1211_v25, %v1212_v27  ;;  %v1281_v47 = vsel %vm1240_vm12, %v1206_v62, %v1280_v32 }
 0x25b   :  { %v1282_v37 = vsel %vm1242_vm13, %v1213_v45, %v1281_v47 }
 0x25c   :  { %1290 = vst.msk [vmem:[#allocation2 + $0x40] sm:$0xff] %vm425_vm5, %v1282_v37 }
 0x263   :  { %v1298_v46 = vld [vmem:[#allocation2 + $0x3e] sm:$0xff] }
 0x264   :  { %v1311_v31 = vld [vmem:[#allocation2 + $0x40] sm:$0xff]  ;;  %v1302_v50 = vpack.c.bf16 %v1298_v46, %v1297_v49 }
 0x265   :  { %v1315_v56 = vpack.c.bf16 %v1311_v31, %v1310_v38  ;;  %v1476_v24 = vld [vmem:[#allocation2 + $0x3a] sm:$0xff]  ;;  %v1477_v53 = vld [vmem:[#allocation2 + $0x42] sm:$0xff] }
 0x266   :  { %6894 = vmatmul.mubr.msk.bf16.gmra.mxu1 %vm425_vm5, %v1302_v50  ;;  %v1481_v15 = vpack.c.bf16 %v1477_v53, %v1476_v24  ;;  %v6372_v53 = vld [vmem:[%s9128_s1 + $0x8] sm:$0x3] }
 0x267   :  { %6884 = vmatmul.mubr.msk.bf16.gmra.mxu0 %vm425_vm5, %v1315_v56 }
 0x268   :  { %6899 = vmatprep.mubr.msk.bf16.mxu0 %vm425_vm5, %v1478_v4 }
 0x26f   :  { %6900 = vmatmul.mubr.msk.bf16.vlgmr.msra.gmra.mxu0 %vm425_vm5, %v7920_v52 }
 0x270   :  { %6903 = vmatprep.mubr.msk.bf16.mxu0 %vm425_vm5, %v1480_v63  ;;  %6918 = vmatpush3.bf16.msra.mxu0 %v7338_v55 }
 0x271   :  { %6937 = vmatprep.subr.bf16.mxu0 %v7372_v2 }
 0x277   :  { %6904 = vmatmul.mubr.msk.bf16.gmra.mxu0 %vm425_vm5, %v1481_v15 }
 0x303   :  { %v6881_v34 = vpop.f32.mrf.mxu0  ;;  %v6891_v21 = vpop.f32.mrf.mxu1 }
 0x305   :  { %v1367_v58 = vpop.f32.mrf.mxu0  ;;  %v1443_v51 = vpop.f32.mrf.mxu1 }
 0x306   :  { %v1444_v60 = vadd.f32 %v1443_v51, %v1367_v58 }
 0x307   :  { %v6882_v57 = vpop.f32.mrf.mxu0  ;;  %v6892_v36 = vpop.f32.mrf.mxu1 }
 0x308   :  { %v2196_v36 = vsel %vm124_vm0, %v6372_v53, 0  ;;  %v2361_v53 = vld [vmem:[#allocation2 + $0x21] sm:$0xff] }
 0x309   :  { %v1370_v59 = vpop.f32.mrf.mxu0  ;;  %v1446_v39 = vpop.f32.mrf.mxu1 }
 0x30a   :  { %v1447_v3 = vadd.f32 %v1446_v39, %v1370_v59 }
 0x326   :  { %v6895_v54 = vpop.f32.mrf.mxu1 }
 0x327   :  { %v6885_v40 = vpop.f32.mrf.mxu0 }
 0x328   :  { %v1457_v16 = vpop.f32.mrf.mxu1  ;;  %v1464_v62 = vadd.f32 %v6895_v54, %v6885_v40 }
 0x329   :  { %v1381_v44 = vpop.f32.mrf.mxu0 }
 0x32a   :  { %v6896_v1 = vpop.f32.mrf.mxu1 }
 0x32b   :  { %v6886_v35 = vpop.f32.mrf.mxu0 }
 0x32c   :  { %v1459_v23 = vpop.f32.mrf.mxu1  ;;  %v1467_v38 = vadd.f32 %v6896_v1, %v6886_v35 }
 0x32d   :  { %v1383_v43 = vpop.f32.mrf.mxu0 }
 0x32e   :  { %v6383_v43 = vld [vmem:[%s9128_s1 + $0xa] sm:$0x3] }
 0x32f   :  { %v6901_v17 = vpop.f32.mrf.mxu0 }
 0x330   :  { %v6371_v17 = vld [vmem:[%s9128_s1 + $0x6] sm:$0x3] }
 0x331   :  { %v1533_v18 = vpop.f32.mrf.mxu0 }
 0x332   :  { %v1560_v48 = vadd.f32 %v1533_v18, %v1444_v60  ;;  %v2391_v60 = vsel %vm124_vm0, %v6383_v43, 0 }
 0x333   :  { %v6902_v25 = vpop.f32.mrf.mxu0 }
 0x334   :  { %v1571_v29 = vadd.f32 %v6348_v30, %v1560_v48  ;;  %v2166_v25 = vld [vmem:[#allocation2 + $0x20] sm:$0xff] }
 0x335   :  { %v1536_v0 = vpop.f32.mrf.mxu0 }
 0x336   :  { %v1575_v27 = vmax.f32 %v1571_v29, 0.0  ;;  %v1561_v32 = vadd.f32 %v1536_v0, %v1447_v3 }
 0x337   :  { %v6905_v45 = vpop.f32.mrf.mxu0 }
 0x338   :  { %1579 = vst.msk [vmem:[#allocation2 + $0x8] sm:$0xff] %vm46_vm1, %v1575_v27  ;;  %v1572_v47 = vadd.f32 %v6348_v30, %v1561_v32  ;;  %v1562_v37 = vadd.f32 %v6905_v45, %v1464_v62 }
 0x339   :  { %v1547_v33 = vpop.f32.mrf.mxu0 }
 0x33a   :  { %v1576_v42 = vmax.f32 %v1572_v47, 0.0  ;;  %v1573_v46 = vadd.f32 %v6348_v30, %v1562_v37  ;;  %v2172_v33 = vld [vmem:[#allocation2 + $0x50] sm:$0xff] }
 0x33b   :  { %v6906_v31 = vpop.f32.mrf.mxu0 }
 0x33c   :  { %1580 = vst.msk [vmem:[#allocation2 + $0x10] sm:$0xff] %vm46_vm1, %v1576_v42  ;;  %v1577_v49 = vmax.f32 %v1573_v46, 0.0  ;;  %v1563_v56 = vadd.f32 %v6906_v31, %v1467_v38  ;;  %v2150_v42 = vld [vmem:[#allocation2 + $0x27] sm:$0xff]  ;;  %v8017_v46 = vld [vmem:[#allocation2 + $0x2f] sm:$0xff] }
 0x33d   :  { %v1549_v50 = vpop.f32.mrf.mxu0 }
 0x33e   :  { %1581 = vst.msk [vmem:[#allocation2 + $0x38] sm:$0xff] %vm46_vm1, %v1577_v49  ;;  %v1574_v4 = vadd.f32 %v6348_v30, %v1563_v56  ;;  %v2285_v30 = vsel %vm124_vm0, %v6371_v17, 0  ;;  %v2158_v49 = vpack.c.bf16 %v8017_v46, %v2150_v42 }
 0x33f   :  { %v1597_v63 = vld [vmem:[#allocation2 + $0x8] sm:$0xff] }
 0x340   :  { %v1578_v26 = vmax.f32 %v1574_v4, 0.0  ;;  %v1583_v24 = vld [vmem:[#allocation2 + $0x6] sm:$0xff] }
 0x342   :  { %1582 = vst.msk [vmem:[#allocation2 + $0x40] sm:$0xff] %vm46_vm1, %v1578_v26 }
 0x343   :  { %v1584_v15 = vld [vmem:[#allocation2 + $0xe] sm:$0xff]  ;;  %v1585_v55 = vld [vmem:[#allocation2 + $0x16] sm:$0xff] }
 0x344   :  { %v1598_v19 = vld [vmem:[#allocation2 + $0x10] sm:$0xff]  ;;  %v1591_v58 = vpack.c.bf16 %v1584_v15, %v1583_v24  ;;  %v1592_v51 = vpack.c.bf16 %v7677_v14, %v1585_v55 }
 0x345   :  { %v1605_v34 = vpack.c.bf16 %v1598_v19, %v1597_v63  ;;  %v1770_v21 = vld [vmem:[#allocation2 + $0xa] sm:$0xff]  ;;  %v1771_v57 = vld [vmem:[#allocation2 + $0x12] sm:$0xff] }
 0x346   :  { %2138 = vst.msk [vmem:[#allocation2 + $0x8] sm:$0xff] %vm67_vm2, %v7463_v5  ;;  %2139 = vst.msk [vmem:[#allocation2 + $0x10] sm:$0xff] %vm67_vm2, %v7468_v6  ;;  %6919 = vmatprep.mubr.msk.bf16.mxu0 %vm46_vm1, %v1591_v58  ;;  %v1603_v14 = vld [vmem:[#allocation2 + $0x38] sm:$0xff]  ;;  %v1778_v35 = vpack.c.bf16 %v1771_v57, %v1770_v21  ;;  %v8036_v58 = vld [vmem:[#allocation2 + $0x29] sm:$0xff] }
 0x347   :  { %2140 = vst.msk [vmem:[#allocation2 + $0x18] sm:$0xff] %vm67_vm2, %v7497_v7  ;;  %6909 = vmatprep.mubr.msk.bf16.mxu1 %vm46_vm1, %v1605_v34  ;;  %6920 = vmatmul.mubr.msk.bf16.vlgmr.msra.gmra.mxu0 %vm46_vm1, %v1592_v51  ;;  %v1589_v59 = vld [vmem:[#allocation2 + $0x36] sm:$0xff] }
 0x348   :  { %6910 = vmatmul.mubr.msk.bf16.vlgmr.msra.gmra.mxu1 %vm46_vm1, %v7782_v41  ;;  %6938 = vmatpush3.bf16.msra.mxu0 %v2196_v36  ;;  %v1775_v54 = vld [vmem:[#allocation2 + $0x32] sm:$0xff] }
 0x349   :  { %6923 = vmatprep.mubr.msk.bf16.mxu0 %vm46_vm1, %v7772_v28  ;;  %6913 = vmatprep.mubr.msk.bf16.mxu1 %vm46_vm1, %v7870_v22  ;;  %v1590_v39 = vld [vmem:[#allocation2 + $0x3e] sm:$0xff]  ;;  %v1780_v18 = vpack.c.bf16 %v1775_v54, %v7916_v13 }
 0x34a   :  { %v1776_v40 = vld [vmem:[#allocation2 + $0x3a] sm:$0xff]  ;;  %6928 = vmatpush3.bf16.msra.mxu1 %v7937_v20  ;;  %6981 = vmatprep.subr.bf16.mxu0 %v7372_v2  ;;  %v1777_v41 = vld [vmem:[#allocation2 + $0x42] sm:$0xff]  ;;  %v1594_v16 = vpack.c.bf16 %v1590_v39, %v1589_v59 }
 0x34b   :  { %v1604_v44 = vld [vmem:[#allocation2 + $0x40] sm:$0xff]  ;;  %2142 = vst.msk [vmem:[#allocation2 + $0x38] sm:$0xff] %vm67_vm2, %v7519_v9  ;;  %6959 = vmatprep.subr.bf16.mxu1 %v7372_v2  ;;  %2144 = vst.msk [vmem:[#allocation2 + $0x48] sm:$0xff] %vm67_vm2, %v7529_v11  ;;  %v1781_v3 = vpack.c.bf16 %v1777_v41, %v1776_v40  ;;  %v2367_v40 = vld [vmem:[#allocation2 + $0x51] sm:$0xff] }
 0x34c   :  { %2143 = vst.msk [vmem:[#allocation2 + $0x40] sm:$0xff] %vm67_vm2, %v7524_v10  ;;  %v1608_v28 = vpack.c.bf16 %v1604_v44, %v1603_v14  ;;  %v6392_v44 = vld [vmem:[%s9130_s3 + $0x10] sm:$0xf] }
 0x34d   :  { %v2163_v20 = vld [vmem:[#allocation2 + $0x8] sm:$0xff]  ;;  %v2164_v1 = vld [vmem:[#allocation2 + $0x10] sm:$0xff]  ;;  %v2554_v41 = vsel %vm482_vm4, %v6392_v44, 0 }
 0x34e   :  { %v2173_v23 = vpack.c.bf16 %v2164_v1, %v2163_v20  ;;  %v2165_v48 = vld [vmem:[#allocation2 + $0x18] sm:$0xff]  ;;  %v2147_v29 = vld [vmem:[#allocation2 + $0xf] sm:$0xff] }
 0x34f   :  { %6924 = vmatmul.mubr.msk.bf16.gmra.mxu0 %vm46_vm1, %v1594_v16  ;;  %v2174_v13 = vpack.c.bf16 %v2166_v25, %v2165_v48  ;;  %v2148_v62 = vld [vmem:[#allocation2 + $0x17] sm:$0xff]  ;;  %v2149_v45 = vld [vmem:[#allocation2 + $0x1f] sm:$0xff]  ;;  %v2358_v56 = vld [vmem:[#allocation2 + $0x9] sm:$0xff] }
 0x350   :  { %6914 = vmatmul.mubr.msk.bf16.gmra.mxu1 %vm46_vm1, %v1608_v28  ;;  %6939 = vmatprep.mubr.msk.bf16.mxu0 %vm7373_vm3, %v7372_v2  ;;  %v2157_v37 = vpack.c.bf16 %v2149_v45, %v2148_v62  ;;  %v2359_v26 = vld [vmem:[#allocation2 + $0x11] sm:$0xff]  ;;  %v2360_v19 = vld [vmem:[#allocation2 + $0x19] sm:$0xff]  ;;  %v6391_v28 = vld [vmem:[%s9130_s3 + $0xc] sm:$0xf] }
 0x351   :  { %6929 = vmatprep.mubr.msk.bf16.mxu1 %vm46_vm1, %v1778_v35  ;;  %v2368_v24 = vpack.c.bf16 %v2359_v26, %v2358_v56  ;;  %v2369_v21 = vpack.c.bf16 %v2361_v53, %v2360_v19  ;;  %v2643_v16 = vsel %vm482_vm4, %v6391_v28, 0 }
 0x352   :  { %v2169_v27 = vld [vmem:[#allocation2 + $0x38] sm:$0xff]  ;;  %v2171_v38 = vld [vmem:[#allocation2 + $0x48] sm:$0xff] }
 0x353   :  { %v2170_v32 = vld [vmem:[#allocation2 + $0x40] sm:$0xff]  ;;  %v2177_v31 = vpack.c.bf16 %v2172_v33, %v2171_v38  ;;  %v2152_v50 = vld [vmem:[#allocation2 + $0x37] sm:$0xff]  ;;  %v2155_v55 = vld [vmem:[#allocation2 + $0x4f] sm:$0xff] }
 0x354   :  { %v2176_v47 = vpack.c.bf16 %v2170_v32, %v2169_v27  ;;  %v2153_v4 = vld [vmem:[#allocation2 + $0x3f] sm:$0xff]  ;;  %v2154_v15 = vld [vmem:[#allocation2 + $0x47] sm:$0xff]  ;;  %v2363_v51 = vld [vmem:[#allocation2 + $0x31] sm:$0xff] }
 0x355   :  { %v2159_v63 = vpack.c.bf16 %v2153_v4, %v2152_v50  ;;  %v2160_v34 = vpack.c.bf16 %v2155_v55, %v2154_v15  ;;  %v2370_v57 = vpack.c.bf16 %v2363_v51, %v8036_v58  ;;  %v2364_v36 = vld [vmem:[#allocation2 + $0x39] sm:$0xff]  ;;  %v2365_v14 = vld [vmem:[#allocation2 + $0x41] sm:$0xff]  ;;  %v2366_v39 = vld [vmem:[#allocation2 + $0x49] sm:$0xff] }
 0x356   :  { %v2371_v59 = vpack.c.bf16 %v2365_v14, %v2364_v36  ;;  %v2372_v54 = vpack.c.bf16 %v2367_v40, %v2366_v39  ;;  %v6369_v36 = vld [vmem:[%s9138_s11] ss:$0 sm:$0xff] }
 0x357   :  { %6940 = vmatmul.mubr.msk.bf16.vlgmr.msra.gmra.mxu0 %vm67_vm2, %v2173_v23  ;;  %v6370_v40 = vld [vmem:[%s9139_s12] ss:$0 sm:$0xff] }
 0x358   :  { %6930 = vmatmul.mubr.msk.bf16.vlgmr.msra.gmra.mxu1 %vm46_vm1, %v7920_v52  ;;  %6982 = vmatpush3.bf16.msra.mxu0 %v2391_v60  ;;  %v2146_v52 = vld [vmem:[#allocation2 + $0x7] sm:$0xff] }
 0x359   :  { %6933 = vmatprep.mubr.msk.bf16.mxu1 %vm46_vm1, %v1780_v18  ;;  %6943 = vmatprep.mubr.msk.bf16.mxu0 %vm7373_vm3, %v7372_v2  ;;  %v2156_v0 = vpack.c.bf16 %v2147_v29, %v2146_v52 }
 0x35a   :  { %6960 = vmatpush3.bf16.msra.mxu1 %v2285_v30  ;;  %7025 = vmatprep.subr.bf16.mxu0 %v7372_v2 }
 0x35b   :  { %7003 = vmatprep.subr.bf16.mxu1 %v7372_v2 }
 0x35f   :  { %6944 = vmatmul.mubr.msk.bf16.gmra.mxu0 %vm67_vm2, %v2174_v13 }
 0x360   :  { %6934 = vmatmul.mubr.msk.bf16.gmra.mxu1 %vm46_vm1, %v1781_v3  ;;  %6947 = vmatprep.mubr.msk.bf16.mxu0 %vm7373_vm3, %v7372_v2 }
 0x361   :  { %6961 = vmatprep.mubr.msk.bf16.mxu1 %vm7373_vm3, %v7372_v2 }
 0x367   :  { %6948 = vmatmul.mubr.msk.bf16.gmra.mxu0 %vm67_vm2, %v7870_v22 }
 0x368   :  { %6962 = vmatmul.mubr.msk.bf16.vlgmr.msra.gmra.mxu1 %vm67_vm2, %v2156_v0  ;;  %6951 = vmatprep.mubr.msk.bf16.mxu0 %vm7373_vm3, %v7372_v2 }
 0x369   :  { %6965 = vmatprep.mubr.msk.bf16.mxu1 %vm7373_vm3, %v7372_v2  ;;  %7004 = vmatpush3.bf16.msra.mxu1 %v2554_v41 }
 0x36a   :  { %7047 = vmatprep.subr.bf16.mxu1 %v7372_v2 }
 0x36f   :  { %6952 = vmatmul.mubr.msk.bf16.gmra.mxu0 %vm67_vm2, %v2176_v47 }
 0x370   :  { %6966 = vmatmul.mubr.msk.bf16.gmra.mxu1 %vm67_vm2, %v2157_v37  ;;  %6955 = vmatprep.mubr.msk.bf16.mxu0 %vm7373_vm3, %v7372_v2 }
 0x371   :  { %6969 = vmatprep.mubr.msk.bf16.mxu1 %vm7373_vm3, %v7372_v2 }
 0x377   :  { %6956 = vmatmul.mubr.msk.bf16.gmra.mxu0 %vm67_vm2, %v2177_v31 }
 0x378   :  { %6970 = vmatmul.mubr.msk.bf16.gmra.mxu1 %vm67_vm2, %v2158_v49  ;;  %6983 = vmatprep.mubr.msk.bf16.mxu0 %vm7373_vm3, %v7372_v2 }
 0x379   :  { %6973 = vmatprep.mubr.msk.bf16.mxu1 %vm7373_vm3, %v7372_v2 }
 0x37f   :  { %6984 = vmatmul.mubr.msk.bf16.vlgmr.msra.gmra.mxu0 %vm67_vm2, %v2368_v24 }
 0x380   :  { %6974 = vmatmul.mubr.msk.bf16.gmra.mxu1 %vm67_vm2, %v2159_v63  ;;  %6987 = vmatprep.mubr.msk.bf16.mxu0 %vm7373_vm3, %v7372_v2  ;;  %v6368_v63 = vld [vmem:[%s9137_s10] ss:$0 sm:$0xff] }
 0x381   :  { %6977 = vmatprep.mubr.msk.bf16.mxu1 %vm7373_vm3, %v7372_v2  ;;  %7026 = vmatpush3.bf16.msra.mxu0 %v2643_v16 }
 0x387   :  { %6988 = vmatmul.mubr.msk.bf16.gmra.mxu0 %vm67_vm2, %v2369_v21 }
 0x388   :  { %6978 = vmatmul.mubr.msk.bf16.gmra.mxu1 %vm67_vm2, %v2160_v34  ;;  %6991 = vmatprep.mubr.msk.bf16.mxu0 %vm7373_vm3, %v7372_v2 }
 0x389   :  { %7005 = vmatprep.mubr.msk.bf16.mxu1 %vm7373_vm3, %v7372_v2 }
 0x38f   :  { %6992 = vmatmul.mubr.msk.bf16.gmra.mxu0 %vm67_vm2, %v2370_v57 }
 0x390   :  { %6995 = vmatprep.mubr.msk.bf16.mxu0 %vm7373_vm3, %v7372_v2 }
 0x397   :  { %6996 = vmatmul.mubr.msk.bf16.gmra.mxu0 %vm67_vm2, %v2371_v59 }
 0x398   :  { %6999 = vmatprep.mubr.msk.bf16.mxu0 %vm7373_vm3, %v7372_v2 }
 0x39f   :  { %7000 = vmatmul.mubr.msk.bf16.gmra.mxu0 %vm67_vm2, %v2372_v54 }
 0x3a0   :  { %7027 = vmatprep.mubr.msk.bf16.mxu0 %vm7373_vm3, %v7372_v2 }
 0x407   :  { %v6921_v20 = vpop.f32.mrf.mxu0 }
 0x408   :  { %v6911_v35 = vpop.f32.mrf.mxu1 }
 0x409   :  { %v1743_v43 = vpop.f32.mrf.mxu0 }
 0x40a   :  { %v1664_v1 = vpop.f32.mrf.mxu1 }
 0x40b   :  { %v1744_v23 = vadd.f32 %v1743_v43, %v1664_v1  ;;  %v6922_v60 = vpop.f32.mrf.mxu0 }
 0x40c   :  { %v6912_v17 = vpop.f32.mrf.mxu1 }
 0x40d   :  { %v8061_v30 = vpop.f32.mrf.mxu0 }
 0x40e   :  { %v8059_v18 = vpop.f32.mrf.mxu1 }
 0x40f   :  { %v6925_v25 = vpop.f32.mrf.mxu0 }
 0x410   :  { %v6915_v48 = vpop.f32.mrf.mxu1 }
 0x411   :  { %v1764_v13 = vadd.f32 %v6925_v25, %v6915_v48  ;;  %v1757_v52 = vpop.f32.mrf.mxu0 }
 0x412   :  { %v1678_v3 = vpop.f32.mrf.mxu1 }
 0x413   :  { %v6926_v0 = vpop.f32.mrf.mxu0 }
 0x414   :  { %v6916_v29 = vpop.f32.mrf.mxu1 }
 0x415   :  { %v1767_v62 = vadd.f32 %v6926_v0, %v6916_v29  ;;  %v1759_v32 = vpop.f32.mrf.mxu0 }
 0x416   :  { %v1680_v27 = vpop.f32.mrf.mxu1 }
 0x417   :  { %v8063_v47 = vpop.f32.mrf.mxu0 }
 0x418   :  { %v6931_v45 = vpop.f32.mrf.mxu1 }
 0x419   :  { %v6941_v33 = vpop.f32.mrf.mxu0 }
 0x41a   :  { %v1837_v37 = vpop.f32.mrf.mxu1 }
 0x41b   :  { %v8065_v38 = vadd.f32 %v1837_v37, %v1744_v23  ;;  %v8067_v31 = vpop.f32.mrf.mxu0 }
 0x41c   :  { %v6932_v42 = vpop.f32.mrf.mxu1 }
 0x41d   :  { %v6942_v56 = vpop.f32.mrf.mxu0 }
 0x41e   :  { %v8069_v49 = vpop.f32.mrf.mxu1 }
 0x41f   :  { %v8071_v4 = vpop.f32.mrf.mxu0 }
 0x420   :  { %v6935_v50 = vpop.f32.mrf.mxu1 }
 0x421   :  { %v1866_v26 = vadd.f32 %v6935_v50, %v1764_v13  ;;  %v6945_v53 = vpop.f32.mrf.mxu0 }
 0x422   :  { %v1851_v24 = vpop.f32.mrf.mxu1 }
 0x423   :  { %v1877_v15 = vadd.f32 %v6368_v63, %v1866_v26  ;;  %v8076_v19 = vpop.f32.mrf.mxu0 }
 0x424   :  { %v6936_v55 = vpop.f32.mrf.mxu1 }
 0x425   :  { %v1881_v34 = vmax.f32 %v1877_v15, 0.0  ;;  %v1867_v21 = vadd.f32 %v6936_v55, %v1767_v62  ;;  %v6946_v57 = vpop.f32.mrf.mxu0 }
 0x426   :  { %v1853_v51 = vpop.f32.mrf.mxu1 }
 0x427   :  { %v2002_v14 = vmul.f32 %v6369_v36, %v1881_v34  ;;  %v2248_v59 = vpop.f32.mrf.mxu0  ;;  %v1878_v35 = vadd.f32 %v6368_v63, %v1867_v21 }
 0x428   :  { %v2321_v39 = vpop.f32.mrf.mxu1 }
 0x429   :  { %v6949_v54 = vpop.f32.mrf.mxu0  ;;  %v2004_v41 = vadd.f32 %v6370_v40, %v2002_v14  ;;  %v1882_v25 = vmax.f32 %v1878_v35, 0.0 }
 0x42a   :  { %v6963_v44 = vpop.f32.mrf.mxu1 }
 0x42b   :  { %v2250_v28 = vpop.f32.mrf.mxu0  ;;  %v2008_v43 = vcombine.high %v2004_v41, %v2004_v41  ;;  %v2015_v60 = vrot.slane %v2004_v41, %v7767_v61  ;;  %v2003_v50 = vmul.f32 %v6369_v36, %v1882_v25 }
 0x42c   :  { %v8084_v16 = vpop.f32.mrf.mxu1 }
 0x42d   :  { %v6950_v20 = vpop.f32.mrf.mxu0  ;;  %v2022_v48 = vrot.slane %v2008_v43, %v7767_v61  ;;  %v2023_v52 = vcombine.high %v2015_v60, %v2015_v60  ;;  %v2050_v0 = vsel %vm1945_vm14, %v2015_v60, -inf  ;;  %v2005_v15 = vadd.f32 %v6370_v40, %v2003_v50 }
 0x42e   :  { %v6964_v1 = vpop.f32.mrf.mxu1  ;;  %v2051_v45 = vrot.slane %v2050_v0, 4 }
 0x42f   :  { %v8086_v23 = vpop.f32.mrf.mxu0  ;;  %v2024_v29 = vcombine.high %v2022_v48, %v2022_v48  ;;  %v2064_v62 = vsel %vm1945_vm14, %v2022_v48, -inf  ;;  %v2057_v37 = vsel %vm1945_vm14, %v2023_v52, -inf  ;;  %v2025_v14 = vcombine.high %v2005_v15, %v2005_v15 }
 0x430   :  { %v8088_v17 = vpop.f32.mrf.mxu1  ;;  %v2058_v33 = vrot.slane %v2057_v37, 4  ;;  %v2065_v42 = vrot.slane %v2064_v62, 4  ;;  %v2052_v21 = vmax.f32 %v2050_v0, %v2051_v45  ;;  %v2032_v59 = vrot.slane %v2005_v15, %v7767_v61 }
 0x431   :  { %v6953_v13 = vpop.f32.mrf.mxu0  ;;  %v2071_v56 = vsel %vm1945_vm14, %v2024_v29, -inf  ;;  %v8104_v28 = vrot.slane %v2025_v14, %v7767_v61  ;;  %v2325_v14 = vadd.f32 %v8084_v16, %v8067_v31 }
 0x432   :  { %v6967_v3 = vpop.f32.mrf.mxu1  ;;  %v2072_v24 = vrot.slane %v2071_v56, 4  ;;  %v2059_v53 = vmax.f32 %v2057_v37, %v2058_v33  ;;  %v2066_v51 = vmax.f32 %v2064_v62, %v2065_v42  ;;  %v2040_v36 = vcombine.high %v2032_v59, %v2032_v59  ;;  %v8118_v42 = vld [vmem:[%s9129_s2 + $0x1] ss:$0 sm:$0xff] }
 0x433   :  { %v8094_v27 = vpop.f32.mrf.mxu0  ;;  %v2078_v35 = vsel %vm1945_vm14, %v2032_v59, -inf  ;;  %v2053_v1 = vrot.slane %v2052_v21, 2  ;;  %v2322_v13 = vadd.f32 %v2321_v39, %v8063_v47  ;;  %v2092_v45 = vsel %vm1945_vm14, %v8104_v28, -inf }
 0x434   :  { %v8096_v32 = vpop.f32.mrf.mxu1  ;;  %v2073_v57 = vmax.f32 %v2071_v56, %v2072_v24  ;;  %v2060_v41 = vrot.slane %v2059_v53, 2  ;;  %v2079_v43 = vrot.slane %v2078_v35, 4  ;;  %v2067_v60 = vrot.slane %v2066_v51, 2 }
 0x435   :  { %v6954_v26 = vpop.f32.mrf.mxu0  ;;  %v2085_v25 = vsel %vm1945_vm14, %v2040_v36, -inf  ;;  %v2054_v56 = vmax.f32 %v2052_v21, %v2053_v1  ;;  %v2041_v31 = vcombine.high %v8104_v28, %v8104_v28 }
 0x436   :  { %v6968_v63 = vpop.f32.mrf.mxu1  ;;  %v2074_v48 = vrot.slane %v2073_v57, 2  ;;  %v2061_v29 = vmax.f32 %v2059_v53, %v2060_v41  ;;  %v2080_v0 = vmax.f32 %v2078_v35, %v2079_v43  ;;  %v2086_v62 = vrot.slane %v2085_v25, 4 }
 0x437   :  { %v8100_v55 = vpop.f32.mrf.mxu0  ;;  %v2068_v39 = vmax.f32 %v2066_v51, %v2067_v60  ;;  %v2093_v63 = vrot.slane %v2092_v45, 4  ;;  %v2055_v21 = vrot.slane %v2054_v56, 1  ;;  %v2330_v43 = vadd.f32 %v8088_v17, %v8071_v4 }
 0x438   :  { %v2337_v34 = vpop.f32.mrf.mxu1  ;;  %v2081_v50 = vrot.slane %v2080_v0, 2  ;;  %v2087_v26 = vmax.f32 %v2085_v25, %v2086_v62  ;;  %v2062_v15 = vrot.slane %v2061_v29, 1  ;;  %v2333_v17 = vadd.f32 %v8096_v32, %v8076_v19 }
 0x439   :  { %v6957_v54 = vpop.f32.mrf.mxu0  ;;  %v2075_v34 = vmax.f32 %v2073_v57, %v2074_v48  ;;  %v2069_v1 = vrot.slane %v2068_v39, 1  ;;  %v2094_v51 = vmax.f32 %v2092_v45, %v2093_v63  ;;  %v2056_v62 = vmax.f32 %v2054_v56, %v2055_v21 }
 0x43a   :  { %v6971_v44 = vpop.f32.mrf.mxu1  ;;  %v2082_v54 = vmax.f32 %v2080_v0, %v2081_v50  ;;  %v2063_v48 = vmax.f32 %v2061_v29, %v2062_v15 }
 0x43b   :  { %v8107_v20 = vpop.f32.mrf.mxu0  ;;  %v2088_v44 = vrot.slane %v2087_v26, 2  ;;  %v2076_v25 = vrot.slane %v2075_v34, 1  ;;  %v2070_v4 = vmax.f32 %v2068_v39, %v2069_v1 }
 0x43c   :  { %v2339_v40 = vpop.f32.mrf.mxu1 }
 0x43d   :  { %v6958_v3 = vpop.f32.mrf.mxu0  ;;  %v2089_v0 = vmax.f32 %v2087_v26, %v2088_v44  ;;  %v2130_v26 = vsel %vm1230_vm7, %v2063_v48, %v2056_v62 }
 0x43e   :  { %v6972_v52 = vpop.f32.mrf.mxu1 }
 0x43f   :  { %v2427_v33 = vpop.f32.mrf.mxu0  ;;  %v2090_v28 = vrot.slane %v2089_v0, 1 }
 0x440   :  { %v8113_v37 = vpop.f32.mrf.mxu1  ;;  %v2464_v47 = vadd.f32 %v2427_v33, %v2322_v13  ;;  %v2083_v13 = vrot.slane %v2082_v54, 1 }
 0x441   :  { %v6985_v53 = vpop.f32.mrf.mxu0  ;;  %v2091_v32 = vmax.f32 %v2089_v0, %v2090_v28 }
 0x442   :  { %v6975_v24 = vpop.f32.mrf.mxu1  ;;  %v2480_v59 = vadd.f32 %v8118_v42, %v2464_v47  ;;  %v2095_v47 = vrot.slane %v2094_v51, 2  ;;  %v2099_v53 = vsel %vm1945_vm14, %v2041_v31, -inf  ;;  %v2084_v39 = vmax.f32 %v2082_v54, %v2083_v13  ;;  %v6403_v54 = vld [vmem:[%s9130_s3 + $0x14] sm:$0xf] }
 0x443   :  { %v2430_v36 = vpop.f32.mrf.mxu0  ;;  %v2077_v24 = vmax.f32 %v2075_v34, %v2076_v25  ;;  %v2100_v44 = vrot.slane %v2099_v53, 4 }
 0x444   :  { %v8123_v41 = vpop.f32.mrf.mxu1  ;;  %v2488_v35 = vmax.f32 %v2480_v59, 0.0  ;;  %v2465_v40 = vadd.f32 %v2430_v36, %v2325_v14  ;;  %v2096_v14 = vmax.f32 %v2094_v51, %v2095_v47 }
 0x445   :  { %v6986_v57 = vpop.f32.mrf.mxu0  ;;  %v2101_v1 = vmax.f32 %v2099_v53, %v2100_v44  ;;  %v2347_v44 = vadd.f32 %v8123_v41, %v8094_v27 }
 0x446   :  { %v6976_v60 = vpop.f32.mrf.mxu1  ;;  %2496 = vst.msk [vmem:[#allocation2 + $0x8] sm:$0xff] %vm425_vm5, %v2488_v35  ;;  %v2481_v16 = vadd.f32 %v8118_v42, %v2465_v40  ;;  %v2097_v35 = vrot.slane %v2096_v14, 1  ;;  %v2131_v40 = vsel %vm1232_vm8, %v2070_v4, %v2130_v26 }
 0x447   :  { %v2435_v52 = vpop.f32.mrf.mxu0 }
 0x448   :  { %v8131_v3 = vpop.f32.mrf.mxu1  ;;  %v2489_v45 = vmax.f32 %v2481_v16, 0.0  ;;  %v2466_v33 = vadd.f32 %v2435_v52, %v2330_v43  ;;  %v2132_v43 = vsel %vm1234_vm9, %v2077_v24, %v2131_v40  ;;  %v2098_v51 = vmax.f32 %v2096_v14, %v2097_v35 }
 0x449   :  { %v6989_v50 = vpop.f32.mrf.mxu0  ;;  %v2133_v57 = vsel %vm1236_vm10, %v2084_v39, %v2132_v43  ;;  %v2102_v16 = vrot.slane %v2101_v1, 2  ;;  %v2352_v41 = vadd.f32 %v8131_v3, %v8100_v55 }
 0x44a   :  { %v6979_v29 = vpop.f32.mrf.mxu1  ;;  %2497 = vst.msk [vmem:[#allocation2 + $0x10] sm:$0xff] %vm425_vm5, %v2489_v45  ;;  %v2482_v63 = vadd.f32 %v8118_v42, %v2466_v33  ;;  %v2134_v25 = vsel %vm1238_vm11, %v2091_v32, %v2133_v57 }
 0x44b   :  { %v2438_v15 = vpop.f32.mrf.mxu0  ;;  %v2135_v45 = vsel %vm1240_vm12, %v2098_v51, %v2134_v25  ;;  %v2103_v29 = vmax.f32 %v2101_v1, %v2102_v16 }
 0x44c   :  { %v8139_v56 = vpop.f32.mrf.mxu1  ;;  %v2490_v59 = vmax.f32 %v2482_v63, 0.0  ;;  %v2467_v19 = vadd.f32 %v2438_v15, %v2333_v17  ;;  %v2749_v17 = vsel %vm482_vm4, %v6403_v54, 0  ;;  %v2344_v63 = vadd.f32 %v8113_v37, %v8086_v23 }
 0x44d   :  { %v6990_v36 = vpop.f32.mrf.mxu0  ;;  %v2521_v31 = vld [vmem:[#allocation2 + $0x8] sm:$0xff]  ;;  %v2104_v28 = vrot.slane %v2103_v29, 1  ;;  %v2355_v16 = vadd.f32 %v8139_v56, %v8107_v20 }
 0x44e   :  { %v6980_v21 = vpop.f32.mrf.mxu1  ;;  %2498 = vst.msk [vmem:[#allocation2 + $0x18] sm:$0xff] %vm425_vm5, %v2490_v59  ;;  %v2483_v34 = vadd.f32 %v8118_v42, %v2467_v19  ;;  %v2504_v0 = vld [vmem:[#allocation2 + $0x7] sm:$0xff] }
 0x44f   :  { %v2443_v60 = vpop.f32.mrf.mxu0  ;;  %v2105_v24 = vmax.f32 %v2103_v29, %v2104_v28 }
 0x450   :  { %v2491_v48 = vmax.f32 %v2483_v34, 0.0 }
 0x451   :  { %v6993_v13 = vpop.f32.mrf.mxu0  ;;  %v2522_v52 = vld [vmem:[#allocation2 + $0x10] sm:$0xff]  ;;  %v8162_v39 = vsel %vm1242_vm13, %v2105_v24, %v2135_v45 }
 0x452   :  { %v2505_v62 = vld [vmem:[#allocation2 + $0xf] sm:$0xff]  ;;  %2499 = vst.msk [vmem:[#allocation2 + $0x20] sm:$0xff] %vm425_vm5, %v2491_v48  ;;  %v2531_v33 = vpack.c.bf16 %v2522_v52, %v2521_v31 }
 0x453   :  { %v2514_v4 = vpack.c.bf16 %v2505_v62, %v2504_v0  ;;  %v2445_v50 = vpop.f32.mrf.mxu0 }
 0x454   :  { %7006 = vmatmul.mubr.msk.bf16.vlgmr.msra.gmra.mxu1 %vm425_vm5, %v2531_v33 }
 0x455   :  { %7028 = vmatmul.mubr.msk.bf16.vlgmr.msra.gmra.mxu0 %vm425_vm5, %v2514_v4  ;;  %7048 = vmatpush3.bf16.msra.mxu1 %v2749_v17  ;;  %v6994_v47 = vpop.f32.mrf.mxu0  ;;  %v2523_v15 = vld [vmem:[#allocation2 + $0x18] sm:$0xff] }
 0x456   :  { %7009 = vmatprep.mubr.msk.bf16.mxu1 %vm7373_vm3, %v7372_v2  ;;  %7031 = vmatprep.mubr.msk.bf16.mxu0 %vm7373_vm3, %v7372_v2  ;;  %v2506_v19 = vld [vmem:[#allocation2 + $0x17] sm:$0xff] }
 0x457   :  { %v2449_v53 = vpop.f32.mrf.mxu0  ;;  %v8170_v21 = vld [vmem:[#allocation2 + $0x11] sm:$0xff] }
 0x458   :  { %v2468_v26 = vadd.f32 %v2449_v53, %v2344_v63 }
 0x459   :  { %v6997_v14 = vpop.f32.mrf.mxu0  ;;  %v8164_v59 = vld [vmem:[#allocation2 + $0x20] sm:$0xff] }
 0x45a   :  { %v2507_v32 = vld [vmem:[#allocation2 + $0x1f] sm:$0xff]  ;;  %v2484_v23 = vadd.f32 %v8118_v42, %v2468_v26  ;;  %v2532_v37 = vpack.c.bf16 %v8164_v59, %v2523_v15  ;;  %v2508_v54 = vld [vmem:[#allocation2 + $0x27] sm:$0xff] }
 0x45b   :  { %v2515_v36 = vpack.c.bf16 %v2507_v32, %v2506_v19  ;;  %v8172_v35 = vld [vmem:[#allocation2 + $0x19] sm:$0xff]  ;;  %v2452_v40 = vpop.f32.mrf.mxu0  ;;  %v2719_v31 = vld [vmem:[#allocation2 + $0x21] sm:$0xff]  ;;  %v2516_v13 = vpack.c.bf16 %v8017_v46, %v2508_v54  ;;  %v2716_v14 = vld [vmem:[#allocation2 + $0x9] sm:$0xff] }
 0x45c   :  { %3350 = vst.msk [vmem:[#allocation2 + $0x18] sm:$0xff] %vm46_vm1, %v7372_v2  ;;  %v2492_v34 = vmax.f32 %v2484_v23, 0.0  ;;  %v2469_v1 = vadd.f32 %v2452_v40, %v2347_v44  ;;  %7010 = vmatmul.mubr.msk.bf16.gmra.mxu1 %vm425_vm5, %v2532_v37  ;;  %v8193_v3 = vld [vmem:[#allocation2 + $0x24] sm:$0xff]  ;;  %v2726_v19 = vpack.c.bf16 %v8170_v21, %v2716_v14  ;;  %v2727_v32 = vpack.c.bf16 %v2719_v31, %v8172_v35  ;;  %v6416_v21 = vld [vmem:[%s9134_s7 + $0x10] sm:$0xf] }
 0x45d   :  { %7032 = vmatmul.mubr.msk.bf16.gmra.mxu0 %vm425_vm5, %v2515_v36  ;;  %v6998_v27 = vpop.f32.mrf.mxu0  ;;  %7013 = vmatprep.mubr.msk.bf16.mxu1 %vm7373_vm3, %v7372_v2  ;;  %v8195_v52 = vld [vmem:[#allocation2 + $0x20] sm:$0xff]  ;;  %v6415_v35 = vld [vmem:[%s9134_s7 + $0xc] sm:$0xf] }
 0x45e   :  { %7035 = vmatprep.mubr.msk.bf16.mxu0 %vm7373_vm3, %v7372_v2  ;;  %2500 = vst.msk [vmem:[#allocation2 + $0x38] sm:$0xff] %vm425_vm5, %v2492_v34  ;;  %v2485_v43 = vadd.f32 %v8118_v42, %v2469_v1  ;;  %7324 = vmatprep.subr.msk.bf16.mxu0 %vm482_vm4, %v6416_v21  ;;  %v3473_v40 = vsel %vm482_vm4, %v6415_v35, 0 }
 0x45f   :  { %v2457_v60 = vpop.f32.mrf.mxu0  ;;  %7325 = vmatprep.subr.msk.bf16.mxu1 %vm482_vm4, %v6415_v35  ;;  %v8263_v35 = vld [vmem:[%s9131_s4 + $0x1] ss:$0 sm:$0xff] }
 0x460   :  { %v2493_v51 = vmax.f32 %v2485_v43, 0.0  ;;  %v2470_v57 = vadd.f32 %v2457_v60, %v2352_v41 }
 0x461   :  { %v7001_v48 = vpop.f32.mrf.mxu0 }
 0x462   :  { %2501 = vst.msk [vmem:[#allocation2 + $0x40] sm:$0xff] %vm425_vm5, %v2493_v51  ;;  %v2486_v25 = vadd.f32 %v8118_v42, %v2470_v57 }
 0x463   :  { %v8191_v55 = vld [vmem:[#allocation2 + $0x1c] sm:$0xff]  ;;  %v2460_v0 = vpop.f32.mrf.mxu0 }
 0x464   :  { %4209 = vst.msk [vmem:[#allocation2 + $0x20] sm:$0xff] %vm67_vm2, %v7502_v8  ;;  %v2494_v62 = vmax.f32 %v2486_v25, 0.0  ;;  %v2471_v45 = vadd.f32 %v2460_v0, %v2355_v16  ;;  %7014 = vmatmul.mubr.msk.bf16.gmra.mxu1 %vm425_vm5, %v7870_v22  ;;  %v8252_v25 = vld [vmem:[%s9134_s7 + $0x14] sm:$0xf] }
 0x465   :  { %7036 = vmatmul.mubr.msk.bf16.gmra.mxu0 %vm425_vm5, %v2516_v13  ;;  %v7002_v20 = vpop.f32.mrf.mxu0  ;;  %7017 = vmatprep.mubr.msk.bf16.mxu1 %vm7373_vm3, %v7372_v2  ;;  %v2527_v8 = vld [vmem:[#allocation2 + $0x38] sm:$0xff] }
 0x466   :  { %7039 = vmatprep.mubr.msk.bf16.mxu0 %vm7373_vm3, %v7372_v2  ;;  %2502 = vst.msk [vmem:[#allocation2 + $0x48] sm:$0xff] %vm425_vm5, %v2494_v62  ;;  %v2487_v46 = vadd.f32 %v8118_v42, %v2471_v45  ;;  %v2510_v4 = vld [vmem:[#allocation2 + $0x37] sm:$0xff] }
 0x468   :  { %v2495_v56 = vmax.f32 %v2487_v46, 0.0 }
 0x469   :  { %v2528_v33 = vld [vmem:[#allocation2 + $0x40] sm:$0xff] }
 0x46a   :  { %v2511_v17 = vld [vmem:[#allocation2 + $0x3f] sm:$0xff]  ;;  %2503 = vst.msk [vmem:[#allocation2 + $0x50] sm:$0xff] %vm425_vm5, %v2495_v56  ;;  %v2534_v22 = vpack.c.bf16 %v2528_v33, %v2527_v8 }
 0x46b   :  { %v2517_v29 = vpack.c.bf16 %v2511_v17, %v2510_v4  ;;  %v2722_v23 = vld [vmem:[#allocation2 + $0x39] sm:$0xff] }
 0x46c   :  { %7018 = vmatmul.mubr.msk.bf16.gmra.mxu1 %vm425_vm5, %v2534_v22 }
 0x46d   :  { %7040 = vmatmul.mubr.msk.bf16.gmra.mxu0 %vm425_vm5, %v2517_v29  ;;  %7021 = vmatprep.mubr.msk.bf16.mxu1 %vm7373_vm3, %v7372_v2  ;;  %v2529_v42 = vld [vmem:[#allocation2 + $0x48] sm:$0xff] }
 0x46e   :  { %7043 = vmatprep.mubr.msk.bf16.mxu0 %vm7373_vm3, %v7372_v2  ;;  %v2512_v50 = vld [vmem:[#allocation2 + $0x47] sm:$0xff] }
 0x46f   :  { %v2723_v28 = vld [vmem:[#allocation2 + $0x41] sm:$0xff] }
 0x470   :  { %v2729_v37 = vpack.c.bf16 %v2723_v28, %v2722_v23 }
 0x471   :  { %v2530_v47 = vld [vmem:[#allocation2 + $0x50] sm:$0xff] }
 0x472   :  { %v2513_v63 = vld [vmem:[#allocation2 + $0x4f] sm:$0xff]  ;;  %v2535_v53 = vpack.c.bf16 %v2530_v47, %v2529_v42 }
 0x473   :  { %v2724_v24 = vld [vmem:[#allocation2 + $0x49] sm:$0xff]  ;;  %v2518_v26 = vpack.c.bf16 %v2513_v63, %v2512_v50  ;;  %v2725_v15 = vld [vmem:[#allocation2 + $0x51] sm:$0xff] }
 0x474   :  { %3351 = vst.msk [vmem:[#allocation2 + $0x48] sm:$0xff] %vm46_vm1, %v7372_v2  ;;  %7022 = vmatmul.mubr.msk.bf16.gmra.mxu1 %vm425_vm5, %v2535_v53  ;;  %v2730_v36 = vpack.c.bf16 %v2725_v15, %v2724_v24 }
 0x475   :  { %4213 = vst.msk [vmem:[#allocation2 + $0x50] sm:$0xff] %vm67_vm2, %v7539_v12  ;;  %7044 = vmatmul.mubr.msk.bf16.gmra.mxu0 %vm425_vm5, %v2518_v26  ;;  %7049 = vmatprep.mubr.msk.bf16.mxu1 %vm7373_vm3, %v7372_v2  ;;  %v2721_v12 = vld [vmem:[#allocation2 + $0x31] sm:$0xff] }
 0x476   :  { %v2728_v44 = vpack.c.bf16 %v2721_v12, %v8036_v58  ;;  %v3397_v58 = vsel %vm482_vm4, %v6416_v21, 0 }
 0x477   :  { %7070 = vmatpush3.bf16.msra.mxu0 %v3397_v58 }
 0x478   :  { %7326 = vmatprep.subr.msk.bf16.mxu0 %vm482_vm4, %v8252_v25 }
 0x47c   :  { %7050 = vmatmul.mubr.msk.bf16.vlgmr.msra.gmra.mxu1 %vm425_vm5, %v2726_v19 }
 0x47d   :  { %7053 = vmatprep.mubr.msk.bf16.mxu1 %vm7373_vm3, %v7372_v2  ;;  %7080 = vmatpush3.bf16.msra.mxu1 %v3473_v40 }
 0x484   :  { %7054 = vmatmul.mubr.msk.bf16.gmra.mxu1 %vm425_vm5, %v2727_v32 }
 0x485   :  { %7057 = vmatprep.mubr.msk.bf16.mxu1 %vm7373_vm3, %v7372_v2 }
 0x48c   :  { %7058 = vmatmul.mubr.msk.bf16.gmra.mxu1 %vm425_vm5, %v2728_v44 }
 0x48d   :  { %7061 = vmatprep.mubr.msk.bf16.mxu1 %vm7373_vm3, %v7372_v2 }
 0x494   :  { %7062 = vmatmul.mubr.msk.bf16.gmra.mxu1 %vm425_vm5, %v2729_v37 }
 0x495   :  { %7065 = vmatprep.mubr.msk.bf16.mxu1 %vm7373_vm3, %v7372_v2 }
 0x49c   :  { %7066 = vmatmul.mubr.msk.bf16.gmra.mxu1 %vm425_vm5, %v2730_v36 }
 0x514   :  { %v2590_v34 = vpop.f32.mrf.mxu1 }
 0x515   :  { %v2679_v1 = vpop.f32.mrf.mxu0 }
 0x516   :  { %v7007_v27 = vpop.f32.mrf.mxu1  ;;  %v2680_v21 = vadd.f32 %v2679_v1, %v2590_v34  ;;  %v8274_v34 = vld [vmem:[%s9133_s6 + $0x1] ss:$0 sm:$0xff] }
 0x517   :  { %v7029_v41 = vpop.f32.mrf.mxu0 }
 0x518   :  { %v2593_v43 = vpop.f32.mrf.mxu1 }
 0x519   :  { %v2682_v60 = vpop.f32.mrf.mxu0 }
 0x51a   :  { %v7008_v54 = vpop.f32.mrf.mxu1  ;;  %v2683_v41 = vadd.f32 %v2682_v60, %v2593_v43  ;;  %v8278_v60 = vld [vmem:[#allocation2 + $0x2c] sm:$0xff] }
 0x51b   :  { %v7030_v51 = vpop.f32.mrf.mxu0 }
 0x51c   :  { %v2598_v57 = vpop.f32.mrf.mxu1  ;;  %v8269_v51 = vld [vmem:[%s9132_s5 + $0x1] ss:$0 sm:$0xff] }
 0x51d   :  { %v2687_v48 = vpop.f32.mrf.mxu0 }
 0x51e   :  { %v7011_v31 = vpop.f32.mrf.mxu1 }
 0x51f   :  { %v7033_v16 = vpop.f32.mrf.mxu0 }
 0x520   :  { %v2601_v13 = vpop.f32.mrf.mxu1 }
 0x521   :  { %v2690_v0 = vpop.f32.mrf.mxu0 }
 0x522   :  { %v7012_v62 = vpop.f32.mrf.mxu1 }
 0x523   :  { %v7034_v45 = vpop.f32.mrf.mxu0 }
 0x524   :  { %v2606_v20 = vpop.f32.mrf.mxu1  ;;  %v2688_v45 = vadd.f32 %v2687_v48, %v2598_v57 }
 0x525   :  { %v2695_v46 = vpop.f32.mrf.mxu0 }
 0x526   :  { %v7015_v56 = vpop.f32.mrf.mxu1 }
 0x527   :  { %v7037_v8 = vpop.f32.mrf.mxu0 }
 0x528   :  { %v2608_v33 = vpop.f32.mrf.mxu1 }
 0x529   :  { %v2697_v4 = vpop.f32.mrf.mxu0 }
 0x52a   :  { %v7016_v17 = vpop.f32.mrf.mxu1  ;;  %v8281_v4 = vld [vmem:[#allocation2 + $0x18] sm:$0xff] }
 0x52b   :  { %v7038_v22 = vpop.f32.mrf.mxu0 }
 0x52c   :  { %v2612_v29 = vpop.f32.mrf.mxu1  ;;  %v8285_v22 = vpack.c.bf16 %v8278_v60, %v8193_v3 }
 0x52d   :  { %v2701_v42 = vpop.f32.mrf.mxu0 }
 0x52e   :  { %v7019_v50 = vpop.f32.mrf.mxu1 }
 0x52f   :  { %v7041_v28 = vpop.f32.mrf.mxu0 }
 0x530   :  { %v2615_v47 = vpop.f32.mrf.mxu1 }
 0x531   :  { %v2704_v63 = vpop.f32.mrf.mxu0 }
 0x532   :  { %v7020_v24 = vpop.f32.mrf.mxu1 }
 0x533   :  { %v7042_v53 = vpop.f32.mrf.mxu0  ;;  %v2691_v24 = vadd.f32 %v2690_v0, %v2601_v13 }
 0x534   :  { %v2620_v26 = vpop.f32.mrf.mxu1  ;;  %v8290_v53 = vadd.f32 %v2701_v42, %v2612_v29 }
 0x535   :  { %v2709_v15 = vpop.f32.mrf.mxu0 }
 0x536   :  { %v8256_v14 = vadd.f32 %v2709_v15, %v2620_v26  ;;  %v7023_v19 = vpop.f32.mrf.mxu1  ;;  %v3379_v15 = vpack.c.bf16 %v8164_v59, %v8281_v4 }
 0x537   :  { %v7045_v32 = vpop.f32.mrf.mxu0  ;;  %v8296_v19 = vsel %vm482_vm4, %v8252_v25, 0 }
 0x538   :  { %v2623_v12 = vpop.f32.mrf.mxu1 }
 0x539   :  { %v2712_v44 = vpop.f32.mrf.mxu0 }
 0x53a   :  { %v8258_v23 = vadd.f32 %v2712_v44, %v2623_v12  ;;  %v7024_v37 = vpop.f32.mrf.mxu1 }
 0x53b   :  { %v7046_v36 = vpop.f32.mrf.mxu0 }
 0x53c   :  { %v2785_v58 = vpop.f32.mrf.mxu1  ;;  %v8301_v36 = vadd.f32 %v2704_v63, %v2615_v47 }
 0x53d   :  { %v2822_v40 = vadd.f32 %v2785_v58, %v2680_v21 }
 0x53e   :  { %v7051_v27 = vpop.f32.mrf.mxu1 }
 0x53f   :  { %v2838_v54 = vadd.f32 %v8263_v35, %v2822_v40 }
 0x540   :  { %v2788_v31 = vpop.f32.mrf.mxu1 }
 0x541   :  { %v2846_v16 = vmax.f32 %v2838_v54, 0.0  ;;  %v2823_v62 = vadd.f32 %v2788_v31, %v2683_v41 }
 0x542   :  { %v7052_v1 = vpop.f32.mrf.mxu1 }
 0x543   :  { %v2864_v20 = vmul.f32 %v8269_v51, %v2846_v16  ;;  %v2839_v43 = vadd.f32 %v8263_v35, %v2823_v62 }
 0x544   :  { %v2793_v46 = vpop.f32.mrf.mxu1 }
 0x545   :  { %v2874_v56 = vadd.f32 %v8274_v34, %v2864_v20  ;;  %v2847_v8 = vmax.f32 %v2839_v43, 0.0  ;;  %v2824_v33 = vadd.f32 %v2793_v46, %v2688_v45 }
 0x546   :  { %v7055_v17 = vpop.f32.mrf.mxu1 }
 0x547   :  { %v2882_v50 = vcombine.high %v2874_v56, %v2874_v56  ;;  %v2889_v57 = vrot.slane %v2874_v56, %v7767_v61  ;;  %v2865_v48 = vmul.f32 %v8269_v51, %v2847_v8  ;;  %v2840_v28 = vadd.f32 %v8263_v35, %v2824_v33 }
 0x548   :  { %v2796_v26 = vpop.f32.mrf.mxu1 }
 0x549   :  { %v2896_v32 = vrot.slane %v2882_v50, %v7767_v61  ;;  %v2897_v12 = vcombine.high %v2889_v57, %v2889_v57  ;;  %v2966_v44 = vsel %vm893_vm6, %v2889_v57, -inf  ;;  %v2875_v37 = vadd.f32 %v8274_v34, %v2865_v48 }
 0x54a   :  { %v2967_v13 = vrot.slane %v2966_v44, 4  ;;  %v2848_v0 = vmax.f32 %v2840_v28, 0.0  ;;  %v2825_v29 = vadd.f32 %v2796_v26, %v2691_v24  ;;  %v7056_v42 = vpop.f32.mrf.mxu1 }
 0x54b   :  { %v2898_v21 = vcombine.high %v2896_v32, %v2896_v32  ;;  %v2973_v58 = vsel %vm893_vm6, %v2897_v12, -inf  ;;  %v2980_v40 = vsel %vm893_vm6, %v2896_v32, -inf  ;;  %v2899_v25 = vcombine.high %v2875_v37, %v2875_v37 }
 0x54c   :  { %v2968_v27 = vmax.f32 %v2966_v44, %v2967_v13  ;;  %v2974_v41 = vrot.slane %v2973_v58, 4  ;;  %v2981_v54 = vrot.slane %v2980_v40, 4  ;;  %v2906_v31 = vrot.slane %v2875_v37, %v7767_v61  ;;  %v2801_v16 = vpop.f32.mrf.mxu1 }
 0x54d   :  { %v2987_v62 = vsel %vm893_vm6, %v2898_v21, -inf  ;;  %v2913_v47 = vrot.slane %v2899_v25, %v7767_v61  ;;  %v2866_v63 = vmul.f32 %v8269_v51, %v2848_v0  ;;  %v8310_v1 = vadd.f32 %v8263_v35, %v2825_v29 }
 0x54e   :  { %v2969_v45 = vrot.slane %v2968_v27, 2  ;;  %v2975_v20 = vmax.f32 %v2973_v58, %v2974_v41  ;;  %v2982_v43 = vmax.f32 %v2980_v40, %v2981_v54  ;;  %v2988_v46 = vrot.slane %v2987_v62, 4  ;;  %v7059_v56 = vpop.f32.mrf.mxu1 }
 0x54f   :  { %v2914_v8 = vcombine.high %v2906_v31, %v2906_v31  ;;  %v2915_v33 = vcombine.high %v2913_v47, %v2913_v47  ;;  %v2994_v17 = vsel %vm893_vm6, %v2906_v31, -inf  ;;  %v3008_v50 = vsel %vm893_vm6, %v2913_v47, -inf }
 0x550   :  { %v2970_v57 = vmax.f32 %v2968_v27, %v2969_v45  ;;  %v2976_v48 = vrot.slane %v2975_v20, 2  ;;  %v2983_v28 = vrot.slane %v2982_v43, 2  ;;  %v2989_v24 = vmax.f32 %v2987_v62, %v2988_v46  ;;  %v2803_v26 = vpop.f32.mrf.mxu1 }
 0x551   :  { %v2995_v32 = vrot.slane %v2994_v17, 4  ;;  %v3001_v12 = vsel %vm893_vm6, %v2914_v8, -inf  ;;  %v3009_v44 = vrot.slane %v3008_v50, 4  ;;  %v3015_v37 = vsel %vm893_vm6, %v2915_v33, -inf }
 0x552   :  { %v2971_v13 = vrot.slane %v2970_v57, 1  ;;  %v2977_v0 = vmax.f32 %v2975_v20, %v2976_v48  ;;  %v2984_v29 = vmax.f32 %v2982_v43, %v2983_v28  ;;  %v2990_v42 = vrot.slane %v2989_v24, 2  ;;  %v7060_v21 = vpop.f32.mrf.mxu1 }
 0x553   :  { %v2996_v58 = vmax.f32 %v2994_v17, %v2995_v32  ;;  %v3002_v40 = vrot.slane %v3001_v12, 4  ;;  %v3010_v25 = vmax.f32 %v3008_v50, %v3009_v44  ;;  %v3016_v41 = vrot.slane %v3015_v37, 4 }
 0x554   :  { %v2972_v27 = vmax.f32 %v2970_v57, %v2971_v13  ;;  %v2978_v54 = vrot.slane %v2977_v0, 1  ;;  %v2985_v31 = vrot.slane %v2984_v29, 1  ;;  %v2991_v16 = vmax.f32 %v2989_v24, %v2990_v42  ;;  %v2807_v62 = vpop.f32.mrf.mxu1 }
 0x555   :  { %v2997_v47 = vrot.slane %v2996_v58, 2  ;;  %v3003_v45 = vmax.f32 %v3001_v12, %v3002_v40  ;;  %v3011_v46 = vrot.slane %v3010_v25, 2  ;;  %v3017_v56 = vmax.f32 %v3015_v37, %v3016_v41 }
 0x556   :  { %v2979_v8 = vmax.f32 %v2977_v0, %v2978_v54  ;;  %v2986_v33 = vmax.f32 %v2984_v29, %v2985_v31  ;;  %v2992_v26 = vrot.slane %v2991_v16, 1  ;;  %v2876_v20 = vadd.f32 %v8274_v34, %v2866_v63  ;;  %v7063_v43 = vpop.f32.mrf.mxu1 }
 0x557   :  { %v2998_v48 = vmax.f32 %v2996_v58, %v2997_v47  ;;  %v3004_v17 = vrot.slane %v3003_v45, 2  ;;  %v3012_v28 = vmax.f32 %v3010_v25, %v3011_v46  ;;  %v3018_v50 = vrot.slane %v3017_v56, 2 }
 0x558   :  { %v2993_v32 = vmax.f32 %v2991_v16, %v2992_v26  ;;  %v3302_v57 = vsel %vm1230_vm7, %v2979_v8, %v2972_v27  ;;  %v2916_v44 = vcombine.high %v2876_v20, %v2876_v20  ;;  %v2923_v24 = vrot.slane %v2876_v20, %v7767_v61  ;;  %v2810_v13 = vpop.f32.mrf.mxu1 }
 0x559   :  { %v3303_v12 = vsel %vm1232_vm8, %v2986_v33, %v3302_v57  ;;  %v2999_v37 = vrot.slane %v2998_v48, 1  ;;  %v3005_v0 = vmax.f32 %v3003_v45, %v3004_v17  ;;  %v3013_v29 = vrot.slane %v3012_v28, 1 }
 0x55a   :  { %v3019_v42 = vmax.f32 %v3017_v56, %v3018_v50  ;;  %v3304_v63 = vsel %vm1234_vm9, %v2993_v32, %v3303_v12  ;;  %v2930_v21 = vrot.slane %v2916_v44, %v7767_v61  ;;  %v2931_v58 = vcombine.high %v2923_v24, %v2923_v24  ;;  %v7064_v40 = vpop.f32.mrf.mxu1 }
 0x55b   :  { %v3000_v25 = vmax.f32 %v2998_v48, %v2999_v37  ;;  %v3006_v41 = vrot.slane %v3005_v0, 1  ;;  %v3014_v54 = vmax.f32 %v3012_v28, %v3013_v29  ;;  %v3022_v27 = vsel %vm893_vm6, %v2923_v24, -inf }
 0x55c   :  { %v3020_v31 = vrot.slane %v3019_v42, 1  ;;  %v2932_v16 = vcombine.high %v2930_v21, %v2930_v21  ;;  %v3023_v47 = vrot.slane %v3022_v27, 4  ;;  %v3029_v46 = vsel %vm893_vm6, %v2931_v58, -inf  ;;  %v2815_v8 = vpop.f32.mrf.mxu1 }
 0x55d   :  { %v3007_v45 = vmax.f32 %v3005_v0, %v3006_v41  ;;  %v3305_v56 = vsel %vm1236_vm10, %v3000_v25, %v3304_v63  ;;  %v3030_v33 = vrot.slane %v3029_v46, 4  ;;  %v3036_v26 = vsel %vm893_vm6, %v2930_v21, -inf }
 0x55e   :  { %v3021_v20 = vmax.f32 %v3019_v42, %v3020_v31  ;;  %v3024_v43 = vmax.f32 %v3022_v27, %v3023_v47  ;;  %v3037_v17 = vrot.slane %v3036_v26, 4  ;;  %v3043_v48 = vsel %vm893_vm6, %v2932_v16, -inf  ;;  %v7067_v28 = vpop.f32.mrf.mxu1 }
 0x55f   :  { %v3306_v50 = vsel %vm1238_vm11, %v3007_v45, %v3305_v56  ;;  %v3031_v32 = vmax.f32 %v3029_v46, %v3030_v33  ;;  %v3044_v57 = vrot.slane %v3043_v48, 4  ;;  %v2849_v44 = vmax.f32 %v8310_v1, 0.0 }
 0x560   :  { %v3307_v24 = vsel %vm1240_vm12, %v3014_v54, %v3306_v50  ;;  %v3025_v12 = vrot.slane %v3024_v43, 2  ;;  %v3038_v37 = vmax.f32 %v3036_v26, %v3037_v17  ;;  %v2826_v0 = vadd.f32 %v2807_v62, %v8290_v53  ;;  %v8331_v29 = vpop.f32.mrf.mxu1 }
 0x561   :  { %v3308_v42 = vsel %vm1242_vm13, %v3021_v20, %v3307_v24  ;;  %v3032_v63 = vrot.slane %v3031_v32, 2  ;;  %v3045_v21 = vmax.f32 %v3043_v48, %v3044_v57  ;;  %v2867_v58 = vmul.f32 %v8269_v51, %v2849_v44 }
 0x562   :  { %3352 = vst.msk [vmem:[#allocation2 + $0x8] sm:$0xff] %vm425_vm5, %v3308_v42  ;;  %v3026_v40 = vmax.f32 %v3024_v43, %v3025_v12  ;;  %v3039_v25 = vrot.slane %v3038_v37, 2  ;;  %v2842_v1 = vadd.f32 %v8263_v35, %v2826_v0  ;;  %v2827_v41 = vadd.f32 %v2810_v13, %v8301_v36  ;;  %v7068_v54 = vpop.f32.mrf.mxu1 }
 0x563   :  { %v3033_v27 = vmax.f32 %v3031_v32, %v3032_v63  ;;  %v3046_v31 = vrot.slane %v3045_v21, 2  ;;  %v2877_v53 = vadd.f32 %v8274_v34, %v2867_v58  ;;  %v8340_v62 = vadd.f32 %v2815_v8, %v8256_v14 }
 0x564   :  { %v3027_v16 = vrot.slane %v3026_v40, 1  ;;  %v3040_v47 = vmax.f32 %v3038_v37, %v3039_v25  ;;  %v2850_v46 = vmax.f32 %v2842_v1, 0.0  ;;  %v2843_v45 = vadd.f32 %v8263_v35, %v2827_v41 }
 0x565   :  { %v3034_v56 = vrot.slane %v3033_v27, 1  ;;  %v3047_v33 = vmax.f32 %v3045_v21, %v3046_v31  ;;  %v2933_v26 = vcombine.high %v2877_v53, %v2877_v53  ;;  %v2940_v20 = vrot.slane %v2877_v53, %v7767_v61 }
 0x566   :  { %v3028_v43 = vmax.f32 %v3026_v40, %v3027_v16  ;;  %v3041_v36 = vrot.slane %v3040_v47, 1  ;;  %v3078_v13 = vmul.f32 %v8269_v51, %v2850_v46  ;;  %v2851_v17 = vmax.f32 %v2843_v45, 0.0 }
 0x567   :  { %v3035_v48 = vmax.f32 %v3033_v27, %v3034_v56  ;;  %v3048_v28 = vrot.slane %v3047_v33, 1  ;;  %v2947_v14 = vrot.slane %v2933_v26, %v7767_v61  ;;  %v2948_v8 = vcombine.high %v2940_v20, %v2940_v20 }
 0x568   :  { %v3042_v50 = vmax.f32 %v3040_v47, %v3041_v36  ;;  %v3050_v32 = vsel %vm893_vm6, %v2940_v20, -inf  ;;  %v3082_v57 = vadd.f32 %v8274_v34, %v3078_v13  ;;  %v3079_v44 = vmul.f32 %v8269_v51, %v2851_v17 }
 0x569   :  { %v3049_v24 = vmax.f32 %v3047_v33, %v3048_v28  ;;  %v3309_v12 = vsel %vm1230_vm7, %v3035_v48, %v3028_v43  ;;  %v2949_v37 = vcombine.high %v2947_v14, %v2947_v14  ;;  %v3051_v0 = vrot.slane %v3050_v32, 4 }
 0x56a   :  { %v3310_v42 = vsel %vm1232_vm8, %v3042_v50, %v3309_v12  ;;  %v3057_v63 = vsel %vm893_vm6, %v2948_v8, -inf  ;;  %v3064_v21 = vsel %vm893_vm6, %v2947_v14, -inf  ;;  %v3090_v58 = vcombine.high %v3082_v57, %v3082_v57 }
 0x56b   :  { %v3052_v40 = vmax.f32 %v3050_v32, %v3051_v0  ;;  %v3058_v25 = vrot.slane %v3057_v63, 4  ;;  %v3065_v1 = vrot.slane %v3064_v21, 4  ;;  %v3071_v41 = vsel %vm893_vm6, %v2949_v37, -inf }
 0x56c   :  { %v3072_v54 = vrot.slane %v3071_v41, 4  ;;  %v3311_v27 = vsel %vm1234_vm9, %v3049_v24, %v3310_v42  ;;  %v3097_v31 = vrot.slane %v3082_v57, %v7767_v61  ;;  %v3104_v53 = vrot.slane %v3090_v58, %v7767_v61 }
 0x56d   :  { %v3053_v16 = vrot.slane %v3052_v40, 2  ;;  %v3059_v47 = vmax.f32 %v3057_v63, %v3058_v25  ;;  %v3066_v46 = vmax.f32 %v3064_v21, %v3065_v1  ;;  %v3083_v45 = vadd.f32 %v8274_v34, %v3079_v44 }
 0x56e   :  { %v3073_v56 = vmax.f32 %v3071_v41, %v3072_v54  ;;  %v3105_v33 = vcombine.high %v3097_v31, %v3097_v31  ;;  %v3106_v26 = vcombine.high %v3104_v53, %v3104_v53  ;;  %v3174_v20 = vsel %vm893_vm6, %v3097_v31, -inf }
 0x56f   :  { %v3054_v43 = vmax.f32 %v3052_v40, %v3053_v16  ;;  %v3060_v36 = vrot.slane %v3059_v47, 2  ;;  %v3067_v13 = vrot.slane %v3066_v46, 2  ;;  %v3175_v17 = vrot.slane %v3174_v20, 4 }
 0x570   :  { %v3074_v48 = vrot.slane %v3073_v56, 2  ;;  %v3181_v28 = vsel %vm893_vm6, %v3105_v33, -inf  ;;  %v3188_v14 = vsel %vm893_vm6, %v3104_v53, -inf  ;;  %v3195_v8 = vsel %vm893_vm6, %v3106_v26, -inf }
 0x571   :  { %v3055_v50 = vrot.slane %v3054_v43, 1  ;;  %v3061_v32 = vmax.f32 %v3059_v47, %v3060_v36  ;;  %v3068_v57 = vmax.f32 %v3066_v46, %v3067_v13  ;;  %v3176_v44 = vmax.f32 %v3174_v20, %v3175_v17 }
 0x572   :  { %v3075_v24 = vmax.f32 %v3073_v56, %v3074_v48  ;;  %v3182_v12 = vrot.slane %v3181_v28, 4  ;;  %v3189_v37 = vrot.slane %v3188_v14, 4  ;;  %v3196_v0 = vrot.slane %v3195_v8, 4 }
 0x573   :  { %v3056_v42 = vmax.f32 %v3054_v43, %v3055_v50  ;;  %v3062_v63 = vrot.slane %v3061_v32, 1  ;;  %v3069_v21 = vrot.slane %v3068_v57, 1  ;;  %v3177_v58 = vrot.slane %v3176_v44, 2 }
 0x574   :  { %v3076_v40 = vrot.slane %v3075_v24, 1  ;;  %v3183_v25 = vmax.f32 %v3181_v28, %v3182_v12  ;;  %v3190_v1 = vmax.f32 %v3188_v14, %v3189_v37  ;;  %v3197_v41 = vmax.f32 %v3195_v8, %v3196_v0 }
 0x575   :  { %v3063_v54 = vmax.f32 %v3061_v32, %v3062_v63  ;;  %v3070_v31 = vmax.f32 %v3068_v57, %v3069_v21  ;;  %v3312_v53 = vsel %vm1236_vm10, %v3056_v42, %v3311_v27  ;;  %v3178_v16 = vmax.f32 %v3176_v44, %v3177_v58 }
 0x576   :  { %v3077_v47 = vmax.f32 %v3075_v24, %v3076_v40  ;;  %v3184_v46 = vrot.slane %v3183_v25, 2  ;;  %v3191_v33 = vrot.slane %v3190_v1, 2  ;;  %v3198_v56 = vrot.slane %v3197_v41, 2 }
 0x577   :  { %v3313_v26 = vsel %vm1238_vm11, %v3063_v54, %v3312_v53  ;;  %v3179_v20 = vrot.slane %v3178_v16, 1  ;;  %v3107_v43 = vcombine.high %v3083_v45, %v3083_v45  ;;  %v3114_v36 = vrot.slane %v3083_v45, %v7767_v61  ;;  %v3374_v54 = vld [vmem:[#allocation2 + $0x28] sm:$0xff] }
 0x578   :  { %v3314_v13 = vsel %vm1240_vm12, %v3070_v31, %v3313_v26  ;;  %v3185_v17 = vmax.f32 %v3183_v25, %v3184_v46  ;;  %v3192_v48 = vmax.f32 %v3190_v1, %v3191_v33  ;;  %v3199_v28 = vmax.f32 %v3197_v41, %v3198_v56  ;;  %v3375_v31 = vld [vmem:[#allocation2 + $0x30] sm:$0xff] }
 0x579   :  { %v3315_v14 = vsel %vm1242_vm13, %v3077_v47, %v3314_v13  ;;  %v3180_v8 = vmax.f32 %v3178_v16, %v3179_v20  ;;  %v3121_v27 = vrot.slane %v3107_v43, %v7767_v61  ;;  %v3122_v50 = vcombine.high %v3114_v36, %v3114_v36 }
 0x57a   :  { %3353 = vst.msk [vmem:[#allocation2 + $0x10] sm:$0xff] %vm425_vm5, %v3315_v14  ;;  %v3186_v32 = vrot.slane %v3185_v17, 1  ;;  %v3193_v57 = vrot.slane %v3192_v48, 1  ;;  %v3200_v44 = vrot.slane %v3199_v28, 1  ;;  %v3202_v24 = vsel %vm893_vm6, %v3114_v36, -inf }
 0x57b   :  { %v3123_v12 = vcombine.high %v3121_v27, %v3121_v27  ;;  %v3203_v45 = vrot.slane %v3202_v24, 4  ;;  %v3209_v37 = vsel %vm893_vm6, %v3122_v50, -inf  ;;  %v3216_v0 = vsel %vm893_vm6, %v3121_v27, -inf }
 0x57c   :  { %v3187_v42 = vmax.f32 %v3185_v17, %v3186_v32  ;;  %v3194_v63 = vmax.f32 %v3192_v48, %v3193_v57  ;;  %v3201_v21 = vmax.f32 %v3199_v28, %v3200_v44  ;;  %v3210_v58 = vrot.slane %v3209_v37, 4  ;;  %v3370_v17 = vld [vmem:[#allocation2 + $0x8] sm:$0xff] }
 0x57d   :  { %v3204_v40 = vmax.f32 %v3202_v24, %v3203_v45  ;;  %v3217_v25 = vrot.slane %v3216_v0, 4  ;;  %v3223_v1 = vsel %vm893_vm6, %v3123_v12, -inf  ;;  %v2844_v41 = vadd.f32 %v8263_v35, %v8340_v62  ;;  %v3356_v24 = vld [vmem:[#allocation2 + $0x4] sm:$0xff] }
 0x57e   :  { %v3334_v53 = vsel %vm1230_vm7, %v3187_v42, %v3180_v8  ;;  %v3211_v16 = vmax.f32 %v3209_v37, %v3210_v58  ;;  %v3224_v47 = vrot.slane %v3223_v1, 4  ;;  %v2829_v46 = vadd.f32 %v8331_v29, %v8258_v23 }
 0x57f   :  { %v3335_v33 = vsel %vm1232_vm8, %v3194_v63, %v3334_v53  ;;  %v3205_v56 = vrot.slane %v3204_v40, 2  ;;  %v3218_v26 = vmax.f32 %v3216_v0, %v3217_v25  ;;  %v2852_v20 = vmax.f32 %v2844_v41, 0.0 }
 0x580   :  { %v3212_v43 = vrot.slane %v3211_v16, 2  ;;  %v3225_v36 = vmax.f32 %v3223_v1, %v3224_v47  ;;  %v2845_v13 = vadd.f32 %v8263_v35, %v2829_v46  ;;  %v8380_v62 = vpack.c.bf16 %v3375_v31, %v3374_v54 }
 0x581   :  { %v3206_v48 = vmax.f32 %v3204_v40, %v3205_v56  ;;  %v3219_v28 = vrot.slane %v3218_v26, 2  ;;  %v3336_v14 = vsel %vm1234_vm9, %v3201_v21, %v3335_v33  ;;  %v3080_v8 = vmul.f32 %v8269_v51, %v2852_v20  ;;  %v3371_v27 = vld [vmem:[#allocation2 + $0x10] sm:$0xff] }
 0x582   :  { %v8384_v23 = vld [vmem:[#allocation2 + $0xc] sm:$0xff]  ;;  %v8386_v29 = vld [vmem:[#allocation2 + $0x14] sm:$0xff]  ;;  %v3213_v50 = vmax.f32 %v3211_v16, %v3212_v43  ;;  %v3226_v32 = vrot.slane %v3225_v36, 2  ;;  %v2853_v57 = vmax.f32 %v2845_v13, 0.0  ;;  %v3378_v44 = vpack.c.bf16 %v3371_v27, %v3370_v17 }
 0x583   :  { %v3207_v35 = vrot.slane %v3206_v48, 1  ;;  %v3220_v12 = vmax.f32 %v3218_v26, %v3219_v28  ;;  %v3084_v45 = vadd.f32 %v8274_v34, %v3080_v8  ;;  %v3364_v37 = vpack.c.bf16 %v8384_v23, %v3356_v24 }
 0x584   :  { %v3214_v0 = vrot.slane %v3213_v50, 1  ;;  %v3227_v42 = vmax.f32 %v3225_v36, %v3226_v32  ;;  %v3081_v63 = vmul.f32 %v8269_v51, %v2853_v57  ;;  %7071 = vmatprep.mubr.msk.bf16.mxu0 %vm425_vm5, %v3378_v44  ;;  %v3365_v21 = vpack.c.bf16 %v8191_v55, %v8386_v29 }
 0x585   :  { %v3208_v58 = vmax.f32 %v3206_v48, %v3207_v35  ;;  %v3221_v40 = vrot.slane %v3220_v12, 1  ;;  %v3124_v25 = vcombine.high %v3084_v45, %v3084_v45  ;;  %v3131_v1 = vrot.slane %v3084_v45, %v7767_v61  ;;  %7081 = vmatprep.mubr.msk.bf16.mxu1 %vm425_vm5, %v3364_v37  ;;  %7072 = vmatmul.mubr.msk.bf16.vlgmr.msra.gmra.mxu0 %vm425_vm5, %v3379_v15 }
 0x586   :  { %v3215_v41 = vmax.f32 %v3213_v50, %v3214_v0  ;;  %v3228_v54 = vrot.slane %v3227_v42, 1  ;;  %v3085_v51 = vadd.f32 %v8274_v34, %v3081_v63  ;;  %7082 = vmatmul.mubr.msk.bf16.vlgmr.msra.gmra.mxu1 %vm425_vm5, %v3365_v21  ;;  %7090 = vmatpush3.bf16.msra.mxu0 %v8296_v19 }
 0x587   :  { %v3222_v31 = vmax.f32 %v3220_v12, %v3221_v40  ;;  %v3337_v53 = vsel %vm1236_vm10, %v3208_v58, %v3336_v14  ;;  %v3138_v16 = vrot.slane %v3124_v25, %v7767_v61  ;;  %v3139_v47 = vcombine.high %v3131_v1, %v3131_v1  ;;  %7085 = vmatprep.mubr.msk.bf16.mxu1 %vm425_vm5, %v8285_v22 }
 0x588   :  { %v3229_v59 = vmax.f32 %v3227_v42, %v3228_v54  ;;  %v3338_v15 = vsel %vm1238_vm11, %v3215_v41, %v3337_v53  ;;  %v3230_v46 = vsel %vm893_vm6, %v3131_v1, -inf  ;;  %v3141_v33 = vcombine.high %v3085_v51, %v3085_v51  ;;  %7075 = vmatprep.mubr.msk.bf16.mxu0 %vm425_vm5, %v8380_v62 }
 0x589   :  { %v3339_v34 = vsel %vm1240_vm12, %v3222_v31, %v3338_v15  ;;  %v3140_v19 = vcombine.high %v3138_v16, %v3138_v16  ;;  %v3231_v56 = vrot.slane %v3230_v46, 4  ;;  %v3237_v26 = vsel %vm893_vm6, %v3139_v47, -inf }
 0x58a   :  { %v3340_v20 = vsel %vm1242_vm13, %v3229_v59, %v3339_v34  ;;  %v3238_v43 = vrot.slane %v3237_v26, 4  ;;  %v3244_v36 = vsel %vm893_vm6, %v3138_v16, -inf  ;;  %v3148_v13 = vrot.slane %v3085_v51, %v7767_v61 }
 0x58b   :  { %3354 = vst.msk [vmem:[#allocation2 + $0x38] sm:$0xff] %vm425_vm5, %v3340_v20  ;;  %v3232_v17 = vmax.f32 %v3230_v46, %v3231_v56  ;;  %v3245_v48 = vrot.slane %v3244_v36, 4  ;;  %v3251_v28 = vsel %vm893_vm6, %v3140_v19, -inf  ;;  %v3155_v14 = vrot.slane %v3141_v33, %v7767_v61 }
 0x58c   :  { %v3239_v8 = vmax.f32 %v3237_v26, %v3238_v43  ;;  %v3252_v27 = vrot.slane %v3251_v28, 4  ;;  %v3156_v50 = vcombine.high %v3148_v13, %v3148_v13  ;;  %v3258_v32 = vsel %vm893_vm6, %v3148_v13, -inf }
 0x58d   :  { %v3233_v57 = vrot.slane %v3232_v17, 2  ;;  %v3246_v44 = vmax.f32 %v3244_v36, %v3245_v48  ;;  %v3157_v24 = vcombine.high %v3155_v14, %v3155_v14  ;;  %v3259_v35 = vrot.slane %v3258_v32, 4 }
 0x58e   :  { %v3240_v12 = vrot.slane %v3239_v8, 2  ;;  %v3253_v45 = vmax.f32 %v3251_v28, %v3252_v27  ;;  %v3265_v37 = vsel %vm893_vm6, %v3156_v50, -inf  ;;  %v3272_v0 = vsel %vm893_vm6, %v3155_v14, -inf }
 0x58f   :  { %v3234_v42 = vmax.f32 %v3232_v17, %v3233_v57  ;;  %v3247_v63 = vrot.slane %v3246_v44, 2  ;;  %v3260_v21 = vmax.f32 %v3258_v32, %v3259_v35  ;;  %v3266_v58 = vrot.slane %v3265_v37, 4 }
 0x590   :  { %v3241_v40 = vmax.f32 %v3239_v8, %v3240_v12  ;;  %v3254_v25 = vrot.slane %v3253_v45, 2  ;;  %v3273_v1 = vrot.slane %v3272_v0, 4  ;;  %v3279_v41 = vsel %vm893_vm6, %v3157_v24, -inf }
 0x591   :  { %v3235_v54 = vrot.slane %v3234_v42, 1  ;;  %v3248_v51 = vmax.f32 %v3246_v44, %v3247_v63  ;;  %v3261_v31 = vrot.slane %v3260_v21, 2  ;;  %v3267_v53 = vmax.f32 %v3265_v37, %v3266_v58 }
 0x592   :  { %v3242_v16 = vrot.slane %v3241_v40, 1  ;;  %v3255_v47 = vmax.f32 %v3253_v45, %v3254_v25  ;;  %v3274_v59 = vmax.f32 %v3272_v0, %v3273_v1  ;;  %v3280_v15 = vrot.slane %v3279_v41, 4  ;;  %v3376_v58 = vld [vmem:[#allocation2 + $0x38] sm:$0xff] }
 0x593   :  { %v3236_v46 = vmax.f32 %v3234_v42, %v3235_v54  ;;  %v3249_v33 = vrot.slane %v3248_v51, 1  ;;  %v3262_v34 = vmax.f32 %v3260_v21, %v3261_v31  ;;  %v3268_v19 = vrot.slane %v3267_v53, 2  ;;  %v3362_v25 = vld [vmem:[#allocation2 + $0x34] sm:$0xff] }
 0x594   :  { %v3243_v56 = vmax.f32 %v3241_v40, %v3242_v16  ;;  %v3256_v26 = vrot.slane %v3255_v47, 1  ;;  %v3275_v20 = vrot.slane %v3274_v59, 2  ;;  %v3281_v43 = vmax.f32 %v3279_v41, %v3280_v15 }
 0x595   :  { %v3250_v36 = vmax.f32 %v3248_v51, %v3249_v33  ;;  %v3263_v13 = vrot.slane %v3262_v34, 1  ;;  %v3269_v17 = vmax.f32 %v3267_v53, %v3268_v19  ;;  %v3544_v51 = vpack.c.bf16 %v8386_v29, %v8384_v23  ;;  %v7341_v23 = vld [vmem:[%s9136_s9 + $0x18] sm:$0xff]   ;;  %v8455_v29 = vld [vmem:[%s9136_s9 + $0x28] sm:$0xff]  }
 0x596   :  { %v3257_v48 = vmax.f32 %v3255_v47, %v3256_v26  ;;  %v3341_v28 = vsel %vm1230_vm7, %v3243_v56, %v3236_v46  ;;  %v3276_v14 = vmax.f32 %v3274_v59, %v3275_v20  ;;  %v3282_v8 = vrot.slane %v3281_v43, 2  ;;  %7109 = vmatprep.subr.bf16.mxu0 %v7341_v23 }
 0x597   :  { %v3342_v27 = vsel %vm1232_vm8, %v3250_v36, %v3341_v28  ;;  %v3264_v50 = vmax.f32 %v3262_v34, %v3263_v13  ;;  %v3270_v32 = vrot.slane %v3269_v17, 1  ;;  %v8438_v31 = vpack.c.bf16 %v8193_v3, %v8191_v55  ;;  %v7342_v3 = vld [vmem:[%s9136_s9 + $0x20] sm:$0xff]  }
 0x598   :  { %v3277_v57 = vrot.slane %v3276_v14, 1  ;;  %v3283_v44 = vmax.f32 %v3281_v43, %v3282_v8  ;;  %v3343_v24 = vsel %vm1234_vm9, %v3257_v48, %v3342_v27  ;;  %v3546_v53 = vpack.c.bf16 %v3362_v25, %v8278_v60  ;;  %7099 = vmatprep.subr.bf16.mxu1 %v7342_v3 }
 0x599   :  { %v3271_v35 = vmax.f32 %v3269_v17, %v3270_v32  ;;  %v3344_v12 = vsel %vm1236_vm10, %v3264_v50, %v3343_v24  ;;  %7100 = vmatpush3.bf16.msra.mxu1 %v7342_v3  ;;  %v6431_v32 = vld [vmem:[%s9135_s8 + $0x1] ss:$0 sm:$0xff] }
 0x59a   :  { %v3278_v45 = vmax.f32 %v3276_v14, %v3277_v57  ;;  %v3284_v37 = vrot.slane %v3283_v44, 1  ;;  %7119 = vmatprep.subr.bf16.mxu1 %v8455_v29 }
 0x59b   :  { %v3345_v0 = vsel %vm1238_vm11, %v3271_v35, %v3344_v12 }
 0x59c   :  { %v3285_v42 = vmax.f32 %v3283_v44, %v3284_v37  ;;  %v3346_v63 = vsel %vm1240_vm12, %v3278_v45, %v3345_v0 }
 0x59e   :  { %v3347_v21 = vsel %vm1242_vm13, %v3285_v42, %v3346_v63 }
 0x59f   :  { %3355 = vst.msk [vmem:[#allocation2 + $0x40] sm:$0xff] %vm425_vm5, %v3347_v21 }
 0x5a6   :  { %v3377_v40 = vld [vmem:[#allocation2 + $0x40] sm:$0xff] }
 0x5a7   :  { %v3363_v1 = vld [vmem:[#allocation2 + $0x3c] sm:$0xff]  ;;  %v3381_v41 = vpack.c.bf16 %v3377_v40, %v3376_v58  ;;  %v3543_v16 = vld [vmem:[#allocation2 + $0x44] sm:$0xff] }
 0x5a8   :  { %v3367_v54 = vpack.c.bf16 %v3363_v1, %v3362_v25  ;;  %v3547_v47 = vpack.c.bf16 %v3543_v16, %v3363_v1 }
 0x5a9   :  { %7076 = vmatmul.mubr.msk.bf16.gmra.mxu0 %vm425_vm5, %v3381_v41 }
 0x5aa   :  { %7086 = vmatmul.mubr.msk.bf16.gmra.mxu1 %vm425_vm5, %v3367_v54  ;;  %7091 = vmatprep.mubr.msk.bf16.mxu0 %vm425_vm5, %v3544_v51 }
 0x5b1   :  { %7092 = vmatmul.mubr.msk.bf16.vlgmr.msra.gmra.mxu0 %vm425_vm5, %v8438_v31 }
 0x5b2   :  { %7095 = vmatprep.mubr.msk.bf16.mxu0 %vm425_vm5, %v3546_v53  ;;  %7110 = vmatpush3.bf16.msra.mxu0 %v7341_v23 }
 0x5b3   :  { %7129 = vmatprep.subr.bf16.mxu0 %v7372_v2 }
 0x5b9   :  { %7096 = vmatmul.mubr.msk.bf16.gmra.mxu0 %vm425_vm5, %v3547_v47 }
 0x645   :  { %v7073_v59 = vpop.f32.mrf.mxu0 }
 0x646   :  { %v7083_v15 = vpop.f32.mrf.mxu1  ;;  %v6460_v59 = vld [vmem:[%s9128_s1 + $0xe] sm:$0x3] }
 0x647   :  { %v3433_v46 = vpop.f32.mrf.mxu0 }
 0x648   :  { %v3509_v33 = vpop.f32.mrf.mxu1 }
 0x649   :  { %v7074_v34 = vpop.f32.mrf.mxu0  ;;  %v3510_v27 = vadd.f32 %v3509_v33, %v3433_v46 }
 0x64a   :  { %v7084_v19 = vpop.f32.mrf.mxu1 }
 0x64b   :  { %v3436_v56 = vpop.f32.mrf.mxu0 }
 0x64c   :  { %v3512_v26 = vpop.f32.mrf.mxu1 }
 0x64d   :  { %v3513_v24 = vadd.f32 %v3512_v26, %v3436_v56  ;;  %v3674_v26 = vpack.c.bf16 %v8195_v52, %v8281_v4 }
 0x669   :  { %v7077_v20 = vpop.f32.mrf.mxu0 }
 0x66a   :  { %v7087_v43 = vpop.f32.mrf.mxu1 }
 0x66b   :  { %v3447_v36 = vpop.f32.mrf.mxu0  ;;  %v3530_v45 = vadd.f32 %v7087_v43, %v7077_v20  ;;  %v4264_v20 = vsel %vm124_vm0, %v6460_v59, 0 }
 0x66c   :  { %v3523_v13 = vpop.f32.mrf.mxu1  ;;  %v6459_v36 = vld [vmem:[%s9128_s1 + $0xc] sm:$0x3] }
 0x66d   :  { %v7078_v17 = vpop.f32.mrf.mxu0 }
 0x66e   :  { %v7088_v48 = vpop.f32.mrf.mxu1 }
 0x66f   :  { %v3449_v28 = vpop.f32.mrf.mxu0  ;;  %v3533_v40 = vadd.f32 %v7088_v48, %v7078_v17  ;;  %v4353_v48 = vsel %vm124_vm0, %v6459_v36, 0 }
 0x670   :  { %v3525_v14 = vpop.f32.mrf.mxu1 }
 0x671   :  { %v7093_v8 = vpop.f32.mrf.mxu0  ;;  %v4234_v14 = vld [vmem:[#allocation2 + $0x20] sm:$0xff] }
 0x673   :  { %v3599_v50 = vpop.f32.mrf.mxu0 }
 0x674   :  { %v3626_v57 = vadd.f32 %v3599_v50, %v3510_v27 }
 0x675   :  { %v7094_v44 = vpop.f32.mrf.mxu0 }
 0x676   :  { %v3638_v35 = vadd.f32 %v6431_v32, %v3626_v57 }
 0x677   :  { %v3602_v12 = vpop.f32.mrf.mxu0 }
 0x678   :  { %v3642_v37 = vmax.f32 %v3638_v35, 0.0  ;;  %v3627_v0 = vadd.f32 %v3602_v12, %v3513_v24 }
 0x679   :  { %v7097_v42 = vpop.f32.mrf.mxu0 }
 0x67a   :  { %3646 = vst.msk [vmem:[#allocation2 + $0x8] sm:$0xff] %vm46_vm1, %v3642_v37  ;;  %v3639_v63 = vadd.f32 %v6431_v32, %v3627_v0  ;;  %v3628_v21 = vadd.f32 %v7097_v42, %v3530_v45  ;;  %v4240_v45 = vld [vmem:[#allocation2 + $0x50] sm:$0xff]  ;;  %v4218_v37 = vld [vmem:[#allocation2 + $0x27] sm:$0xff] }
 0x67b   :  { %v3613_v58 = vpop.f32.mrf.mxu0  ;;  %v8536_v0 = vld [vmem:[#allocation2 + $0x2f] sm:$0xff] }
 0x67c   :  { %v3643_v25 = vmax.f32 %v3639_v63, 0.0  ;;  %v3640_v1 = vadd.f32 %v6431_v32, %v3628_v21  ;;  %v4226_v63 = vpack.c.bf16 %v8536_v0, %v4218_v37 }
 0x67d   :  { %v7098_v41 = vpop.f32.mrf.mxu0 }
 0x67e   :  { %3647 = vst.msk [vmem:[#allocation2 + $0x10] sm:$0xff] %vm46_vm1, %v3643_v25  ;;  %v3644_v54 = vmax.f32 %v3640_v1, 0.0  ;;  %v3629_v51 = vadd.f32 %v7098_v41, %v3533_v40 }
 0x67f   :  { %v3615_v53 = vpop.f32.mrf.mxu0 }
 0x680   :  { %3648 = vst.msk [vmem:[#allocation2 + $0x38] sm:$0xff] %vm46_vm1, %v3644_v54  ;;  %v3641_v16 = vadd.f32 %v6431_v32, %v3629_v51  ;;  %v4429_v54 = vld [vmem:[#allocation2 + $0x21] sm:$0xff] }
 0x681   :  { %v3665_v23 = vld [vmem:[#allocation2 + $0x8] sm:$0xff] }
 0x682   :  { %v3645_v47 = vmax.f32 %v3641_v16, 0.0  ;;  %v3650_v3 = vld [vmem:[#allocation2 + $0x4] sm:$0xff] }
 0x684   :  { %3649 = vst.msk [vmem:[#allocation2 + $0x40] sm:$0xff] %vm46_vm1, %v3645_v47 }
 0x685   :  { %v3666_v15 = vld [vmem:[#allocation2 + $0x10] sm:$0xff] }
 0x686   :  { %v3651_v46 = vld [vmem:[#allocation2 + $0xc] sm:$0xff]  ;;  %v3652_v33 = vld [vmem:[#allocation2 + $0x14] sm:$0xff]  ;;  %v3673_v34 = vpack.c.bf16 %v3666_v15, %v3665_v23 }
 0x687   :  { %v3658_v19 = vpack.c.bf16 %v3651_v46, %v3650_v3  ;;  %v3659_v56 = vpack.c.bf16 %v8191_v55, %v3652_v33  ;;  %4206 = vst.msk [vmem:[#allocation2 + $0x8] sm:$0xff] %vm67_vm2, %v7463_v5  ;;  %4207 = vst.msk [vmem:[#allocation2 + $0x10] sm:$0xff] %vm67_vm2, %v7468_v6  ;;  %v3671_v5 = vld [vmem:[#allocation2 + $0x38] sm:$0xff]  ;;  %v3846_v43 = vpack.c.bf16 %v3652_v33, %v3651_v46  ;;  %v8555_v3 = vld [vmem:[#allocation2 + $0x29] sm:$0xff] }
 0x688   :  { %4208 = vst.msk [vmem:[#allocation2 + $0x18] sm:$0xff] %vm67_vm2, %v7497_v7  ;;  %7101 = vmatprep.mubr.msk.bf16.mxu1 %vm46_vm1, %v3673_v34  ;;  %v3656_v6 = vld [vmem:[#allocation2 + $0x34] sm:$0xff] }
 0x689   :  { %7111 = vmatprep.mubr.msk.bf16.mxu0 %vm46_vm1, %v3658_v19  ;;  %7102 = vmatmul.mubr.msk.bf16.vlgmr.msra.gmra.mxu1 %vm46_vm1, %v3674_v26  ;;  %v3848_v17 = vpack.c.bf16 %v3656_v6, %v8278_v60 }
 0x68a   :  { %7112 = vmatmul.mubr.msk.bf16.vlgmr.msra.gmra.mxu0 %vm46_vm1, %v3659_v56  ;;  %7105 = vmatprep.mubr.msk.bf16.mxu1 %vm46_vm1, %v8380_v62  ;;  %v4435_v56 = vld [vmem:[#allocation2 + $0x51] sm:$0xff] }
 0x68b   :  { %7130 = vmatpush3.bf16.msra.mxu0 %v4264_v20  ;;  %7115 = vmatprep.mubr.msk.bf16.mxu0 %vm46_vm1, %v8285_v22  ;;  %v3672_v7 = vld [vmem:[#allocation2 + $0x40] sm:$0xff]  ;;  %v6480_v20 = vld [vmem:[%s9130_s3 + $0x1c] sm:$0xf] }
 0x68c   :  { %v3657_v55 = vld [vmem:[#allocation2 + $0x3c] sm:$0xff]  ;;  %7120 = vmatpush3.bf16.msra.mxu1 %v8455_v29  ;;  %v3845_v52 = vld [vmem:[#allocation2 + $0x44] sm:$0xff]  ;;  %7173 = vmatprep.subr.bf16.mxu0 %v7372_v2  ;;  %v3676_v4 = vpack.c.bf16 %v3672_v7, %v3671_v5  ;;  %v4622_v5 = vsel %vm482_vm4, %v6480_v20, 0 }
 0x68d   :  { %4210 = vst.msk [vmem:[#allocation2 + $0x38] sm:$0xff] %vm67_vm2, %v7519_v9  ;;  %4211 = vst.msk [vmem:[#allocation2 + $0x40] sm:$0xff] %vm67_vm2, %v7524_v10  ;;  %7151 = vmatprep.subr.bf16.mxu1 %v7372_v2  ;;  %v3661_v22 = vpack.c.bf16 %v3657_v55, %v3656_v6  ;;  %v6471_v10 = vld [vmem:[%s9128_s1 + $0x10] sm:$0x3]  ;;  %v3849_v8 = vpack.c.bf16 %v3845_v52, %v3657_v55  ;;  %v6479_v6 = vld [vmem:[%s9130_s3 + $0x18] sm:$0xf] }
 0x68e   :  { %4212 = vst.msk [vmem:[#allocation2 + $0x48] sm:$0xff] %vm67_vm2, %v7529_v11  ;;  %v4231_v9 = vld [vmem:[#allocation2 + $0x8] sm:$0xff]  ;;  %v4232_v29 = vld [vmem:[#allocation2 + $0x10] sm:$0xff]  ;;  %v4459_v13 = vsel %vm124_vm0, %v6471_v10, 0  ;;  %v4711_v7 = vsel %vm482_vm4, %v6479_v6, 0  ;;  %vm6277_vm0 = vcmask 392192  }
 0x68f   :  { %v4241_v11 = vpack.c.bf16 %v4232_v29, %v4231_v9  ;;  %v4233_v28 = vld [vmem:[#allocation2 + $0x18] sm:$0xff]  ;;  %v4215_v27 = vld [vmem:[#allocation2 + $0xf] sm:$0xff] }
 0x690   :  { %v4242_v60 = vpack.c.bf16 %v4234_v14, %v4233_v28  ;;  %v4216_v32 = vld [vmem:[#allocation2 + $0x17] sm:$0xff]  ;;  %v4217_v24 = vld [vmem:[#allocation2 + $0x1f] sm:$0xff]  ;;  %v4426_v21 = vld [vmem:[#allocation2 + $0x9] sm:$0xff] }
 0x691   :  { %7106 = vmatmul.mubr.msk.bf16.gmra.mxu1 %vm46_vm1, %v3676_v4  ;;  %v4225_v12 = vpack.c.bf16 %v4217_v24, %v4216_v32  ;;  %v4427_v25 = vld [vmem:[#allocation2 + $0x11] sm:$0xff]  ;;  %v4428_v16 = vld [vmem:[#allocation2 + $0x19] sm:$0xff]  ;;  %v6454_v32 = vld [vmem:[%s9137_s10 + $0x1] ss:$0 sm:$0xff] }
 0x692   :  { %7116 = vmatmul.mubr.msk.bf16.gmra.mxu0 %vm46_vm1, %v3661_v22  ;;  %7121 = vmatprep.mubr.msk.bf16.mxu1 %vm46_vm1, %v3846_v43  ;;  %v4436_v41 = vpack.c.bf16 %v4427_v25, %v4426_v21  ;;  %v4437_v23 = vpack.c.bf16 %v4429_v54, %v4428_v16 }
 0x693   :  { %7131 = vmatprep.mubr.msk.bf16.mxu0 %vm7373_vm3, %v7372_v2 }
 0x694   :  { %v4237_v57 = vld [vmem:[#allocation2 + $0x38] sm:$0xff]  ;;  %v4238_v44 = vld [vmem:[#allocation2 + $0x40] sm:$0xff] }
 0x695   :  { %v4244_v35 = vpack.c.bf16 %v4238_v44, %v4237_v57  ;;  %v4220_v58 = vld [vmem:[#allocation2 + $0x37] sm:$0xff]  ;;  %v4221_v40 = vld [vmem:[#allocation2 + $0x3f] sm:$0xff]  ;;  %v4222_v51 = vld [vmem:[#allocation2 + $0x47] sm:$0xff] }
 0x696   :  { %v4227_v1 = vpack.c.bf16 %v4221_v40, %v4220_v58  ;;  %v4223_v53 = vld [vmem:[#allocation2 + $0x4f] sm:$0xff]  ;;  %v4432_v46 = vld [vmem:[#allocation2 + $0x39] sm:$0xff]  ;;  %v4433_v33 = vld [vmem:[#allocation2 + $0x41] sm:$0xff] }
 0x697   :  { %v4228_v47 = vpack.c.bf16 %v4223_v53, %v4222_v51  ;;  %v4431_v59 = vld [vmem:[#allocation2 + $0x31] sm:$0xff]  ;;  %v4439_v34 = vpack.c.bf16 %v4433_v33, %v4432_v46  ;;  %v4434_v19 = vld [vmem:[#allocation2 + $0x49] sm:$0xff]  ;;  %v8593_v40 = vld [vmem:[%s9139_s12 + $0x1] ss:$0 sm:$0xff] }
 0x698   :  { %v4438_v15 = vpack.c.bf16 %v4431_v59, %v8555_v3  ;;  %v4440_v26 = vpack.c.bf16 %v4435_v56, %v4434_v19 }
 0x699   :  { %7122 = vmatmul.mubr.msk.bf16.vlgmr.msra.gmra.mxu1 %vm46_vm1, %v8438_v31  ;;  %v4214_v31 = vld [vmem:[#allocation2 + $0x7] sm:$0xff] }
 0x69a   :  { %7132 = vmatmul.mubr.msk.bf16.vlgmr.msra.gmra.mxu0 %vm67_vm2, %v4241_v11  ;;  %7125 = vmatprep.mubr.msk.bf16.mxu1 %vm46_vm1, %v3848_v17  ;;  %v4224_v50 = vpack.c.bf16 %v4215_v27, %v4214_v31 }
 0x69b   :  { %7174 = vmatpush3.bf16.msra.mxu0 %v4459_v13  ;;  %7135 = vmatprep.mubr.msk.bf16.mxu0 %vm7373_vm3, %v7372_v2 }
 0x69c   :  { %7152 = vmatpush3.bf16.msra.mxu1 %v4353_v48  ;;  %7217 = vmatprep.subr.bf16.mxu0 %v7372_v2 }
 0x69d   :  { %7195 = vmatprep.subr.bf16.mxu1 %v7372_v2 }
 0x6a1   :  { %7126 = vmatmul.mubr.msk.bf16.gmra.mxu1 %vm46_vm1, %v3849_v8 }
 0x6a2   :  { %7136 = vmatmul.mubr.msk.bf16.gmra.mxu0 %vm67_vm2, %v4242_v60  ;;  %7153 = vmatprep.mubr.msk.bf16.mxu1 %vm7373_vm3, %v7372_v2 }
 0x6a3   :  { %7139 = vmatprep.mubr.msk.bf16.mxu0 %vm7373_vm3, %v7372_v2 }
 0x6a9   :  { %7154 = vmatmul.mubr.msk.bf16.vlgmr.msra.gmra.mxu1 %vm67_vm2, %v4224_v50 }
 0x6aa   :  { %7140 = vmatmul.mubr.msk.bf16.gmra.mxu0 %vm67_vm2, %v8380_v62  ;;  %7157 = vmatprep.mubr.msk.bf16.mxu1 %vm7373_vm3, %v7372_v2  ;;  %v4239_v62 = vld [vmem:[#allocation2 + $0x48] sm:$0xff] }
 0x6ab   :  { %7143 = vmatprep.mubr.msk.bf16.mxu0 %vm7373_vm3, %v7372_v2  ;;  %v4245_v42 = vpack.c.bf16 %v4240_v45, %v4239_v62  ;;  %7196 = vmatpush3.bf16.msra.mxu1 %v4622_v5  ;;  %v8588_v62 = vld [vmem:[%s9138_s11 + $0x1] ss:$0 sm:$0xff] }
 0x6ac   :  { %7239 = vmatprep.subr.bf16.mxu1 %v7372_v2 }
 0x6b1   :  { %7158 = vmatmul.mubr.msk.bf16.gmra.mxu1 %vm67_vm2, %v4225_v12 }
 0x6b2   :  { %7144 = vmatmul.mubr.msk.bf16.gmra.mxu0 %vm67_vm2, %v4244_v35  ;;  %7161 = vmatprep.mubr.msk.bf16.mxu1 %vm7373_vm3, %v7372_v2 }
 0x6b3   :  { %7147 = vmatprep.mubr.msk.bf16.mxu0 %vm7373_vm3, %v7372_v2 }
 0x6b9   :  { %7162 = vmatmul.mubr.msk.bf16.gmra.mxu1 %vm67_vm2, %v4226_v63 }
 0x6ba   :  { %7148 = vmatmul.mubr.msk.bf16.gmra.mxu0 %vm67_vm2, %v4245_v42  ;;  %7165 = vmatprep.mubr.msk.bf16.mxu1 %vm7373_vm3, %v7372_v2 }
 0x6bb   :  { %7175 = vmatprep.mubr.msk.bf16.mxu0 %vm7373_vm3, %v7372_v2 }
 0x6c1   :  { %7166 = vmatmul.mubr.msk.bf16.gmra.mxu1 %vm67_vm2, %v4227_v1 }
 0x6c2   :  { %7176 = vmatmul.mubr.msk.bf16.vlgmr.msra.gmra.mxu0 %vm67_vm2, %v4436_v41  ;;  %7169 = vmatprep.mubr.msk.bf16.mxu1 %vm7373_vm3, %v7372_v2 }
 0x6c3   :  { %7179 = vmatprep.mubr.msk.bf16.mxu0 %vm7373_vm3, %v7372_v2  ;;  %7218 = vmatpush3.bf16.msra.mxu0 %v4711_v7 }
 0x6c9   :  { %7170 = vmatmul.mubr.msk.bf16.gmra.mxu1 %vm67_vm2, %v4228_v47 }
 0x6ca   :  { %7180 = vmatmul.mubr.msk.bf16.gmra.mxu0 %vm67_vm2, %v4437_v23  ;;  %7197 = vmatprep.mubr.msk.bf16.mxu1 %vm7373_vm3, %v7372_v2 }
 0x6cb   :  { %7183 = vmatprep.mubr.msk.bf16.mxu0 %vm7373_vm3, %v7372_v2 }
 0x6d2   :  { %7184 = vmatmul.mubr.msk.bf16.gmra.mxu0 %vm67_vm2, %v4438_v15 }
 0x6d3   :  { %7187 = vmatprep.mubr.msk.bf16.mxu0 %vm7373_vm3, %v7372_v2 }
 0x6da   :  { %7188 = vmatmul.mubr.msk.bf16.gmra.mxu0 %vm67_vm2, %v4439_v34 }
 0x6db   :  { %7191 = vmatprep.mubr.msk.bf16.mxu0 %vm7373_vm3, %v7372_v2 }
 0x6e2   :  { %7192 = vmatmul.mubr.msk.bf16.gmra.mxu0 %vm67_vm2, %v4440_v26 }
 0x6e3   :  { %7219 = vmatprep.mubr.msk.bf16.mxu0 %vm7373_vm3, %v7372_v2 }
 0x749   :  { %v7103_v55 = vpop.f32.mrf.mxu1 }
 0x74a   :  { %v7113_v52 = vpop.f32.mrf.mxu0 }
 0x74b   :  { %v3732_v4 = vpop.f32.mrf.mxu1 }
 0x74c   :  { %v3811_v22 = vpop.f32.mrf.mxu0 }
 0x74d   :  { %v7104_v43 = vpop.f32.mrf.mxu1  ;;  %v3812_v27 = vadd.f32 %v3811_v22, %v3732_v4 }
 0x74e   :  { %v7114_v9 = vpop.f32.mrf.mxu0 }
 0x74f   :  { %v3735_v29 = vpop.f32.mrf.mxu1 }
 0x750   :  { %v3814_v10 = vpop.f32.mrf.mxu0 }
 0x751   :  { %v7107_v11 = vpop.f32.mrf.mxu1  ;;  %v3815_v12 = vadd.f32 %v3814_v10, %v3735_v29 }
 0x752   :  { %v7117_v36 = vpop.f32.mrf.mxu0 }
 0x753   :  { %v3746_v13 = vpop.f32.mrf.mxu1  ;;  %v3832_v63 = vadd.f32 %v7117_v36, %v7107_v11 }
 0x754   :  { %v3825_v17 = vpop.f32.mrf.mxu0 }
 0x755   :  { %v7108_v48 = vpop.f32.mrf.mxu1 }
 0x756   :  { %v7118_v28 = vpop.f32.mrf.mxu0 }
 0x757   :  { %v3748_v14 = vpop.f32.mrf.mxu1  ;;  %v3835_v15 = vadd.f32 %v7118_v28, %v7108_v48 }
 0x758   :  { %v3827_v60 = vpop.f32.mrf.mxu0 }
 0x759   :  { %v7123_v8 = vpop.f32.mrf.mxu1 }
 0x75a   :  { %v8578_v31 = vpop.f32.mrf.mxu0 }
 0x75b   :  { %v3905_v50 = vpop.f32.mrf.mxu1 }
 0x75c   :  { %v7133_v57 = vpop.f32.mrf.mxu0  ;;  %v3932_v44 = vadd.f32 %v3905_v50, %v3812_v27 }
 0x75d   :  { %v7124_v24 = vpop.f32.mrf.mxu1 }
 0x75e   :  { %v8583_v35 = vpop.f32.mrf.mxu0  ;;  %v3944_v45 = vadd.f32 %v6454_v32, %v3932_v44 }
 0x75f   :  { %v3908_v37 = vpop.f32.mrf.mxu1 }
 0x760   :  { %v7134_v42 = vpop.f32.mrf.mxu0  ;;  %v3948_v21 = vmax.f32 %v3944_v45, 0.0  ;;  %v3933_v58 = vadd.f32 %v3908_v37, %v3815_v12 }
 0x761   :  { %v7127_v25 = vpop.f32.mrf.mxu1 }
 0x762   :  { %v8595_v1 = vpop.f32.mrf.mxu0  ;;  %v3962_v41 = vmul.f32 %v8588_v62, %v3948_v21  ;;  %v3945_v54 = vadd.f32 %v6454_v32, %v3933_v58  ;;  %v3934_v51 = vadd.f32 %v7127_v25, %v3832_v63 }
 0x763   :  { %v3919_v53 = vpop.f32.mrf.mxu1 }
 0x764   :  { %v7137_v16 = vpop.f32.mrf.mxu0  ;;  %v3970_v47 = vadd.f32 %v8593_v40, %v3962_v41  ;;  %v3949_v23 = vmax.f32 %v3945_v54, 0.0  ;;  %v3946_v59 = vadd.f32 %v6454_v32, %v3934_v51 }
 0x765   :  { %v7128_v46 = vpop.f32.mrf.mxu1 }
 0x766   :  { %v8599_v33 = vpop.f32.mrf.mxu0  ;;  %v3974_v34 = vcombine.high %v3970_v47, %v3970_v47  ;;  %v3981_v19 = vrot.slane %v3970_v47, %v7767_v61  ;;  %v3963_v56 = vmul.f32 %v8588_v62, %v3949_v23  ;;  %v3950_v26 = vmax.f32 %v3946_v59, 0.0 }
 0x767   :  { %v3935_v20 = vadd.f32 %v7128_v46, %v3835_v15  ;;  %v3921_v5 = vpop.f32.mrf.mxu1 }
 0x768   :  { %v7138_v6 = vpop.f32.mrf.mxu0  ;;  %v3988_v7 = vrot.slane %v3974_v34, %v7767_v61  ;;  %v3989_v55 = vcombine.high %v3981_v19, %v3981_v19  ;;  %v4016_v52 = vsel %vm1945_vm14, %v3981_v19, -inf  ;;  %v3971_v4 = vadd.f32 %v8593_v40, %v3963_v56 }
 0x769   :  { %v4017_v22 = vrot.slane %v4016_v52, 4  ;;  %v4072_v43 = vmul.f32 %v8588_v62, %v3950_v26  ;;  %v8607_v29 = vpop.f32.mrf.mxu1  ;;  %v3947_v50 = vadd.f32 %v6454_v32, %v3935_v20 }
 0x76a   :  { %v4316_v9 = vpop.f32.mrf.mxu0  ;;  %v3990_v10 = vcombine.high %v3988_v7, %v3988_v7  ;;  %v4023_v11 = vsel %vm1945_vm14, %v3989_v55, -inf  ;;  %v4030_v36 = vsel %vm1945_vm14, %v3988_v7, -inf  ;;  %v3998_v28 = vrot.slane %v3971_v4, %v7767_v61 }
 0x76b   :  { %v4018_v13 = vmax.f32 %v4016_v52, %v4017_v22  ;;  %v4024_v17 = vrot.slane %v4023_v11, 4  ;;  %v4031_v48 = vrot.slane %v4030_v36, 4  ;;  %v7155_v60 = vpop.f32.mrf.mxu1  ;;  %v4074_v27 = vadd.f32 %v8593_v40, %v4072_v43 }
 0x76c   :  { %v7141_v14 = vpop.f32.mrf.mxu0  ;;  %v4037_v8 = vsel %vm1945_vm14, %v3990_v10, -inf  ;;  %v3991_v12 = vcombine.high %v3971_v4, %v3971_v4  ;;  %v4006_v42 = vcombine.high %v3998_v28, %v3998_v28  ;;  %v4044_v63 = vsel %vm1945_vm14, %v3998_v28, -inf }
 0x76d   :  { %v4019_v57 = vrot.slane %v4018_v13, 2  ;;  %v4025_v44 = vmax.f32 %v4023_v11, %v4024_v17  ;;  %v4032_v24 = vmax.f32 %v4030_v36, %v4031_v48  ;;  %v4392_v37 = vpop.f32.mrf.mxu1  ;;  %v4078_v21 = vcombine.high %v4074_v27, %v4074_v27 }
 0x76e   :  { %v4318_v45 = vpop.f32.mrf.mxu0  ;;  %v4085_v58 = vrot.slane %v4074_v27, %v7767_v61  ;;  %v4038_v51 = vrot.slane %v4037_v8, 4  ;;  %v4045_v47 = vrot.slane %v4044_v63, 4  ;;  %v3951_v59 = vmax.f32 %v3947_v50, 0.0 }
 0x76f   :  { %v4020_v25 = vmax.f32 %v4018_v13, %v4019_v57  ;;  %v4026_v41 = vrot.slane %v4025_v44, 2  ;;  %v4033_v54 = vrot.slane %v4032_v24, 2  ;;  %v7156_v16 = vpop.f32.mrf.mxu1  ;;  %v4092_v32 = vrot.slane %v4078_v21, %v7767_v61 }
 0x770   :  { %v7142_v53 = vpop.f32.mrf.mxu0  ;;  %v4093_v23 = vcombine.high %v4085_v58, %v4085_v58  ;;  %v4051_v19 = vsel %vm1945_vm14, %v4006_v42, -inf  ;;  %v4046_v20 = vmax.f32 %v4044_v63, %v4045_v47  ;;  %v4120_v6 = vsel %vm1945_vm14, %v4085_v58, -inf }
 0x771   :  { %v4021_v15 = vrot.slane %v4020_v25, 1  ;;  %v4027_v46 = vmax.f32 %v4025_v44, %v4026_v41  ;;  %v4034_v34 = vmax.f32 %v4032_v24, %v4033_v54  ;;  %v4397_v26 = vpop.f32.mrf.mxu1  ;;  %v4094_v5 = vcombine.high %v4092_v32, %v4092_v32 }
 0x772   :  { %v8618_v56 = vpop.f32.mrf.mxu0  ;;  %v4127_v7 = vsel %vm1945_vm14, %v4093_v23, -inf  ;;  %v4039_v52 = vmax.f32 %v4037_v8, %v4038_v51  ;;  %v8623_v4 = vrot.slane %v3991_v12, %v7767_v61  ;;  %v4121_v22 = vrot.slane %v4120_v6, 4 }
 0x773   :  { %v4028_v55 = vrot.slane %v4027_v46, 1  ;;  %v7159_v9 = vpop.f32.mrf.mxu1  ;;  %v4052_v10 = vrot.slane %v4051_v19, 4  ;;  %v4128_v11 = vrot.slane %v4127_v7, 4  ;;  %v4134_v36 = vsel %vm1945_vm14, %v4092_v32, -inf }
 0x774   :  { %v7145_v43 = vpop.f32.mrf.mxu0  ;;  %v4141_v13 = vsel %vm1945_vm14, %v4094_v5, -inf  ;;  %v8627_v17 = vmax.f32 %v4020_v25, %v4021_v15  ;;  %v4122_v48 = vmax.f32 %v4120_v6, %v4121_v22  ;;  %v4135_v28 = vrot.slane %v4134_v36, 4 }
 0x775   :  { %v4142_v14 = vrot.slane %v4141_v13, 4  ;;  %v8631_v8 = vpop.f32.mrf.mxu1  ;;  %v4035_v27 = vrot.slane %v4034_v34, 1  ;;  %v4047_v50 = vrot.slane %v4046_v20, 2  ;;  %v4129_v57 = vmax.f32 %v4127_v7, %v4128_v11 }
 0x776   :  { %v8629_v60 = vpop.f32.mrf.mxu0  ;;  %v4073_v44 = vmul.f32 %v8588_v62, %v3951_v59  ;;  %v4029_v24 = vmax.f32 %v4027_v46, %v4028_v55  ;;  %v4123_v12 = vrot.slane %v4122_v48, 2  ;;  %v4136_v45 = vmax.f32 %v4134_v36, %v4135_v28 }
 0x777   :  { %v8636_v42 = vadd.f32 %v8607_v29, %v8578_v31  ;;  %v7160_v21 = vpop.f32.mrf.mxu1  ;;  %v4130_v58 = vrot.slane %v4129_v57, 2  ;;  %v8638_v25 = vmax.f32 %v4141_v13, %v4142_v14  ;;  %v8642_v54 = vadd.f32 %v4392_v37, %v8583_v35 }
 0x778   :  { %v7146_v63 = vpop.f32.mrf.mxu0  ;;  %v4075_v41 = vadd.f32 %v8593_v40, %v4073_v44  ;;  %v4124_v51 = vmax.f32 %v4122_v48, %v4123_v12  ;;  %v4137_v53 = vrot.slane %v4136_v45, 2  ;;  %v8645_v62 = vadd.f32 %v4397_v26, %v8595_v1 }
 0x779   :  { %v4405_v47 = vpop.f32.mrf.mxu1  ;;  %v4007_v31 = vcombine.high %v8623_v4, %v8623_v4  ;;  %v4131_v29 = vmax.f32 %v4129_v57, %v4130_v58  ;;  %v4040_v59 = vrot.slane %v4039_v52, 2  ;;  %v4048_v46 = vmax.f32 %v4046_v20, %v4047_v50 }
 0x77a   :  { %v8647_v16 = vpop.f32.mrf.mxu0  ;;  %v4095_v32 = vcombine.high %v4075_v41, %v4075_v41  ;;  %v4102_v23 = vrot.slane %v4075_v41, %v7767_v61  ;;  %v4125_v40 = vrot.slane %v4124_v51, 1  ;;  %v8652_v15 = vmax.f32 %v4136_v45, %v4137_v53 }
 0x77b   :  { %v7163_v37 = vpop.f32.mrf.mxu1  ;;  %v4053_v5 = vmax.f32 %v4051_v19, %v4052_v10  ;;  %v4132_v1 = vrot.slane %v4131_v29, 1  ;;  %v4144_v55 = vrot.slane %v8638_v25, 2  ;;  %v4036_v11 = vmax.f32 %v4034_v34, %v4035_v27 }
 0x77c   :  { %v7149_v35 = vpop.f32.mrf.mxu0  ;;  %v8655_v26 = vrot.slane %v4095_v32, %v7767_v61  ;;  %v4110_v6 = vcombine.high %v4102_v23, %v4102_v23  ;;  %v4148_v7 = vsel %vm1945_vm14, %v4102_v23, -inf  ;;  %v4041_v36 = vmax.f32 %v4039_v52, %v4040_v59 }
 0x77d   :  { %v4149_v22 = vrot.slane %v4148_v7, 4  ;;  %v4407_v9 = vpop.f32.mrf.mxu1  ;;  %v8661_v13 = vmax.f32 %v4124_v51, %v4125_v40  ;;  %v4139_v20 = vrot.slane %v8652_v15, 1  ;;  %v4133_v48 = vmax.f32 %v4131_v29, %v4132_v1 }
 0x77e   :  { %v8659_v43 = vpop.f32.mrf.mxu0  ;;  %v4155_v19 = vsel %vm1945_vm14, %v4110_v6, -inf  ;;  %v4162_v10 = vsel %vm1945_vm14, %v8655_v26, -inf  ;;  %v4042_v50 = vrot.slane %v4041_v36, 1  ;;  %v4049_v12 = vrot.slane %v4048_v46, 1 }
 0x77f   :  { %v4150_v28 = vmax.f32 %v4148_v7, %v4149_v22  ;;  %v4156_v14 = vrot.slane %v4155_v19, 4  ;;  %v7164_v44 = vpop.f32.mrf.mxu1  ;;  %v4054_v45 = vrot.slane %v4053_v5, 2  ;;  %v4058_v34 = vsel %vm1945_vm14, %v8623_v4, -inf }
 0x780   :  { %v7150_v57 = vpop.f32.mrf.mxu0  ;;  %v4065_v52 = vsel %vm1945_vm14, %v4007_v31, -inf  ;;  %v4163_v63 = vrot.slane %v4162_v10, 4  ;;  %v4043_v21 = vmax.f32 %v4041_v36, %v4042_v50  ;;  %v4059_v58 = vrot.slane %v4058_v34, 4  ;;  %v8678_v31 = vld [vmem:[%s9129_s2 + $0x2] ss:$0 sm:$0xff]  ;;  %s7375_s2 = smov 16  }
 0x781   :  { %v4151_v27 = vrot.slane %v4150_v28, 2  ;;  %v8670_v41 = vpop.f32.mrf.mxu1  ;;  %v4050_v53 = vmax.f32 %v4048_v46, %v4049_v12  ;;  %v4055_v47 = vmax.f32 %v4053_v5, %v4054_v45  ;;  %v4066_v29 = vrot.slane %v4065_v52, 4 }
 0x782   :  { %v4495_v51 = vpop.f32.mrf.mxu0  ;;  %v4184_v32 = vsel %vm1230_vm7, %v4029_v24, %v8627_v17  ;;  %v4157_v59 = vmax.f32 %v4155_v19, %v4156_v14  ;;  %v4060_v40 = vmax.f32 %v4058_v34, %v4059_v58  ;;  %v4111_v17 = vcombine.high %v8655_v26, %v8655_v26 }
 0x783   :  { %v4152_v23 = vmax.f32 %v4150_v28, %v4151_v27  ;;  %v4185_v4 = vsel %vm1232_vm8, %v4036_v11, %v4184_v32  ;;  %v7167_v35 = vpop.f32.mrf.mxu1  ;;  %v4056_v1 = vrot.slane %v4055_v47, 1  ;;  %v4067_v6 = vmax.f32 %v4065_v52, %v4066_v29 }
 0x784   :  { %v7177_v37 = vpop.f32.mrf.mxu0  ;;  %v4186_v46 = vsel %vm1234_vm9, %v4043_v21, %v4185_v4  ;;  %v4532_v5 = vadd.f32 %v4495_v51, %v8636_v42  ;;  %v4061_v24 = vrot.slane %v4060_v40, 2  ;;  %v4145_v22 = vmax.f32 %v8638_v25, %v4144_v55 }
 0x785   :  { %v4187_v7 = vsel %vm1236_vm10, %v4050_v53, %v4186_v46  ;;  %v8686_v9 = vpop.f32.mrf.mxu1  ;;  %v4057_v36 = vmax.f32 %v4055_v47, %v4056_v1  ;;  %v4068_v19 = vrot.slane %v4067_v6, 2  ;;  %v4153_v14 = vrot.slane %v4152_v23, 1 }
 0x786   :  { %v4498_v11 = vpop.f32.mrf.mxu0  ;;  %v4548_v28 = vadd.f32 %v8678_v31, %v4532_v5  ;;  %v4062_v50 = vmax.f32 %v4060_v40, %v4061_v24  ;;  %v4146_v57 = vrot.slane %v4145_v22, 1  ;;  %v4158_v44 = vrot.slane %v4157_v59, 2 }
 0x787   :  { %v4164_v42 = vmax.f32 %v4162_v10, %v4163_v63  ;;  %v7168_v12 = vpop.f32.mrf.mxu1  ;;  %v4069_v26 = vmax.f32 %v4067_v6, %v4068_v19  ;;  %v4188_v34 = vsel %vm1238_vm11, %v4057_v36, %v4187_v7  ;;  %v4140_v25 = vmax.f32 %v8652_v15, %v4139_v20 }
 0x788   :  { %v7178_v45 = vpop.f32.mrf.mxu0  ;;  %v4556_v52 = vmax.f32 %v4548_v28, 0.0  ;;  %v4063_v55 = vrot.slane %v4062_v50, 1  ;;  %v4154_v27 = vmax.f32 %v4152_v23, %v4153_v14  ;;  %v4159_v21 = vmax.f32 %v4157_v59, %v4158_v44 }
 0x789   :  { %v4165_v58 = vrot.slane %v4164_v42, 2  ;;  %v8691_v51 = vpop.f32.mrf.mxu1  ;;  %v4070_v47 = vrot.slane %v4069_v26, 1  ;;  %v4147_v29 = vmax.f32 %v4145_v22, %v4146_v57  ;;  %v4169_v10 = vsel %vm1945_vm14, %v4111_v17, -inf }
 0x78a   :  { %v4503_v53 = vpop.f32.mrf.mxu0  ;;  %4564 = vst.msk [vmem:[#allocation2 + $0x8] sm:$0xff] %vm425_vm5, %v4556_v52  ;;  %v4199_v63 = vsel %vm1230_vm7, %v4133_v48, %v8661_v13  ;;  %v4064_v32 = vmax.f32 %v4062_v50, %v4063_v55  ;;  %v4160_v40 = vrot.slane %v4159_v21, 1  ;;  %v4170_v15 = vrot.slane %v4169_v10, 4 }
 0x78b   :  { %v4166_v4 = vmax.f32 %v4164_v42, %v4165_v58  ;;  %v7171_v20 = vpop.f32.mrf.mxu1  ;;  %v4401_v59 = vadd.f32 %v8631_v8, %v8599_v33  ;;  %v4071_v35 = vmax.f32 %v4069_v26, %v4070_v47  ;;  %v4200_v37 = vsel %vm1232_vm8, %v4140_v25, %v4199_v63 }
 0x78c   :  { %v7181_v23 = vpop.f32.mrf.mxu0  ;;  %v4533_v1 = vadd.f32 %v4498_v11, %v8642_v54  ;;  %v4189_v6 = vsel %vm1240_vm12, %v4064_v32, %v4188_v34  ;;  %v4161_v46 = vmax.f32 %v4159_v21, %v4160_v40  ;;  %v4171_v17 = vmax.f32 %v4169_v10, %v4170_v15  ;;  %v6491_v21 = vld [vmem:[%s9130_s3 + $0x20] sm:$0xf] }
 0x78d   :  { %v4167_v5 = vrot.slane %v4166_v4, 1  ;;  %v8702_v13 = vpop.f32.mrf.mxu1  ;;  %v4190_v24 = vsel %vm1242_vm13, %v4071_v35, %v4189_v6  ;;  %v4201_v7 = vsel %vm1234_vm9, %v4147_v29, %v4200_v37  ;;  %v4534_v33 = vadd.f32 %v4503_v53, %v8645_v62 }
 0x78e   :  { %v4506_v48 = vpop.f32.mrf.mxu0  ;;  %v4549_v22 = vadd.f32 %v8678_v31, %v4533_v1  ;;  %6260 = vrot.lane.b32.xlu0 %v4190_v24, %s7375_s2  ;;  %v4172_v8 = vrot.slane %v4171_v17, 2  ;;  %v4202_v54 = vsel %vm1236_vm10, %v4154_v27, %v4201_v7  ;;  %v4412_v53 = vadd.f32 %v8670_v41, %v8618_v56 }
 0x78f   :  { %v7172_v36 = vpop.f32.mrf.mxu1  ;;  %v4168_v19 = vmax.f32 %v4166_v4, %v4167_v5  ;;  %v4550_v14 = vadd.f32 %v8678_v31, %v4534_v33  ;;  %v4535_v50 = vadd.f32 %v4506_v48, %v4401_v59  ;;  %v4203_v44 = vsel %vm1238_vm11, %v4161_v46, %v4202_v54 }
 0x790   :  { %v7182_v11 = vpop.f32.mrf.mxu0  ;;  %v4557_v28 = vmax.f32 %v4549_v22, 0.0  ;;  %v4173_v57 = vmax.f32 %v4171_v17, %v4172_v8  ;;  %v4817_v15 = vsel %vm482_vm4, %v6491_v21, 0  ;;  %v4415_v59 = vadd.f32 %v8686_v9, %v8629_v60 }
 0x791   :  { %v4558_v12 = vmax.f32 %v4550_v14, 0.0  ;;  %v4551_v62 = vadd.f32 %v8678_v31, %v4535_v50  ;;  %v4204_v34 = vsel %vm1240_vm12, %v4168_v19, %v4203_v44  ;;  %v4589_v47 = vld [vmem:[#allocation2 + $0x8] sm:$0xff]  ;;  %v4420_v48 = vadd.f32 %v8691_v51, %v8647_v16 }
 0x792   :  { %v4511_v42 = vpop.f32.mrf.mxu0  ;;  %4565 = vst.msk [vmem:[#allocation2 + $0x10] sm:$0xff] %vm425_vm5, %v4557_v28  ;;  %v4174_v45 = vrot.slane %v4173_v57, 1  ;;  %v4572_v10 = vld [vmem:[#allocation2 + $0x7] sm:$0xff]  ;;  %v4423_v36 = vadd.f32 %v8702_v13, %v8659_v43  ;;  %v4594_v28 = vld [vmem:[#allocation2 + $0x30] sm:$0xff] }
 0x793   :  { %4566 = vst.msk [vmem:[#allocation2 + $0x18] sm:$0xff] %vm425_vm5, %v4558_v12  ;;  %v4559_v52 = vmax.f32 %v4551_v62, 0.0  ;;  %v4593_v19 = vld [vmem:[#allocation2 + $0x28] sm:$0xff] }
 0x794   :  { %v7185_v26 = vpop.f32.mrf.mxu0  ;;  %v4175_v25 = vmax.f32 %v4173_v57, %v4174_v45  ;;  %v4601_v44 = vpack.c.bf16 %v4594_v28, %v4593_v19 }
 0x795   :  { %4567 = vst.msk [vmem:[#allocation2 + $0x20] sm:$0xff] %vm425_vm5, %v4559_v52 }
 0x796   :  { %v4513_v55 = vpop.f32.mrf.mxu0  ;;  %v4205_v27 = vsel %vm1242_vm13, %v4175_v25, %v4204_v34 }
 0x797   :  { %6262 = vrot.lane.b32.xlu0 %v4205_v27, %s7375_s2 }
 0x798   :  { %v7186_v58 = vpop.f32.mrf.mxu0 }
 0x799   :  { %v4590_v29 = vld [vmem:[#allocation2 + $0x10] sm:$0xff] }
 0x79a   :  { %v4573_v63 = vld [vmem:[#allocation2 + $0xf] sm:$0xff]  ;;  %v4517_v32 = vpop.f32.mrf.mxu0  ;;  %v4599_v40 = vpack.c.bf16 %v4590_v29, %v4589_v47  ;;  %v4591_v35 = vld [vmem:[#allocation2 + $0x18] sm:$0xff] }
 0x79b   :  { %v4582_v4 = vpack.c.bf16 %v4573_v63, %v4572_v10  ;;  %v4536_v20 = vadd.f32 %v4517_v32, %v4412_v53  ;;  %v4574_v60 = vld [vmem:[#allocation2 + $0x17] sm:$0xff]  ;;  %v4784_v29 = vld [vmem:[#allocation2 + $0x9] sm:$0xff] }
 0x79c   :  { %v7189_v23 = vpop.f32.mrf.mxu0  ;;  %7198 = vmatmul.mubr.msk.bf16.vlgmr.msra.gmra.mxu1 %vm425_vm5, %v4599_v40  ;;  %v4592_v37 = vld [vmem:[#allocation2 + $0x20] sm:$0xff]  ;;  %v4785_v9 = vld [vmem:[#allocation2 + $0x11] sm:$0xff] }
 0x79d   :  { %7220 = vmatmul.mubr.msk.bf16.vlgmr.msra.gmra.mxu0 %vm425_vm5, %v4582_v4  ;;  %v4552_v56 = vadd.f32 %v8678_v31, %v4536_v20  ;;  %7240 = vmatpush3.bf16.msra.mxu1 %v4817_v15  ;;  %v4575_v1 = vld [vmem:[#allocation2 + $0x1f] sm:$0xff]  ;;  %v4600_v7 = vpack.c.bf16 %v4592_v37, %v4591_v35  ;;  %v4576_v43 = vld [vmem:[#allocation2 + $0x27] sm:$0xff]  ;;  %v4794_v10 = vpack.c.bf16 %v4785_v9, %v4784_v29 }
 0x79e   :  { %v4520_v41 = vpop.f32.mrf.mxu0  ;;  %7201 = vmatprep.mubr.msk.bf16.mxu1 %vm7373_vm3, %v7372_v2  ;;  %7223 = vmatprep.mubr.msk.bf16.mxu0 %vm7373_vm3, %v7372_v2  ;;  %v8732_v5 = vld [vmem:[#allocation2 + $0x19] sm:$0xff]  ;;  %v4583_v22 = vpack.c.bf16 %v4575_v1, %v4574_v60  ;;  %v4584_v12 = vpack.c.bf16 %v8536_v0, %v4576_v43  ;;  %v4787_v63 = vld [vmem:[#allocation2 + $0x21] sm:$0xff] }
 0x79f   :  { %v4560_v6 = vmax.f32 %v4552_v56, 0.0  ;;  %v4537_v46 = vadd.f32 %v4520_v41, %v4415_v59  ;;  %5418 = vst.msk [vmem:[#allocation2 + $0x18] sm:$0xff] %vm46_vm1, %v7372_v2  ;;  %v4795_v32 = vpack.c.bf16 %v4787_v63, %v8732_v5  ;;  %v6503_v41 = vld [vmem:[%s9134_s7 + $0x18] sm:$0xf] }
 0x7a0   :  { %v7190_v17 = vpop.f32.mrf.mxu0  ;;  %7328 = vmatprep.subr.msk.bf16.mxu1 %vm482_vm4, %v6503_v41 }
 0x7a1   :  { %4568 = vst.msk [vmem:[#allocation2 + $0x38] sm:$0xff] %vm425_vm5, %v4560_v6  ;;  %v4553_v24 = vadd.f32 %v8678_v31, %v4537_v46 }
 0x7a2   :  { %v4525_v33 = vpop.f32.mrf.mxu0 }
 0x7a3   :  { %v4561_v8 = vmax.f32 %v4553_v24, 0.0  ;;  %v4538_v54 = vadd.f32 %v4525_v33, %v4420_v48 }
 0x7a4   :  { %v7193_v11 = vpop.f32.mrf.mxu0  ;;  %7202 = vmatmul.mubr.msk.bf16.gmra.mxu1 %vm425_vm5, %v4600_v7 }
 0x7a5   :  { %4569 = vst.msk [vmem:[#allocation2 + $0x40] sm:$0xff] %vm425_vm5, %v4561_v8  ;;  %7224 = vmatmul.mubr.msk.bf16.gmra.mxu0 %vm425_vm5, %v4583_v22  ;;  %v4554_v16 = vadd.f32 %v8678_v31, %v4538_v54  ;;  %7205 = vmatprep.mubr.msk.bf16.mxu1 %vm7373_vm3, %v7372_v2  ;;  %v8800_v22 = vld [vmem:[%s9134_s7 + $0x20] sm:$0xf] }
 0x7a6   :  { %v4528_v51 = vpop.f32.mrf.mxu0  ;;  %7227 = vmatprep.mubr.msk.bf16.mxu0 %vm7373_vm3, %v7372_v2 }
 0x7a7   :  { %v4562_v14 = vmax.f32 %v4554_v16, 0.0  ;;  %v4539_v50 = vadd.f32 %v4528_v51, %v4423_v36 }
 0x7a8   :  { %v7194_v13 = vpop.f32.mrf.mxu0  ;;  %v4595_v26 = vld [vmem:[#allocation2 + $0x38] sm:$0xff] }
 0x7a9   :  { %4570 = vst.msk [vmem:[#allocation2 + $0x48] sm:$0xff] %vm425_vm5, %v4562_v14  ;;  %v4555_v57 = vadd.f32 %v8678_v31, %v4539_v50  ;;  %v4578_v31 = vld [vmem:[#allocation2 + $0x37] sm:$0xff] }
 0x7aa   :  { %v4789_v40 = vld [vmem:[#allocation2 + $0x31] sm:$0xff] }
 0x7ab   :  { %v4563_v42 = vmax.f32 %v4555_v57, 0.0  ;;  %v4796_v4 = vpack.c.bf16 %v4789_v40, %v8555_v3  ;;  %v6504_v3 = vld [vmem:[%s9134_s7 + $0x1c] sm:$0xf] }
 0x7ac   :  { %7206 = vmatmul.mubr.msk.bf16.gmra.mxu1 %vm425_vm5, %v4601_v44  ;;  %v4596_v62 = vld [vmem:[#allocation2 + $0x40] sm:$0xff]  ;;  %7327 = vmatprep.subr.msk.bf16.mxu0 %vm482_vm4, %v6504_v3  ;;  %v5458_v56 = vsel %vm482_vm4, %v6504_v3, 0 }
 0x7ad   :  { %4571 = vst.msk [vmem:[#allocation2 + $0x50] sm:$0xff] %vm425_vm5, %v4563_v42  ;;  %7228 = vmatmul.mubr.msk.bf16.gmra.mxu0 %vm425_vm5, %v4584_v12  ;;  %7209 = vmatprep.mubr.msk.bf16.mxu1 %vm7373_vm3, %v7372_v2  ;;  %v4579_v45 = vld [vmem:[#allocation2 + $0x3f] sm:$0xff]  ;;  %v4602_v34 = vpack.c.bf16 %v4596_v62, %v4595_v26 }
 0x7ae   :  { %7231 = vmatprep.mubr.msk.bf16.mxu0 %vm7373_vm3, %v7372_v2  ;;  %v4585_v52 = vpack.c.bf16 %v4579_v45, %v4578_v31  ;;  %v4790_v15 = vld [vmem:[#allocation2 + $0x39] sm:$0xff]  ;;  %7262 = vmatpush3.bf16.msra.mxu0 %v5458_v56  ;;  %v8822_v3 = vld [vmem:[%s9133_s6 + $0x2] ss:$0 sm:$0xff] }
 0x7af   :  { %7329 = vmatprep.subr.msk.bf16.mxu0 %vm482_vm4, %v8800_v22 }
 0x7b0   :  { %v4597_v25 = vld [vmem:[#allocation2 + $0x48] sm:$0xff] }
 0x7b1   :  { %v4580_v0 = vld [vmem:[#allocation2 + $0x47] sm:$0xff] }
 0x7b2   :  { %v4791_v27 = vld [vmem:[#allocation2 + $0x41] sm:$0xff] }
 0x7b3   :  { %v4797_v20 = vpack.c.bf16 %v4791_v27, %v4790_v15  ;;  %v8817_v15 = vld [vmem:[%s9132_s5 + $0x2] ss:$0 sm:$0xff] }
 0x7b4   :  { %v4581_v55 = vld [vmem:[#allocation2 + $0x4f] sm:$0xff]  ;;  %7210 = vmatmul.mubr.msk.bf16.gmra.mxu1 %vm425_vm5, %v4602_v34 }
 0x7b5   :  { %v4792_v21 = vld [vmem:[#allocation2 + $0x49] sm:$0xff]  ;;  %7232 = vmatmul.mubr.msk.bf16.gmra.mxu0 %vm425_vm5, %v4585_v52  ;;  %7213 = vmatprep.mubr.msk.bf16.mxu1 %vm7373_vm3, %v7372_v2  ;;  %v4586_v47 = vpack.c.bf16 %v4581_v55, %v4580_v0  ;;  %v4793_v23 = vld [vmem:[#allocation2 + $0x51] sm:$0xff] }
 0x7b6   :  { %5419 = vst.msk [vmem:[#allocation2 + $0x48] sm:$0xff] %vm46_vm1, %v7372_v2  ;;  %7235 = vmatprep.mubr.msk.bf16.mxu0 %vm7373_vm3, %v7372_v2  ;;  %v4598_v58 = vld [vmem:[#allocation2 + $0x50] sm:$0xff]  ;;  %v4798_v59 = vpack.c.bf16 %v4793_v23, %v4792_v21 }
 0x7b7   :  { %v4603_v53 = vpack.c.bf16 %v4598_v58, %v4597_v25 }
 0x7bc   :  { %7214 = vmatmul.mubr.msk.bf16.gmra.mxu1 %vm425_vm5, %v4603_v53 }
 0x7bd   :  { %7236 = vmatmul.mubr.msk.bf16.gmra.mxu0 %vm425_vm5, %v4586_v47  ;;  %7241 = vmatprep.mubr.msk.bf16.mxu1 %vm7373_vm3, %v7372_v2 }
 0x7c4   :  { %7242 = vmatmul.mubr.msk.bf16.vlgmr.msra.gmra.mxu1 %vm425_vm5, %v4794_v10  ;;  %v8811_v10 = vld [vmem:[%s9131_s4 + $0x2] ss:$0 sm:$0xff] }
 0x7c5   :  { %7245 = vmatprep.mubr.msk.bf16.mxu1 %vm7373_vm3, %v7372_v2 }
 0x7cc   :  { %7246 = vmatmul.mubr.msk.bf16.gmra.mxu1 %vm425_vm5, %v4795_v32 }
 0x7cd   :  { %7249 = vmatprep.mubr.msk.bf16.mxu1 %vm7373_vm3, %v7372_v2 }
 0x7d4   :  { %7250 = vmatmul.mubr.msk.bf16.gmra.mxu1 %vm425_vm5, %v4796_v4 }
 0x7d5   :  { %7253 = vmatprep.mubr.msk.bf16.mxu1 %vm7373_vm3, %v7372_v2 }
 0x7dc   :  { %7254 = vmatmul.mubr.msk.bf16.gmra.mxu1 %vm425_vm5, %v4797_v20 }
 0x7dd   :  { %7257 = vmatprep.mubr.msk.bf16.mxu1 %vm7373_vm3, %v7372_v2  ;;  %v5534_v2 = vsel %vm482_vm4, %v6503_v41, 0 }
 0x7de   :  { %7272 = vmatpush3.bf16.msra.mxu1 %v5534_v2 }
 0x7e4   :  { %7258 = vmatmul.mubr.msk.bf16.gmra.mxu1 %vm425_vm5, %v4798_v59 }
 0x85c   :  { %v4658_v35 = vpop.f32.mrf.mxu1 }
 0x85d   :  { %v4747_v37 = vpop.f32.mrf.mxu0 }
 0x85e   :  { %v7199_v1 = vpop.f32.mrf.mxu1  ;;  %v4748_v47 = vadd.f32 %v4747_v37, %v4658_v35  ;;  %v5428_v37 = vld [vmem:[#allocation2 + $0x20] sm:$0xff] }
 0x85f   :  { %v7221_v6 = vpop.f32.mrf.mxu0  ;;  %v5429_v1 = vld [vmem:[#allocation2 + $0x28] sm:$0xff] }
 0x860   :  { %v4661_v46 = vpop.f32.mrf.mxu1 }
 0x861   :  { %v4750_v60 = vpop.f32.mrf.mxu0 }
 0x862   :  { %v7200_v9 = vpop.f32.mrf.mxu1  ;;  %v4751_v40 = vadd.f32 %v4750_v60, %v4661_v46 }
 0x863   :  { %v7222_v5 = vpop.f32.mrf.mxu0 }
 0x864   :  { %v4666_v17 = vpop.f32.mrf.mxu1  ;;  %v8827_v5 = vld [vmem:[#allocation2 + $0x18] sm:$0xff] }
 0x865   :  { %v4755_v48 = vpop.f32.mrf.mxu0 }
 0x866   :  { %v7203_v24 = vpop.f32.mrf.mxu1  ;;  %v4756_v41 = vadd.f32 %v4755_v48, %v4666_v17 }
 0x867   :  { %v7225_v7 = vpop.f32.mrf.mxu0 }
 0x868   :  { %v4669_v33 = vpop.f32.mrf.mxu1  ;;  %v8829_v7 = vpack.c.bf16 %v5429_v1, %v5428_v37 }
 0x869   :  { %v4758_v8 = vpop.f32.mrf.mxu0 }
 0x86a   :  { %v7204_v54 = vpop.f32.mrf.mxu1 }
 0x86b   :  { %v7226_v11 = vpop.f32.mrf.mxu0 }
 0x86c   :  { %v4674_v36 = vpop.f32.mrf.mxu1 }
 0x86d   :  { %v4763_v16 = vpop.f32.mrf.mxu0  ;;  %v8834_v36 = vld [vmem:[#allocation2 + $0x30] sm:$0xff] }
 0x86e   :  { %v7207_v51 = vpop.f32.mrf.mxu1  ;;  %v4759_v16 = vadd.f32 %v4758_v8, %v4669_v33 }
 0x86f   :  { %v7229_v19 = vpop.f32.mrf.mxu0 }
 0x870   :  { %v4676_v28 = vpop.f32.mrf.mxu1 }
 0x871   :  { %v4765_v14 = vpop.f32.mrf.mxu0  ;;  %v8839_v28 = vpack.c.bf16 %v5428_v37, %v8827_v5 }
 0x872   :  { %v7208_v50 = vpop.f32.mrf.mxu1  ;;  %v8842_v14 = vpack.c.bf16 %v8834_v36, %v5429_v1 }
 0x873   :  { %v7230_v43 = vpop.f32.mrf.mxu0 }
 0x874   :  { %v4680_v13 = vpop.f32.mrf.mxu1 }
 0x875   :  { %v4769_v57 = vpop.f32.mrf.mxu0 }
 0x876   :  { %v7211_v44 = vpop.f32.mrf.mxu1  ;;  %v8836_v51 = vadd.f32 %v4769_v57, %v4680_v13 }
 0x877   :  { %v7233_v42 = vpop.f32.mrf.mxu0 }
 0x878   :  { %v4683_v12 = vpop.f32.mrf.mxu1 }
 0x879   :  { %v4772_v62 = vpop.f32.mrf.mxu0 }
 0x87a   :  { %v7212_v45 = vpop.f32.mrf.mxu1 }
 0x87b   :  { %v7234_v26 = vpop.f32.mrf.mxu0  ;;  %v8847_v45 = vadd.f32 %v4772_v62, %v4683_v12 }
 0x87c   :  { %v4688_v31 = vpop.f32.mrf.mxu1 }
 0x87d   :  { %v4777_v34 = vpop.f32.mrf.mxu0 }
 0x87e   :  { %v8804_v52 = vadd.f32 %v4777_v34, %v4688_v31  ;;  %v7215_v25 = vpop.f32.mrf.mxu1 }
 0x87f   :  { %v7237_v0 = vpop.f32.mrf.mxu0 }
 0x880   :  { %v4691_v55 = vpop.f32.mrf.mxu1 }
 0x881   :  { %v4780_v27 = vpop.f32.mrf.mxu0 }
 0x882   :  { %v8806_v21 = vadd.f32 %v4780_v27, %v4691_v55  ;;  %v7216_v58 = vpop.f32.mrf.mxu1 }
 0x883   :  { %v7238_v53 = vpop.f32.mrf.mxu0 }
 0x884   :  { %v4853_v29 = vpop.f32.mrf.mxu1 }
 0x885   :  { %v4890_v63 = vadd.f32 %v4853_v29, %v4748_v47 }
 0x886   :  { %v7243_v32 = vpop.f32.mrf.mxu1 }
 0x887   :  { %v4906_v4 = vadd.f32 %v8811_v10, %v4890_v63 }
 0x888   :  { %v4856_v20 = vpop.f32.mrf.mxu1 }
 0x889   :  { %v4914_v23 = vmax.f32 %v4906_v4, 0.0  ;;  %v4891_v59 = vadd.f32 %v4856_v20, %v4751_v40 }
 0x88a   :  { %v7244_v56 = vpop.f32.mrf.mxu1 }
 0x88b   :  { %v4932_v2 = vmul.f32 %v8817_v15, %v4914_v23  ;;  %v4907_v35 = vadd.f32 %v8811_v10, %v4891_v59 }
 0x88c   :  { %v4861_v6 = vpop.f32.mrf.mxu1 }
 0x88d   :  { %v4942_v46 = vadd.f32 %v8822_v3, %v4932_v2  ;;  %v4915_v60 = vmax.f32 %v4907_v35, 0.0  ;;  %v4892_v9 = vadd.f32 %v4861_v6, %v4756_v41 }
 0x88e   :  { %v7247_v24 = vpop.f32.mrf.mxu1 }
 0x88f   :  { %v4950_v54 = vcombine.high %v4942_v46, %v4942_v46  ;;  %v4957_v11 = vrot.slane %v4942_v46, %v7767_v61  ;;  %v4933_v17 = vmul.f32 %v8817_v15, %v4915_v60  ;;  %v4908_v48 = vadd.f32 %v8811_v10, %v4892_v9 }
 0x890   :  { %v4864_v19 = vpop.f32.mrf.mxu1 }
 0x891   :  { %v4964_v50 = vrot.slane %v4950_v54, %v7767_v61  ;;  %v4965_v43 = vcombine.high %v4957_v11, %v4957_v11  ;;  %v5034_v44 = vsel %vm893_vm6, %v4957_v11, -inf  ;;  %v4943_v42 = vadd.f32 %v8822_v3, %v4933_v17 }
 0x892   :  { %v5035_v26 = vrot.slane %v5034_v44, 4  ;;  %v4916_v33 = vmax.f32 %v4908_v48, 0.0  ;;  %v4893_v8 = vadd.f32 %v4864_v19, %v4759_v16  ;;  %v7248_v13 = vpop.f32.mrf.mxu1 }
 0x893   :  { %v4966_v57 = vcombine.high %v4964_v50, %v4964_v50  ;;  %v5041_v31 = vsel %vm893_vm6, %v4965_v43, -inf  ;;  %v5048_v34 = vsel %vm893_vm6, %v4964_v50, -inf  ;;  %v4967_v25 = vcombine.high %v4943_v42, %v4943_v42 }
 0x894   :  { %v5036_v0 = vmax.f32 %v5034_v44, %v5035_v26  ;;  %v5042_v55 = vrot.slane %v5041_v31, 4  ;;  %v5049_v27 = vrot.slane %v5048_v34, 4  ;;  %v4974_v58 = vrot.slane %v4943_v42, %v7767_v61  ;;  %v4869_v53 = vpop.f32.mrf.mxu1 }
 0x895   :  { %v5055_v47 = vsel %vm893_vm6, %v4966_v57, -inf  ;;  %v4981_v12 = vrot.slane %v4967_v25, %v7767_v61  ;;  %v4934_v62 = vmul.f32 %v8817_v15, %v4916_v33  ;;  %v8856_v29 = vadd.f32 %v8811_v10, %v4893_v8 }
 0x896   :  { %v5037_v63 = vrot.slane %v5036_v0, 2  ;;  %v5043_v32 = vmax.f32 %v5041_v31, %v5042_v55  ;;  %v5050_v40 = vmax.f32 %v5048_v34, %v5049_v27  ;;  %v5056_v4 = vrot.slane %v5055_v47, 4  ;;  %v7251_v20 = vpop.f32.mrf.mxu1 }
 0x897   :  { %v4982_v23 = vcombine.high %v4974_v58, %v4974_v58  ;;  %v4983_v59 = vcombine.high %v4981_v12, %v4981_v12  ;;  %v5062_v56 = vsel %vm893_vm6, %v4974_v58, -inf  ;;  %v5076_v41 = vsel %vm893_vm6, %v4981_v12, -inf }
 0x898   :  { %v5038_v2 = vmax.f32 %v5036_v0, %v5037_v63  ;;  %v5044_v35 = vrot.slane %v5043_v32, 2  ;;  %v5051_v37 = vrot.slane %v5050_v40, 2  ;;  %v5057_v1 = vmax.f32 %v5055_v47, %v5056_v4  ;;  %v4871_v6 = vpop.f32.mrf.mxu1 }
 0x899   :  { %v5063_v46 = vrot.slane %v5062_v56, 4  ;;  %v5069_v60 = vsel %vm893_vm6, %v4982_v23, -inf  ;;  %v5077_v9 = vrot.slane %v5076_v41, 4  ;;  %v5083_v24 = vsel %vm893_vm6, %v4983_v59, -inf }
 0x89a   :  { %v5039_v54 = vrot.slane %v5038_v2, 1  ;;  %v5045_v11 = vmax.f32 %v5043_v32, %v5044_v35  ;;  %v5052_v17 = vmax.f32 %v5050_v40, %v5051_v37  ;;  %v5058_v48 = vrot.slane %v5057_v1, 2  ;;  %v7252_v16 = vpop.f32.mrf.mxu1 }
 0x89b   :  { %v5064_v19 = vmax.f32 %v5062_v56, %v5063_v46  ;;  %v5070_v50 = vrot.slane %v5069_v60, 4  ;;  %v5078_v43 = vmax.f32 %v5076_v41, %v5077_v9  ;;  %v5084_v44 = vrot.slane %v5083_v24, 4 }
 0x89c   :  { %v5040_v42 = vmax.f32 %v5038_v2, %v5039_v54  ;;  %v5046_v26 = vrot.slane %v5045_v11, 1  ;;  %v5053_v33 = vrot.slane %v5052_v17, 1  ;;  %v5059_v8 = vmax.f32 %v5057_v1, %v5058_v48  ;;  %v4875_v13 = vpop.f32.mrf.mxu1 }
 0x89d   :  { %v5065_v57 = vrot.slane %v5064_v19, 2  ;;  %v5071_v31 = vmax.f32 %v5069_v60, %v5070_v50  ;;  %v5079_v34 = vrot.slane %v5078_v43, 2  ;;  %v5085_v25 = vmax.f32 %v5083_v24, %v5084_v44 }
 0x89e   :  { %v5047_v0 = vmax.f32 %v5045_v11, %v5046_v26  ;;  %v5054_v55 = vmax.f32 %v5052_v17, %v5053_v33  ;;  %v5060_v27 = vrot.slane %v5059_v8, 1  ;;  %v4944_v58 = vadd.f32 %v8822_v3, %v4934_v62  ;;  %v7255_v53 = vpop.f32.mrf.mxu1 }
 0x89f   :  { %v5066_v47 = vmax.f32 %v5064_v19, %v5065_v57  ;;  %v5072_v12 = vrot.slane %v5071_v31, 2  ;;  %v5080_v63 = vmax.f32 %v5078_v43, %v5079_v34  ;;  %v5086_v32 = vrot.slane %v5085_v25, 2 }
 0x8a0   :  { %v5061_v40 = vmax.f32 %v5059_v8, %v5060_v27  ;;  %v5370_v4 = vsel %vm1230_vm7, %v5047_v0, %v5040_v42  ;;  %v4984_v20 = vcombine.high %v4944_v58, %v4944_v58  ;;  %v4991_v23 = vrot.slane %v4944_v58, %v7767_v61  ;;  %v4878_v59 = vpop.f32.mrf.mxu1 }
 0x8a1   :  { %v5371_v56 = vsel %vm1232_vm8, %v5054_v55, %v5370_v4  ;;  %v5067_v41 = vrot.slane %v5066_v47, 1  ;;  %v5073_v2 = vmax.f32 %v5071_v31, %v5072_v12  ;;  %v5081_v35 = vrot.slane %v5080_v63, 1 }
 0x8a2   :  { %v5087_v37 = vmax.f32 %v5085_v25, %v5086_v32  ;;  %v5372_v62 = vsel %vm1234_vm9, %v5061_v40, %v5371_v56  ;;  %v4998_v1 = vrot.slane %v4984_v20, %v7767_v61  ;;  %v4999_v6 = vcombine.high %v4991_v23, %v4991_v23  ;;  %v7256_v46 = vpop.f32.mrf.mxu1 }
 0x8a3   :  { %v5068_v60 = vmax.f32 %v5066_v47, %v5067_v41  ;;  %v5074_v9 = vrot.slane %v5073_v2, 1  ;;  %v5082_v24 = vmax.f32 %v5080_v63, %v5081_v35  ;;  %v5090_v54 = vsel %vm893_vm6, %v4991_v23, -inf }
 0x8a4   :  { %v5088_v11 = vrot.slane %v5087_v37, 1  ;;  %v5000_v17 = vcombine.high %v4998_v1, %v4998_v1  ;;  %v5091_v48 = vrot.slane %v5090_v54, 4  ;;  %v5097_v16 = vsel %vm893_vm6, %v4999_v6, -inf  ;;  %v8870_v19 = vpop.f32.mrf.mxu1 }
 0x8a5   :  { %v5075_v50 = vmax.f32 %v5073_v2, %v5074_v9  ;;  %v5373_v43 = vsel %vm1236_vm10, %v5068_v60, %v5372_v62  ;;  %v5098_v44 = vrot.slane %v5097_v16, 4  ;;  %v5104_v42 = vsel %vm893_vm6, %v4998_v1, -inf }
 0x8a6   :  { %v5089_v26 = vmax.f32 %v5087_v37, %v5088_v11  ;;  %v5092_v33 = vmax.f32 %v5090_v54, %v5091_v48  ;;  %v5105_v8 = vrot.slane %v5104_v42, 4  ;;  %v5111_v57 = vsel %vm893_vm6, %v5000_v17, -inf  ;;  %v7259_v31 = vpop.f32.mrf.mxu1 }
 0x8a7   :  { %v5374_v34 = vsel %vm1238_vm11, %v5075_v50, %v5373_v43  ;;  %v5099_v25 = vmax.f32 %v5097_v16, %v5098_v44  ;;  %v5112_v0 = vrot.slane %v5111_v57, 4  ;;  %v4917_v55 = vmax.f32 %v8856_v29, 0.0 }
 0x8a8   :  { %v5375_v27 = vsel %vm1240_vm12, %v5082_v24, %v5374_v34  ;;  %v5093_v58 = vrot.slane %v5092_v33, 2  ;;  %v5106_v53 = vmax.f32 %v5104_v42, %v5105_v8  ;;  %v4894_v47 = vadd.f32 %v4875_v13, %v8836_v51  ;;  %v8879_v12 = vpop.f32.mrf.mxu1 }
 0x8a9   :  { %v5376_v63 = vsel %vm1242_vm13, %v5089_v26, %v5375_v27  ;;  %v5100_v32 = vrot.slane %v5099_v25, 2  ;;  %v5113_v40 = vmax.f32 %v5111_v57, %v5112_v0  ;;  %v4935_v4 = vmul.f32 %v8817_v15, %v4917_v55 }
 0x8aa   :  { %5420 = vst.msk [vmem:[#allocation2 + $0x8] sm:$0xff] %vm425_vm5, %v5376_v63  ;;  %v5094_v20 = vmax.f32 %v5092_v33, %v5093_v58  ;;  %v5107_v23 = vrot.slane %v5106_v53, 2  ;;  %v4910_v29 = vadd.f32 %v8811_v10, %v4894_v47  ;;  %v4895_v56 = vadd.f32 %v4878_v59, %v8847_v45  ;;  %v7260_v41 = vpop.f32.mrf.mxu1 }
 0x8ab   :  { %v5101_v2 = vmax.f32 %v5099_v25, %v5100_v32  ;;  %v5114_v35 = vrot.slane %v5113_v40, 2  ;;  %v4945_v51 = vadd.f32 %v8822_v3, %v4935_v4  ;;  %v8889_v13 = vsel %vm482_vm4, %v8800_v22, 0 }
 0x8ac   :  { %v5095_v37 = vrot.slane %v5094_v20, 1  ;;  %v5108_v62 = vmax.f32 %v5106_v53, %v5107_v23  ;;  %v4918_v1 = vmax.f32 %v4910_v29, 0.0  ;;  %v4911_v6 = vadd.f32 %v8811_v10, %v4895_v56 }
 0x8ad   :  { %v5102_v46 = vrot.slane %v5101_v2, 1  ;;  %v5115_v60 = vmax.f32 %v5113_v40, %v5114_v35  ;;  %v5001_v9 = vcombine.high %v4945_v51, %v4945_v51  ;;  %v5008_v24 = vrot.slane %v4945_v51, %v7767_v61 }
 0x8ae   :  { %v5096_v45 = vmax.f32 %v5094_v20, %v5095_v37  ;;  %v5109_v59 = vrot.slane %v5108_v62, 1  ;;  %v5146_v54 = vmul.f32 %v8817_v15, %v4918_v1  ;;  %v4919_v11 = vmax.f32 %v4911_v6, 0.0 }
 0x8af   :  { %v5103_v17 = vmax.f32 %v5101_v2, %v5102_v46  ;;  %v5116_v48 = vrot.slane %v5115_v60, 1  ;;  %v5015_v22 = vrot.slane %v5001_v9, %v7767_v61  ;;  %v5016_v16 = vcombine.high %v5008_v24, %v5008_v24 }
 0x8b0   :  { %v5110_v50 = vmax.f32 %v5108_v62, %v5109_v59  ;;  %v5118_v43 = vsel %vm893_vm6, %v5008_v24, -inf  ;;  %v5150_v44 = vadd.f32 %v8822_v3, %v5146_v54  ;;  %v5147_v42 = vmul.f32 %v8817_v15, %v4919_v11 }
 0x8b1   :  { %v5117_v26 = vmax.f32 %v5115_v60, %v5116_v48  ;;  %v5377_v33 = vsel %vm1230_vm7, %v5103_v17, %v5096_v45  ;;  %v5017_v8 = vcombine.high %v5015_v22, %v5015_v22  ;;  %v5119_v57 = vrot.slane %v5118_v43, 4 }
 0x8b2   :  { %v5378_v31 = vsel %vm1232_vm8, %v5110_v50, %v5377_v33  ;;  %v5125_v34 = vsel %vm893_vm6, %v5016_v16, -inf  ;;  %v5132_v25 = vsel %vm893_vm6, %v5015_v22, -inf  ;;  %v5158_v0 = vcombine.high %v5150_v44, %v5150_v44 }
 0x8b3   :  { %v5120_v55 = vmax.f32 %v5118_v43, %v5119_v57  ;;  %v5126_v27 = vrot.slane %v5125_v34, 4  ;;  %v5133_v58 = vrot.slane %v5132_v25, 4  ;;  %v5139_v53 = vsel %vm893_vm6, %v5017_v8, -inf }
 0x8b4   :  { %v5140_v47 = vrot.slane %v5139_v53, 4  ;;  %v5379_v63 = vsel %vm1234_vm9, %v5117_v26, %v5378_v31  ;;  %v5165_v32 = vrot.slane %v5150_v44, %v7767_v61  ;;  %v5172_v40 = vrot.slane %v5158_v0, %v7767_v61 }
 0x8b5   :  { %v5121_v4 = vrot.slane %v5120_v55, 2  ;;  %v5127_v20 = vmax.f32 %v5125_v34, %v5126_v27  ;;  %v5134_v23 = vmax.f32 %v5132_v25, %v5133_v58  ;;  %v5151_v29 = vadd.f32 %v8822_v3, %v5147_v42 }
 0x8b6   :  { %v5141_v56 = vmax.f32 %v5139_v53, %v5140_v47  ;;  %v5173_v41 = vcombine.high %v5165_v32, %v5165_v32  ;;  %v5174_v2 = vcombine.high %v5172_v40, %v5172_v40  ;;  %v5242_v35 = vsel %vm893_vm6, %v5165_v32, -inf }
 0x8b7   :  { %v5122_v51 = vmax.f32 %v5120_v55, %v5121_v4  ;;  %v5128_v37 = vrot.slane %v5127_v20, 2  ;;  %v5135_v62 = vrot.slane %v5134_v23, 2  ;;  %v5243_v1 = vrot.slane %v5242_v35, 4 }
 0x8b8   :  { %v5142_v6 = vrot.slane %v5141_v56, 2  ;;  %v5249_v46 = vsel %vm893_vm6, %v5173_v41, -inf  ;;  %v5256_v60 = vsel %vm893_vm6, %v5172_v40, -inf  ;;  %v5263_v9 = vsel %vm893_vm6, %v5174_v2, -inf }
 0x8b9   :  { %v5123_v24 = vrot.slane %v5122_v51, 1  ;;  %v5129_v45 = vmax.f32 %v5127_v20, %v5128_v37  ;;  %v5136_v59 = vmax.f32 %v5134_v23, %v5135_v62  ;;  %v5244_v54 = vmax.f32 %v5242_v35, %v5243_v1 }
 0x8ba   :  { %v5143_v11 = vmax.f32 %v5141_v56, %v5142_v6  ;;  %v5250_v17 = vrot.slane %v5249_v46, 4  ;;  %v5257_v48 = vrot.slane %v5256_v60, 4  ;;  %v5264_v22 = vrot.slane %v5263_v9, 4 }
 0x8bb   :  { %v5124_v16 = vmax.f32 %v5122_v51, %v5123_v24  ;;  %v5130_v50 = vrot.slane %v5129_v45, 1  ;;  %v5137_v43 = vrot.slane %v5136_v59, 1  ;;  %v5245_v44 = vrot.slane %v5244_v54, 2 }
 0x8bc   :  { %v5144_v42 = vrot.slane %v5143_v11, 1  ;;  %v5251_v26 = vmax.f32 %v5249_v46, %v5250_v17  ;;  %v5258_v33 = vmax.f32 %v5256_v60, %v5257_v48  ;;  %v5265_v8 = vmax.f32 %v5263_v9, %v5264_v22 }
 0x8bd   :  { %v5131_v57 = vmax.f32 %v5129_v45, %v5130_v50  ;;  %v5138_v31 = vmax.f32 %v5136_v59, %v5137_v43  ;;  %v5380_v34 = vsel %vm1236_vm10, %v5124_v16, %v5379_v63  ;;  %v5246_v25 = vmax.f32 %v5244_v54, %v5245_v44  ;;  %v8928_v50 = vld [vmem:[#allocation2] sm:$0xff]  ;;  %v5425_v43 = vld [vmem:[#allocation2 + $0x8] sm:$0xff] }
 0x8be   :  { %v5145_v0 = vmax.f32 %v5143_v11, %v5144_v42  ;;  %v5252_v55 = vrot.slane %v5251_v26, 2  ;;  %v5259_v27 = vrot.slane %v5258_v33, 2  ;;  %v5266_v58 = vrot.slane %v5265_v8, 2 }
 0x8bf   :  { %v5381_v53 = vsel %vm1238_vm11, %v5131_v57, %v5380_v34  ;;  %v5247_v47 = vrot.slane %v5246_v25, 1  ;;  %v5175_v32 = vcombine.high %v5151_v29, %v5151_v29  ;;  %v5182_v40 = vrot.slane %v5151_v29, %v7767_v61 }
 0x8c0   :  { %v5382_v4 = vsel %vm1240_vm12, %v5138_v31, %v5381_v53  ;;  %v5253_v20 = vmax.f32 %v5251_v26, %v5252_v55  ;;  %v5260_v23 = vmax.f32 %v5258_v33, %v5259_v27  ;;  %v5267_v56 = vmax.f32 %v5265_v8, %v5266_v58 }
 0x8c1   :  { %v5383_v41 = vsel %vm1242_vm13, %v5145_v0, %v5382_v4  ;;  %v5189_v63 = vrot.slane %v5175_v32, %v7767_v61  ;;  %v5190_v2 = vcombine.high %v5182_v40, %v5182_v40  ;;  %v4896_v35 = vadd.f32 %v8870_v19, %v8804_v52 }
 0x8c2   :  { %5421 = vst.msk [vmem:[#allocation2 + $0x10] sm:$0xff] %vm425_vm5, %v5383_v41  ;;  %v5254_v51 = vrot.slane %v5253_v20, 1  ;;  %v5261_v37 = vrot.slane %v5260_v23, 1  ;;  %v5268_v62 = vrot.slane %v5267_v56, 1  ;;  %v5270_v29 = vsel %vm893_vm6, %v5182_v40, -inf }
 0x8c3   :  { %v5191_v1 = vcombine.high %v5189_v63, %v5189_v63  ;;  %v5271_v6 = vrot.slane %v5270_v29, 4  ;;  %v5277_v46 = vsel %vm893_vm6, %v5190_v2, -inf  ;;  %v5284_v60 = vsel %vm893_vm6, %v5189_v63, -inf }
 0x8c4   :  { %v5248_v9 = vmax.f32 %v5246_v25, %v5247_v47  ;;  %v5255_v24 = vmax.f32 %v5253_v20, %v5254_v51  ;;  %v5262_v45 = vmax.f32 %v5260_v23, %v5261_v37  ;;  %v5278_v59 = vrot.slane %v5277_v46, 4 }
 0x8c5   :  { %v5272_v54 = vmax.f32 %v5270_v29, %v5271_v6  ;;  %v5285_v11 = vrot.slane %v5284_v60, 4  ;;  %v5291_v52 = vsel %vm893_vm6, %v5191_v1, -inf  ;;  %v4912_v19 = vadd.f32 %v8811_v10, %v4896_v35 }
 0x8c6   :  { %v5402_v17 = vsel %vm1230_vm7, %v5255_v24, %v5248_v9  ;;  %v5279_v48 = vmax.f32 %v5277_v46, %v5278_v59  ;;  %v5292_v22 = vrot.slane %v5291_v52, 4  ;;  %v4897_v16 = vadd.f32 %v8879_v12, %v8806_v21 }
 0x8c7   :  { %v5269_v44 = vmax.f32 %v5267_v56, %v5268_v62  ;;  %v5273_v42 = vrot.slane %v5272_v54, 2  ;;  %v5286_v26 = vmax.f32 %v5284_v60, %v5285_v11  ;;  %v4920_v33 = vmax.f32 %v4912_v19, 0.0 }
 0x8c8   :  { %v5403_v8 = vsel %vm1232_vm8, %v5262_v45, %v5402_v17  ;;  %v5280_v57 = vrot.slane %v5279_v48, 2  ;;  %v5293_v31 = vmax.f32 %v5291_v52, %v5292_v22  ;;  %v4913_v34 = vadd.f32 %v8811_v10, %v4897_v16 }
 0x8c9   :  { %v5274_v25 = vmax.f32 %v5272_v54, %v5273_v42  ;;  %v5287_v0 = vrot.slane %v5286_v26, 2  ;;  %v5148_v55 = vmul.f32 %v8817_v15, %v4920_v33  ;;  %v5432_v27 = vpack.c.bf16 %v5425_v43, %v8928_v50  ;;  %v5426_v21 = vld [vmem:[#allocation2 + $0x10] sm:$0xff] }
 0x8ca   :  { %v5281_v12 = vmax.f32 %v5279_v48, %v5280_v57  ;;  %v5294_v58 = vrot.slane %v5293_v31, 2  ;;  %v4921_v53 = vmax.f32 %v4913_v34, 0.0  ;;  %v8935_v47 = vpack.c.bf16 %v8827_v5, %v5426_v21 }
 0x8cb   :  { %v5275_v32 = vrot.slane %v5274_v25, 1  ;;  %v5288_v40 = vmax.f32 %v5286_v26, %v5287_v0  ;;  %v5152_v4 = vadd.f32 %v8822_v3, %v5148_v55  ;;  %7273 = vmatprep.mubr.msk.bf16.mxu1 %vm425_vm5, %v5432_v27  ;;  %v5439_v10 = vpack.c.bf16 %v5426_v21, %v5425_v43 }
 0x8cc   :  { %v5282_v20 = vrot.slane %v5281_v12, 1  ;;  %v5295_v23 = vmax.f32 %v5293_v31, %v5294_v58  ;;  %v5404_v56 = vsel %vm1234_vm9, %v5269_v44, %v5403_v8  ;;  %v5149_v41 = vmul.f32 %v8817_v15, %v4921_v53  ;;  %7274 = vmatmul.mubr.msk.bf16.vlgmr.msra.gmra.mxu1 %vm425_vm5, %v8935_v47 }
 0x8cd   :  { %v5276_v63 = vmax.f32 %v5274_v25, %v5275_v32  ;;  %v5289_v2 = vrot.slane %v5288_v40, 1  ;;  %v5192_v35 = vcombine.high %v5152_v4, %v5152_v4  ;;  %v5199_v51 = vrot.slane %v5152_v4, %v7767_v61  ;;  %7263 = vmatprep.mubr.msk.bf16.mxu0 %vm425_vm5, %v5439_v10  ;;  %7277 = vmatprep.mubr.msk.bf16.mxu1 %vm425_vm5, %v8829_v7 }
 0x8ce   :  { %v5283_v37 = vmax.f32 %v5281_v12, %v5282_v20  ;;  %v5296_v62 = vrot.slane %v5295_v23, 1  ;;  %v5153_v29 = vadd.f32 %v8822_v3, %v5149_v41  ;;  %7264 = vmatmul.mubr.msk.bf16.vlgmr.msra.gmra.mxu0 %vm425_vm5, %v8839_v28 }
 0x8cf   :  { %v5290_v15 = vmax.f32 %v5288_v40, %v5289_v2  ;;  %v5405_v1 = vsel %vm1236_vm10, %v5276_v63, %v5404_v56  ;;  %v5206_v6 = vrot.slane %v5192_v35, %v7767_v61  ;;  %v5207_v46 = vcombine.high %v5199_v51, %v5199_v51  ;;  %7282 = vmatpush3.bf16.msra.mxu0 %v8889_v13 }
 0x8d0   :  { %v5297_v60 = vmax.f32 %v5295_v23, %v5296_v62  ;;  %v5406_v9 = vsel %vm1238_vm11, %v5283_v37, %v5405_v1  ;;  %v5298_v24 = vsel %vm893_vm6, %v5199_v51, -inf  ;;  %v5209_v45 = vcombine.high %v5153_v29, %v5153_v29  ;;  %7267 = vmatprep.mubr.msk.bf16.mxu0 %vm425_vm5, %v8842_v14 }
 0x8d1   :  { %v5407_v3 = vsel %vm1240_vm12, %v5290_v15, %v5406_v9  ;;  %v5208_v59 = vcombine.high %v5206_v6, %v5206_v6  ;;  %v5299_v54 = vrot.slane %v5298_v24, 4  ;;  %v5305_v11 = vsel %vm893_vm6, %v5207_v46, -inf }
 0x8d2   :  { %v5408_v52 = vsel %vm1242_vm13, %v5297_v60, %v5407_v3  ;;  %v5306_v19 = vrot.slane %v5305_v11, 4  ;;  %v5312_v13 = vsel %vm893_vm6, %v5206_v6, -inf  ;;  %v5216_v17 = vrot.slane %v5153_v29, %v7767_v61 }
 0x8d3   :  { %5422 = vst.msk [vmem:[#allocation2 + $0x38] sm:$0xff] %vm425_vm5, %v5408_v52  ;;  %v5300_v48 = vmax.f32 %v5298_v24, %v5299_v54  ;;  %v5313_v22 = vrot.slane %v5312_v13, 4  ;;  %v5319_v16 = vsel %vm893_vm6, %v5208_v59, -inf  ;;  %v5223_v43 = vrot.slane %v5209_v45, %v7767_v61 }
 0x8d4   :  { %v5307_v44 = vmax.f32 %v5305_v11, %v5306_v19  ;;  %v5320_v42 = vrot.slane %v5319_v16, 4  ;;  %v5224_v26 = vcombine.high %v5216_v17, %v5216_v17  ;;  %v5326_v33 = vsel %vm893_vm6, %v5216_v17, -inf }
 0x8d5   :  { %v5301_v8 = vrot.slane %v5300_v48, 2  ;;  %v5314_v57 = vmax.f32 %v5312_v13, %v5313_v22  ;;  %v5225_v31 = vcombine.high %v5223_v43, %v5223_v43  ;;  %v5327_v34 = vrot.slane %v5326_v33, 4 }
 0x8d6   :  { %v5308_v25 = vrot.slane %v5307_v44, 2  ;;  %v5321_v0 = vmax.f32 %v5319_v16, %v5320_v42  ;;  %v5333_v55 = vsel %vm893_vm6, %v5224_v26, -inf  ;;  %v5340_v27 = vsel %vm893_vm6, %v5223_v43, -inf }
 0x8d7   :  { %v5302_v21 = vmax.f32 %v5300_v48, %v5301_v8  ;;  %v5315_v12 = vrot.slane %v5314_v57, 2  ;;  %v5328_v58 = vmax.f32 %v5326_v33, %v5327_v34  ;;  %v5334_v53 = vrot.slane %v5333_v55, 4 }
 0x8d8   :  { %v5309_v32 = vmax.f32 %v5307_v44, %v5308_v25  ;;  %v5322_v40 = vrot.slane %v5321_v0, 2  ;;  %v5341_v4 = vrot.slane %v5340_v27, 4  ;;  %v5347_v10 = vsel %vm893_vm6, %v5225_v31, -inf }
 0x8d9   :  { %v5303_v20 = vrot.slane %v5302_v21, 1  ;;  %v5316_v23 = vmax.f32 %v5314_v57, %v5315_v12  ;;  %v5329_v56 = vrot.slane %v5328_v58, 2  ;;  %v5335_v41 = vmax.f32 %v5333_v55, %v5334_v53  ;;  %v8985_v55 = vld [vmem:[#allocation2 + $0x48] sm:$0xff]  ;;  %v7346_v12 = vld [vmem:[%s9136_s9 + $0x40] sm:$0xff]  }
 0x8da   :  { %v5310_v63 = vrot.slane %v5309_v32, 1  ;;  %v5323_v2 = vmax.f32 %v5321_v0, %v5322_v40  ;;  %v5342_v35 = vmax.f32 %v5340_v27, %v5341_v4  ;;  %v5348_v51 = vrot.slane %v5347_v10, 4  ;;  %v5431_v37 = vld [vmem:[#allocation2 + $0x38] sm:$0xff] }
 0x8db   :  { %v5304_v62 = vmax.f32 %v5302_v21, %v5303_v20  ;;  %v5317_v29 = vrot.slane %v5316_v23, 1  ;;  %v5330_v15 = vmax.f32 %v5328_v58, %v5329_v56  ;;  %v5336_v1 = vrot.slane %v5335_v41, 2  ;;  %v7344_v21 = vld [vmem:[%s9136_s9 + $0x38] sm:$0xff]  }
 0x8dc   :  { %v5311_v6 = vmax.f32 %v5309_v32, %v5310_v63  ;;  %v5324_v46 = vrot.slane %v5323_v2, 1  ;;  %v5343_v60 = vrot.slane %v5342_v35, 2  ;;  %v5349_v9 = vmax.f32 %v5347_v10, %v5348_v51  ;;  %7291 = vmatprep.subr.bf16.mxu1 %v7344_v21 }
 0x8dd   :  { %v5318_v24 = vmax.f32 %v5316_v23, %v5317_v29  ;;  %v5331_v45 = vrot.slane %v5330_v15, 1  ;;  %v5337_v3 = vmax.f32 %v5335_v41, %v5336_v1  ;;  %v5435_v59 = vpack.c.bf16 %v5431_v37, %v8834_v36  ;;  %7292 = vmatpush3.bf16.msra.mxu1 %v7344_v21 }
 0x8de   :  { %v5325_v54 = vmax.f32 %v5323_v2, %v5324_v46  ;;  %v5409_v11 = vsel %vm1230_vm7, %v5311_v6, %v5304_v62  ;;  %v5344_v52 = vmax.f32 %v5342_v35, %v5343_v60  ;;  %v5350_v19 = vrot.slane %v5349_v9, 2  ;;  %7311 = vmatprep.subr.bf16.mxu1 %v7346_v12  ;;  %v6519_v6 = vld [vmem:[%s9135_s8 + $0x2] ss:$0 sm:$0xff] }
 0x8df   :  { %v5410_v13 = vsel %vm1232_vm8, %v5318_v24, %v5409_v11  ;;  %v5332_v17 = vmax.f32 %v5330_v15, %v5331_v45  ;;  %v5338_v48 = vrot.slane %v5337_v3, 1  ;;  %7278 = vmatmul.mubr.msk.bf16.gmra.mxu1 %vm425_vm5, %v5435_v59 }
 0x8e0   :  { %v5345_v22 = vrot.slane %v5344_v52, 1  ;;  %v5351_v16 = vmax.f32 %v5349_v9, %v5350_v19  ;;  %v5411_v43 = vsel %vm1234_vm9, %v5325_v54, %v5410_v13 }
 0x8e1   :  { %v5339_v44 = vmax.f32 %v5337_v3, %v5338_v48  ;;  %v5412_v42 = vsel %vm1236_vm10, %v5332_v17, %v5411_v43 }
 0x8e2   :  { %v5346_v26 = vmax.f32 %v5344_v52, %v5345_v22  ;;  %v5352_v33 = vrot.slane %v5351_v16, 1 }
 0x8e3   :  { %v5413_v8 = vsel %vm1238_vm11, %v5339_v44, %v5412_v42 }
 0x8e4   :  { %v5353_v57 = vmax.f32 %v5351_v16, %v5352_v33  ;;  %v5414_v31 = vsel %vm1240_vm12, %v5346_v26, %v5413_v8 }
 0x8e6   :  { %v5415_v34 = vsel %vm1242_vm13, %v5353_v57, %v5414_v31 }
 0x8e7   :  { %5423 = vst.msk [vmem:[#allocation2 + $0x40] sm:$0xff] %vm425_vm5, %v5415_v34 }
 0x8ee   :  { %v5438_v25 = vld [vmem:[#allocation2 + $0x40] sm:$0xff] }
 0x8ef   :  { %v5442_v0 = vpack.c.bf16 %v5438_v25, %v5431_v37  ;;  %v5608_v27 = vpack.c.bf16 %v8985_v55, %v5438_v25 }
 0x8f1   :  { %7268 = vmatmul.mubr.msk.bf16.gmra.mxu0 %vm425_vm5, %v5442_v0 }
 0x8f2   :  { %7283 = vmatprep.mubr.msk.bf16.mxu0 %vm425_vm5, %v8935_v47  ;;  %v7345_v47 = vld [vmem:[%s9136_s9 + $0x30] sm:$0xff]  }
 0x8f3   :  { %7301 = vmatprep.subr.bf16.mxu0 %v7345_v47 }
 0x8f9   :  { %7284 = vmatmul.mubr.msk.bf16.vlgmr.msra.gmra.mxu0 %vm425_vm5, %v8829_v7 }
 0x8fa   :  { %7287 = vmatprep.mubr.msk.bf16.mxu0 %vm425_vm5, %v5435_v59  ;;  %7302 = vmatpush3.bf16.msra.mxu0 %v7345_v47 }
 0x901   :  { %7288 = vmatmul.mubr.msk.bf16.gmra.mxu0 %vm425_vm5, %v5608_v27 }
 0x98c   :  { %v7275_v58 = vpop.f32.mrf.mxu1 }
 0x98e   :  { %v7265_v53 = vpop.f32.mrf.mxu0  ;;  %v5570_v32 = vpop.f32.mrf.mxu1 }
 0x990   :  { %v5494_v40 = vpop.f32.mrf.mxu0  ;;  %v7276_v4 = vpop.f32.mrf.mxu1 }
 0x991   :  { %v5571_v15 = vadd.f32 %v5570_v32, %v5494_v40 }
 0x992   :  { %v7266_v10 = vpop.f32.mrf.mxu0  ;;  %v5573_v20 = vpop.f32.mrf.mxu1 }
 0x994   :  { %v5497_v2 = vpop.f32.mrf.mxu0 }
 0x995   :  { %v5574_v9 = vadd.f32 %v5573_v20, %v5497_v2 }
 0x99f   :  { %v7279_v23 = vpop.f32.mrf.mxu1 }
 0x9a1   :  { %v5584_v56 = vpop.f32.mrf.mxu1 }
 0x9a3   :  { %v7280_v41 = vpop.f32.mrf.mxu1 }
 0x9a5   :  { %v5586_v63 = vpop.f32.mrf.mxu1 }
 0x9b1   :  { %v7269_v35 = vpop.f32.mrf.mxu0 }
 0x9b2   :  { %v5591_v3 = vadd.f32 %v7279_v23, %v7269_v35  ;;  %v6542_v35 = vld [vmem:[%s9137_s10 + $0x2] ss:$0 sm:$0xff] }
 0x9b3   :  { %v5508_v51 = vpop.f32.mrf.mxu0 }
 0x9b5   :  { %v7270_v37 = vpop.f32.mrf.mxu0 }
 0x9b6   :  { %v5594_v17 = vadd.f32 %v7280_v41, %v7270_v37 }
 0x9b7   :  { %v5510_v62 = vpop.f32.mrf.mxu0 }
 0x9b9   :  { %v7285_v29 = vpop.f32.mrf.mxu0 }
 0x9bb   :  { %v5660_v1 = vpop.f32.mrf.mxu0 }
 0x9bc   :  { %v5687_v46 = vadd.f32 %v5660_v1, %v5571_v15  ;;  %v9031_v15 = vld [vmem:[%s9138_s11 + $0x2] ss:$0 sm:$0xff] }
 0x9bd   :  { %v7286_v60 = vpop.f32.mrf.mxu0 }
 0x9be   :  { %v5699_v24 = vadd.f32 %v6519_v6, %v5687_v46 }
 0x9bf   :  { %v5663_v45 = vpop.f32.mrf.mxu0 }
 0x9c0   :  { %v5703_v59 = vmax.f32 %v5699_v24, 0.0  ;;  %v5688_v54 = vadd.f32 %v5663_v45, %v5574_v9  ;;  %v9036_v9 = vld [vmem:[%s9139_s12 + $0x2] ss:$0 sm:$0xff] }
 0x9c1   :  { %v7289_v11 = vpop.f32.mrf.mxu0 }
 0x9c2   :  { %5707 = vst.msk [vmem:[#allocation2 + $0x8] sm:$0xff] %vm46_vm1, %v5703_v59  ;;  %v5700_v52 = vadd.f32 %v6519_v6, %v5688_v54  ;;  %v5689_v19 = vadd.f32 %v7289_v11, %v5591_v3 }
 0x9c3   :  { %v5674_v13 = vpop.f32.mrf.mxu0 }
 0x9c4   :  { %v5704_v48 = vmax.f32 %v5700_v52, 0.0  ;;  %v5701_v22 = vadd.f32 %v6519_v6, %v5689_v19 }
 0x9c5   :  { %v7290_v16 = vpop.f32.mrf.mxu0 }
 0x9c6   :  { %5708 = vst.msk [vmem:[#allocation2 + $0x10] sm:$0xff] %vm46_vm1, %v5704_v48  ;;  %v5705_v43 = vmax.f32 %v5701_v22, 0.0  ;;  %v5690_v44 = vadd.f32 %v7290_v16, %v5594_v17 }
 0x9c7   :  { %v5676_v42 = vpop.f32.mrf.mxu0 }
 0x9c8   :  { %5709 = vst.msk [vmem:[#allocation2 + $0x38] sm:$0xff] %vm46_vm1, %v5705_v43  ;;  %v5702_v26 = vadd.f32 %v6519_v6, %v5690_v44 }
 0x9c9   :  { %v5712_v33 = vld [vmem:[#allocation2 + $0x8] sm:$0xff] }
 0x9ca   :  { %v5706_v8 = vmax.f32 %v5702_v26, 0.0  ;;  %v5719_v57 = vpack.c.bf16 %v5712_v33, %v8928_v50 }
 0x9cc   :  { %5710 = vst.msk [vmem:[#allocation2 + $0x40] sm:$0xff] %vm46_vm1, %v5706_v8  ;;  %7303 = vmatprep.mubr.msk.bf16.mxu0 %vm46_vm1, %v5719_v57 }
 0x9cd   :  { %v5713_v31 = vld [vmem:[#allocation2 + $0x10] sm:$0xff] }
 0x9ce   :  { %v5720_v34 = vpack.c.bf16 %v8827_v5, %v5713_v31  ;;  %v5727_v25 = vpack.c.bf16 %v5713_v31, %v5712_v33 }
 0x9cf   :  { %v5718_v50 = vld [vmem:[#allocation2 + $0x38] sm:$0xff] }
 0x9d0   :  { %7293 = vmatprep.mubr.msk.bf16.mxu1 %vm46_vm1, %v5727_v25  ;;  %7304 = vmatmul.mubr.msk.bf16.vlgmr.msra.gmra.mxu0 %vm46_vm1, %v5720_v34  ;;  %v5722_v27 = vpack.c.bf16 %v5718_v50, %v8834_v36 }
 0x9d1   :  { %7294 = vmatmul.mubr.msk.bf16.vlgmr.msra.gmra.mxu1 %vm46_vm1, %v8839_v28  ;;  %7307 = vmatprep.mubr.msk.bf16.mxu0 %vm46_vm1, %v8829_v7 }
 0x9d2   :  { %7312 = vmatpush3.bf16.msra.mxu1 %v7346_v12  ;;  %7297 = vmatprep.mubr.msk.bf16.mxu1 %vm46_vm1, %v8842_v14 }
 0x9d3   :  { %v5726_v0 = vld [vmem:[#allocation2 + $0x40] sm:$0xff] }
 0x9d4   :  { %v5730_v5 = vpack.c.bf16 %v5726_v0, %v5718_v50  ;;  %v5903_v28 = vpack.c.bf16 %v8985_v55, %v5726_v0 }
 0x9d8   :  { %7308 = vmatmul.mubr.msk.bf16.gmra.mxu0 %vm46_vm1, %v5722_v27 }
 0x9d9   :  { %7298 = vmatmul.mubr.msk.bf16.gmra.mxu1 %vm46_vm1, %v5730_v5 }
 0x9da   :  { %7313 = vmatprep.mubr.msk.bf16.mxu1 %vm46_vm1, %v5720_v34 }
 0x9e1   :  { %7314 = vmatmul.mubr.msk.bf16.vlgmr.msra.gmra.mxu1 %vm46_vm1, %v8829_v7 }
 0x9e2   :  { %7317 = vmatprep.mubr.msk.bf16.mxu1 %vm46_vm1, %v5722_v27 }
 0x9e9   :  { %7318 = vmatmul.mubr.msk.bf16.gmra.mxu1 %vm46_vm1, %v5903_v28 }
 0xa90   :  { %v7305_v14 = vpop.f32.mrf.mxu0 }
 0xa91   :  { %v7295_v21 = vpop.f32.mrf.mxu1 }
 0xa92   :  { %v5865_v47 = vpop.f32.mrf.mxu0 }
 0xa93   :  { %v5786_v36 = vpop.f32.mrf.mxu1 }
 0xa94   :  { %v7306_v12 = vpop.f32.mrf.mxu0  ;;  %v5866_v55 = vadd.f32 %v5865_v47, %v5786_v36 }
 0xa95   :  { %v7296_v58 = vpop.f32.mrf.mxu1 }
 0xa96   :  { %v5868_v53 = vpop.f32.mrf.mxu0 }
 0xa97   :  { %v5789_v32 = vpop.f32.mrf.mxu1 }
 0xa98   :  { %v7309_v40 = vpop.f32.mrf.mxu0  ;;  %v5869_v62 = vadd.f32 %v5868_v53, %v5789_v32 }
 0xa99   :  { %v7299_v4 = vpop.f32.mrf.mxu1 }
 0xa9a   :  { %v5879_v10 = vpop.f32.mrf.mxu0  ;;  %v5886_v6 = vadd.f32 %v7309_v40, %v7299_v4 }
 0xa9b   :  { %v5800_v20 = vpop.f32.mrf.mxu1 }
 0xa9c   :  { %v7310_v23 = vpop.f32.mrf.mxu0 }
 0xa9d   :  { %v7300_v7 = vpop.f32.mrf.mxu1 }
 0xa9e   :  { %v5881_v56 = vpop.f32.mrf.mxu0  ;;  %v5889_v13 = vadd.f32 %v7310_v23, %v7300_v7 }
 0xa9f   :  { %v5802_v41 = vpop.f32.mrf.mxu1 }
 0xaa1   :  { %v7315_v63 = vpop.f32.mrf.mxu1 }
 0xaa3   :  { %v5959_v2 = vpop.f32.mrf.mxu1 }
 0xaa4   :  { %v5986_v51 = vadd.f32 %v5959_v2, %v5866_v55 }
 0xaa5   :  { %v7316_v37 = vpop.f32.mrf.mxu1 }
 0xaa6   :  { %v5998_v29 = vadd.f32 %v6542_v35, %v5986_v51 }
 0xaa7   :  { %v5962_v1 = vpop.f32.mrf.mxu1 }
 0xaa8   :  { %v6002_v46 = vmax.f32 %v5998_v29, 0.0  ;;  %v5987_v60 = vadd.f32 %v5962_v1, %v5869_v62 }
 0xaa9   :  { %v7319_v24 = vpop.f32.mrf.mxu1 }
 0xaaa   :  { %v6016_v45 = vmul.f32 %v9031_v15, %v6002_v46  ;;  %v5999_v3 = vadd.f32 %v6542_v35, %v5987_v60  ;;  %v5988_v59 = vadd.f32 %v7319_v24, %v5886_v6 }
 0xaab   :  { %v5973_v54 = vpop.f32.mrf.mxu1 }
 0xaac   :  { %v6024_v11 = vadd.f32 %v9036_v9, %v6016_v45  ;;  %v6003_v52 = vmax.f32 %v5999_v3, 0.0  ;;  %v6000_v19 = vadd.f32 %v6542_v35, %v5988_v59 }
 0xaad   :  { %v7320_v17 = vpop.f32.mrf.mxu1 }
 0xaae   :  { %v6028_v48 = vcombine.high %v6024_v11, %v6024_v11  ;;  %v6035_v22 = vrot.slane %v6024_v11, %v7767_v61  ;;  %v6017_v16 = vmul.f32 %v9031_v15, %v6003_v52  ;;  %v6004_v43 = vmax.f32 %v6000_v19, 0.0 }
 0xaaf   :  { %v5989_v44 = vadd.f32 %v7320_v17, %v5889_v13  ;;  %v5975_v42 = vpop.f32.mrf.mxu1 }
 0xab0   :  { %v6042_v26 = vrot.slane %v6028_v48, %v7767_v61  ;;  %v6043_v33 = vcombine.high %v6035_v22, %v6035_v22  ;;  %v6070_v8 = vsel %vm1945_vm14, %v6035_v22, -inf  ;;  %v6025_v57 = vadd.f32 %v9036_v9, %v6017_v16 }
 0xab1   :  { %v6071_v31 = vrot.slane %v6070_v8, 4  ;;  %v6126_v34 = vmul.f32 %v9031_v15, %v6004_v43  ;;  %v6001_v25 = vadd.f32 %v6542_v35, %v5989_v44 }
 0xab2   :  { %v6044_v50 = vcombine.high %v6042_v26, %v6042_v26  ;;  %v6077_v0 = vsel %vm1945_vm14, %v6043_v33, -inf  ;;  %v6084_v27 = vsel %vm1945_vm14, %v6042_v26, -inf  ;;  %v6045_v5 = vcombine.high %v6025_v57, %v6025_v57 }
 0xab3   :  { %v6072_v28 = vmax.f32 %v6070_v8, %v6071_v31  ;;  %v6078_v14 = vrot.slane %v6077_v0, 4  ;;  %v6085_v21 = vrot.slane %v6084_v27, 4  ;;  %v6052_v47 = vrot.slane %v6025_v57, %v7767_v61 }
 0xab4   :  { %v6091_v36 = vsel %vm1945_vm14, %v6044_v50, -inf  ;;  %v9051_v12 = vrot.slane %v6045_v5, %v7767_v61  ;;  %v6128_v58 = vadd.f32 %v9036_v9, %v6126_v34  ;;  %v6005_v55 = vmax.f32 %v6001_v25, 0.0 }
 0xab5   :  { %v6073_v53 = vrot.slane %v6072_v28, 2  ;;  %v6079_v32 = vmax.f32 %v6077_v0, %v6078_v14  ;;  %v6086_v40 = vmax.f32 %v6084_v27, %v6085_v21  ;;  %v6092_v4 = vrot.slane %v6091_v36, 4 }
 0xab6   :  { %v6060_v10 = vcombine.high %v6052_v47, %v6052_v47  ;;  %v6098_v20 = vsel %vm1945_vm14, %v6052_v47, -inf  ;;  %v6132_v23 = vcombine.high %v6128_v58, %v6128_v58  ;;  %v6139_v7 = vrot.slane %v6128_v58, %v7767_v61 }
 0xab7   :  { %v6074_v56 = vmax.f32 %v6072_v28, %v6073_v53  ;;  %v6080_v41 = vrot.slane %v6079_v32, 2  ;;  %v6087_v63 = vrot.slane %v6086_v40, 2  ;;  %v6099_v2 = vrot.slane %v6098_v20, 4 }
 0xab8   :  { %v6105_v35 = vsel %vm1945_vm14, %v6060_v10, -inf  ;;  %v6146_v51 = vrot.slane %v6132_v23, %v7767_v61  ;;  %v6147_v37 = vcombine.high %v6139_v7, %v6139_v7  ;;  %v6093_v6 = vmax.f32 %v6091_v36, %v6092_v4 }
 0xab9   :  { %v6075_v62 = vrot.slane %v6074_v56, 1  ;;  %v6081_v29 = vmax.f32 %v6079_v32, %v6080_v41  ;;  %v6088_v1 = vmax.f32 %v6086_v40, %v6087_v63  ;;  %v6100_v46 = vmax.f32 %v6098_v20, %v6099_v2 }
 0xaba   :  { %v6148_v60 = vcombine.high %v6146_v51, %v6146_v51  ;;  %v6174_v24 = vsel %vm1945_vm14, %v6139_v7, -inf  ;;  %v6181_v45 = vsel %vm1945_vm14, %v6147_v37, -inf  ;;  %v6106_v54 = vrot.slane %v6105_v35, 4 }
 0xabb   :  { %v6076_v3 = vmax.f32 %v6074_v56, %v6075_v62  ;;  %v6082_v59 = vrot.slane %v6081_v29, 1  ;;  %v6175_v11 = vrot.slane %v6174_v24, 4  ;;  %v6089_v52 = vrot.slane %v6088_v1, 1 }
 0xabc   :  { %v6182_v19 = vrot.slane %v6181_v45, 4  ;;  %v6188_v13 = vsel %vm1945_vm14, %v6146_v51, -inf  ;;  %v6195_v17 = vsel %vm1945_vm14, %v6148_v60, -inf  ;;  %v6101_v48 = vrot.slane %v6100_v46, 2 }
 0xabd   :  { %v6176_v22 = vmax.f32 %v6174_v24, %v6175_v11  ;;  %v6189_v16 = vrot.slane %v6188_v13, 4  ;;  %v6196_v43 = vrot.slane %v6195_v17, 4  ;;  %v6083_v44 = vmax.f32 %v6081_v29, %v6082_v59 }
 0xabe   :  { %v6183_v42 = vmax.f32 %v6181_v45, %v6182_v19  ;;  %v6127_v26 = vmul.f32 %v9031_v15, %v6005_v55  ;;  %v6061_v33 = vcombine.high %v9051_v12, %v9051_v12  ;;  %v6094_v34 = vrot.slane %v6093_v6, 2 }
 0xabf   :  { %v6177_v8 = vrot.slane %v6176_v22, 2  ;;  %v6190_v57 = vmax.f32 %v6188_v13, %v6189_v16  ;;  %v6197_v31 = vmax.f32 %v6195_v17, %v6196_v43  ;;  %v6090_v0 = vmax.f32 %v6088_v1, %v6089_v52 }
 0xac0   :  { %v6184_v25 = vrot.slane %v6183_v42, 2  ;;  %v6129_v50 = vadd.f32 %v9036_v9, %v6127_v26  ;;  %v6107_v27 = vmax.f32 %v6105_v35, %v6106_v54  ;;  %v6095_v14 = vmax.f32 %v6093_v6, %v6094_v34 }
 0xac1   :  { %v6178_v5 = vmax.f32 %v6176_v22, %v6177_v8  ;;  %v6191_v28 = vrot.slane %v6190_v57, 2  ;;  %v6102_v21 = vmax.f32 %v6100_v46, %v6101_v48  ;;  %v6198_v36 = vrot.slane %v6197_v31, 2 }
 0xac2   :  { %v6185_v47 = vmax.f32 %v6183_v42, %v6184_v25  ;;  %v6149_v58 = vcombine.high %v6129_v50, %v6129_v50  ;;  %v6156_v15 = vrot.slane %v6129_v50, %v7767_v61  ;;  %v6096_v40 = vrot.slane %v6095_v14, 1 }
 0xac3   :  { %v6179_v53 = vrot.slane %v6178_v5, 1  ;;  %v6192_v32 = vmax.f32 %v6190_v57, %v6191_v28  ;;  %v6108_v4 = vrot.slane %v6107_v27, 2  ;;  %v6103_v63 = vrot.slane %v6102_v21, 1 }
 0xac4   :  { %v6186_v10 = vrot.slane %v6185_v47, 1  ;;  %v6163_v20 = vrot.slane %v6149_v58, %v7767_v61  ;;  %v6164_v23 = vcombine.high %v6156_v15, %v6156_v15  ;;  %v6202_v9 = vsel %vm1945_vm14, %v6156_v15, -inf }
 0xac5   :  { %v6180_v7 = vmax.f32 %v6178_v5, %v6179_v53  ;;  %v6193_v56 = vrot.slane %v6192_v32, 1  ;;  %v6203_v41 = vrot.slane %v6202_v9, 4  ;;  %v6097_v51 = vmax.f32 %v6095_v14, %v6096_v40 }
 0xac6   :  { %v6187_v55 = vmax.f32 %v6185_v47, %v6186_v10  ;;  %v6209_v2 = vsel %vm1945_vm14, %v6164_v23, -inf  ;;  %v6216_v35 = vsel %vm1945_vm14, %v6163_v20, -inf  ;;  %v6165_v37 = vcombine.high %v6163_v20, %v6163_v20 }
 0xac7   :  { %v6204_v62 = vmax.f32 %v6202_v9, %v6203_v41  ;;  %v6210_v29 = vrot.slane %v6209_v2, 4  ;;  %v6217_v1 = vrot.slane %v6216_v35, 4  ;;  %v6109_v6 = vmax.f32 %v6107_v27, %v6108_v4 }
 0xac8   :  { %v6112_v46 = vsel %vm1945_vm14, %v9051_v12, -inf  ;;  %v6119_v60 = vsel %vm1945_vm14, %v6061_v33, -inf  ;;  %v6238_v24 = vsel %vm1230_vm7, %v6083_v44, %v6076_v3  ;;  %v6104_v52 = vmax.f32 %v6102_v21, %v6103_v63 }
 0xac9   :  { %v6205_v45 = vrot.slane %v6204_v62, 2  ;;  %v6211_v59 = vmax.f32 %v6209_v2, %v6210_v29  ;;  %v6113_v54 = vrot.slane %v6112_v46, 4  ;;  %v6120_v11 = vrot.slane %v6119_v60, 4 }
 0xaca   :  { %v6110_v19 = vrot.slane %v6109_v6, 1  ;;  %v6239_v13 = vsel %vm1232_vm8, %v6090_v0, %v6238_v24  ;;  %v6199_v17 = vmax.f32 %v6197_v31, %v6198_v36  ;;  %v6194_v12 = vmax.f32 %v6192_v32, %v6193_v56  ;;  %v7348_v24 = vld [vmem:[%s9138_s11] ss:$0 sm:$0xff] }
 0xacb   :  { %v6206_v48 = vmax.f32 %v6204_v62, %v6205_v45  ;;  %v6114_v22 = vmax.f32 %v6112_v46, %v6113_v54  ;;  %v6121_v16 = vmax.f32 %v6119_v60, %v6120_v11  ;;  %v6240_v43 = vsel %vm1234_vm9, %v6097_v51, %v6239_v13  ;;  %v7349_v54 = vld [vmem:[%s9139_s12] ss:$0 sm:$0xff] }
 0xacc   :  { %v6111_v42 = vmax.f32 %v6109_v6, %v6110_v19  ;;  %v6200_v26 = vrot.slane %v6199_v17, 1  ;;  %v6212_v33 = vrot.slane %v6211_v59, 2  ;;  %v6218_v57 = vmax.f32 %v6216_v35, %v6217_v1  ;;  %v7347_v1 = vld [vmem:[%s9137_s10] ss:$0 sm:$0xff]  ;;  %s7377_s10 = smov [#allocation3]  }
 0xacd   :  { %v6115_v8 = vrot.slane %v6114_v22, 2  ;;  %v6122_v3 = vrot.slane %v6121_v16, 2  ;;  %v6207_v44 = vrot.slane %v6206_v48, 1  ;;  %v6241_v34 = vsel %vm1236_vm10, %v6104_v52, %v6240_v43  ;;  %s6285_s11 = sshll.u32 %s7377_s10, 4  ;;  %s6286_s11 = int_to_ptr.vmem [resolvable:$true] %s6285_s11 }
 0xace   :  { %v6201_v25 = vmax.f32 %v6199_v17, %v6200_v26  ;;  %v6213_v50 = vmax.f32 %v6211_v59, %v6212_v33  ;;  %v6223_v0 = vsel %vm1945_vm14, %v6165_v37, -inf  ;;  %v6219_v28 = vrot.slane %v6218_v57, 2  ;;  %s7350_s12 = scalar_lea.vmem %s6286_s11, 256  ;;  %p7355_p1 = scmp.lt.s32.totalorder %s6286_s11, %s6286_s11 }
 0xacf   :  { %v6116_v31 = vmax.f32 %v6114_v22, %v6115_v8  ;;  %v6123_v27 = vmax.f32 %v6121_v16, %v6122_v3  ;;  %v6208_v5 = vmax.f32 %v6206_v48, %v6207_v44  ;;  %v6224_v21 = vrot.slane %v6223_v0, 4  ;;  %p7351_p0 = scmp.ne.s32.totalorder %s6286_s11, %s7350_s12  ;;  %p7356_p2 = scmp.lt.s32.totalorder %s7350_s12, %s7350_s12 }
 0xad0   :  { %v6214_v14 = vrot.slane %v6213_v50, 1  ;;  %v6253_v47 = vsel %vm1230_vm7, %v6187_v55, %v6180_v7  ;;  %v6220_v15 = vmax.f32 %v6218_v57, %v6219_v28  ;;  %v6242_v32 = vsel %vm1238_vm11, %v6111_v42, %v6241_v34 }
 0xad1   :  { %v6117_v36 = vrot.slane %v6116_v31, 1  ;;  %v6124_v58 = vrot.slane %v6123_v27, 1  ;;  %v6254_v53 = vsel %vm1232_vm8, %v6194_v12, %v6253_v47  ;;  %v6225_v4 = vmax.f32 %v6223_v0, %v6224_v21  ;;  %p7357_p3 = por %p7356_p2, %p7355_p1 }
 0xad2   :  { %v6215_v40 = vmax.f32 %v6213_v50, %v6214_v14  ;;  %v6255_v10 = vsel %vm1234_vm9, %v6201_v25, %v6254_v53  ;;  %v6221_v9 = vrot.slane %v6220_v15, 1  ;;  %v1875_v6 = vadd.f32 %v7347_v1, %v8065_v38 }
 0xad3   :  { %v6118_v20 = vmax.f32 %v6116_v31, %v6117_v36  ;;  %v6125_v23 = vmax.f32 %v6123_v27, %v6124_v58  ;;  %v6256_v56 = vsel %vm1236_vm10, %v6208_v5, %v6255_v10  ;;  %v6226_v41 = vrot.slane %v6225_v4, 2  ;;  %p7358_p4 = pnand %p7357_p3, %p7351_p0 }
 0xad4   :  { %v6222_v7 = vmax.f32 %v6220_v15, %v6221_v9  ;;  %v6257_v35 = vsel %vm1238_vm11, %v6215_v40, %v6256_v56  ;;  %v1879_v46 = vmax.f32 %v1875_v6, 0.0  ;;  %v1747_v60 = vadd.f32 %v8061_v30, %v8059_v18 }
 0xad5   :  { %v6243_v63 = vsel %vm1240_vm12, %v6118_v20, %v6242_v32  ;;  %v6227_v2 = vmax.f32 %v6225_v4, %v6226_v41 }
 0xad6   :  { %v6244_v55 = vsel %vm1242_vm13, %v6125_v23, %v6243_v63  ;;  %v6258_v37 = vsel %vm1240_vm12, %v6222_v7, %v6257_v35  ;;  %v1891_v45 = vmul.f32 %v7348_v24, %v1879_v46  ;;  %v1865_v59 = vadd.f32 %v8069_v49, %v1747_v60 }
 0xad7   :  { %6266 = vrot.lane.b32.xlu1 %v6244_v55, %s7376_s26  ;;  %v6228_v51 = vrot.slane %v6227_v2, 1 }
 0xad8   :  { %v1899_v11 = vadd.f32 %v7349_v54, %v1891_v45  ;;  %v1876_v52 = vadd.f32 %v7347_v1, %v1865_v59 }
 0xad9   :  { %v6229_v62 = vmax.f32 %v6227_v2, %v6228_v51 }
 0xada   :  { %v1910_v19 = vrot.slane %v1899_v11, %v7767_v61  ;;  %v1880_v38 = vmax.f32 %v1876_v52, 0.0  ;;  %v1903_v13 = vcombine.high %v1899_v11, %v1899_v11 }
 0xadb   :  { %v6259_v29 = vsel %vm1242_vm13, %v6229_v62, %v6258_v37 }
 0xadc   :  { %6268 = vrot.lane.b32.xlu1 %v6259_v29, %s7376_s26  ;;  %v1918_v17 = vcombine.high %v1910_v19, %v1910_v19  ;;  %v1892_v48 = vmul.f32 %v7348_v24, %v1880_v38  ;;  %v1917_v18 = vrot.slane %v1903_v13, %v7767_v61  ;;  %v1946_v49 = vsel %vm1945_vm14, %v1910_v19, -inf }
 0xadd   :  { %v1947_v26 = vrot.slane %v1946_v49, 4 }
 0xade   :  { %v1953_v30 = vsel %vm1945_vm14, %v1918_v17, -inf  ;;  %v1900_v22 = vadd.f32 %v7349_v54, %v1892_v48  ;;  %v1919_v16 = vcombine.high %v1917_v18, %v1917_v18  ;;  %v1960_v42 = vsel %vm1945_vm14, %v1917_v18, -inf }
 0xadf   :  { %v1954_v43 = vrot.slane %v1953_v30, 4  ;;  %v1961_v33 = vrot.slane %v1960_v42, 4  ;;  %v1948_v34 = vmax.f32 %v1946_v49, %v1947_v26 }
 0xae0   :  { %v1927_v12 = vrot.slane %v1900_v22, %v7767_v61  ;;  %v1967_v8 = vsel %vm1945_vm14, %v1919_v16, -inf  ;;  %v1920_v3 = vcombine.high %v1900_v22, %v1900_v22 }
 0xae1   :  { %v1955_v44 = vmax.f32 %v1953_v30, %v1954_v43  ;;  %v1968_v25 = vrot.slane %v1967_v8, 4  ;;  %v1962_v0 = vmax.f32 %v1960_v42, %v1961_v33  ;;  %v1949_v14 = vrot.slane %v1948_v34, 2 }
 0xae2   :  { %v1935_v57 = vcombine.high %v1927_v12, %v1927_v12  ;;  %v1974_v50 = vsel %vm1945_vm14, %v1927_v12, -inf  ;;  %v1934_v31 = vrot.slane %v1920_v3, %v7767_v61  ;;  %v6261_v12 = vpop.permute.xlu0 %6260 }
 0xae3   :  { %v1956_v27 = vrot.slane %v1955_v44, 2  ;;  %v1975_v5 = vrot.slane %v1974_v50, 4  ;;  %v1969_v21 = vmax.f32 %v1967_v8, %v1968_v25  ;;  %v1963_v47 = vrot.slane %v1962_v0, 2 }
 0xae4   :  { %v1981_v28 = vsel %vm1945_vm14, %v1935_v57, -inf  ;;  %v1936_v36 = vcombine.high %v1934_v31, %v1934_v31  ;;  %v1988_v53 = vsel %vm1945_vm14, %v1934_v31, -inf  ;;  %v1950_v40 = vmax.f32 %v1948_v34, %v1949_v14 }
 0xae5   :  { %v1957_v58 = vmax.f32 %v1955_v44, %v1956_v27  ;;  %v1982_v15 = vrot.slane %v1981_v28, 4  ;;  %v1976_v32 = vmax.f32 %v1974_v50, %v1975_v5  ;;  %v1970_v4 = vrot.slane %v1969_v21, 2 }
 0xae6   :  { %v1964_v10 = vmax.f32 %v1962_v0, %v1963_v47  ;;  %v1989_v20 = vrot.slane %v1988_v53, 4  ;;  %v1995_v23 = vsel %vm1945_vm14, %v1936_v36, -inf  ;;  %v1951_v41 = vrot.slane %v1950_v40, 1  ;;  %v6263_v44 = vpop.permute.xlu0 %6262 }
 0xae7   :  { %v1958_v61 = vrot.slane %v1957_v58, 1  ;;  %v1983_v9 = vmax.f32 %v1981_v28, %v1982_v15  ;;  %v1977_v56 = vrot.slane %v1976_v32, 2  ;;  %v1971_v63 = vmax.f32 %v1969_v21, %v1970_v4 }
 0xae8   :  { %v1996_v7 = vrot.slane %v1995_v23, 4  ;;  %v1965_v55 = vrot.slane %v1964_v10, 1  ;;  %v1990_v2 = vmax.f32 %v1988_v53, %v1989_v20  ;;  %v1952_v62 = vmax.f32 %v1950_v40, %v1951_v41 }
 0xae9   :  { %v1959_v35 = vmax.f32 %v1957_v58, %v1958_v61  ;;  %v1984_v51 = vrot.slane %v1983_v9, 2  ;;  %v1978_v37 = vmax.f32 %v1976_v32, %v1977_v56  ;;  %v1972_v29 = vrot.slane %v1971_v63, 1 }
 0xaea   :  { %v1997_v1 = vmax.f32 %v1995_v23, %v1996_v7  ;;  %v1966_v6 = vmax.f32 %v1964_v10, %v1965_v55  ;;  %v1991_v46 = vrot.slane %v1990_v2, 2  ;;  %v6273_v57 = vsel %vm46_vm1, %v8162_v39, %v6263_v44 }
 0xaeb   :  { %v1985_v60 = vmax.f32 %v1983_v9, %v1984_v51  ;;  %v2114_v24 = vsel %vm1230_vm7, %v1959_v35, %v1952_v62  ;;  %v1979_v45 = vrot.slane %v1978_v37, 1  ;;  %v1973_v59 = vmax.f32 %v1971_v63, %v1972_v29 }
 0xaec   :  { %v1998_v54 = vrot.slane %v1997_v1, 2  ;;  %v1992_v11 = vmax.f32 %v1990_v2, %v1991_v46  ;;  %v2115_v52 = vsel %vm1232_vm8, %v1966_v6, %v2114_v24 }
 0xaed   :  { %v1986_v19 = vrot.slane %v1985_v60, 1  ;;  %v1980_v38 = vmax.f32 %v1978_v37, %v1979_v45  ;;  %v2116_v17 = vsel %vm1234_vm9, %v1973_v59, %v2115_v52 }
 0xaee   :  { %v1999_v13 = vmax.f32 %v1997_v1, %v1998_v54  ;;  %v1993_v48 = vrot.slane %v1992_v11, 1 }
 0xaef   :  { %v1987_v18 = vmax.f32 %v1985_v60, %v1986_v19  ;;  %v2117_v30 = vsel %vm1236_vm10, %v1980_v38, %v2116_v17 }
 0xaf0   :  { %v2000_v22 = vrot.slane %v1999_v13, 1  ;;  %v1994_v16 = vmax.f32 %v1992_v11, %v1993_v48 }
 0xaf1   :  { %v2118_v49 = vsel %vm1238_vm11, %v1987_v18, %v2117_v30 }
 0xaf2   :  { %v2001_v43 = vmax.f32 %v1999_v13, %v2000_v22  ;;  %v2119_v42 = vsel %vm1240_vm12, %v1994_v16, %v2118_v49 }
 0xaf4   :  { %v2120_v26 = vsel %vm1242_vm13, %v2001_v43, %v2119_v42 }
 0xaf5   :  { %v6272_v33 = vsel %vm46_vm1, %v2120_v26, %v6261_v12 }
 0xb49   :  { %v6267_v8 = vpop.permute.xlu1 %6266 }
 0xb4a   :  { %v6275_v3 = vsel %vm6274_vm15, %v6272_v33, %v6267_v8 }
 0xb4b   :  { %6278 = vst.msk [vmem:[#allocation3] sm:$0xff] %vm6277_vm0, %v6275_v3 }
 0xb4e   :  { %v6269_v34 = vpop.permute.xlu1 %6268 }
 0xb4f   :  { %v6276_v25 = vsel %vm6274_vm15, %v6273_v57, %v6269_v34 }
 0xb50   :  { %6279 = vst.msk [vmem:[#allocation3 + $0x8] sm:$0xff] %vm6277_vm0, %v6276_v25 }
 0xb51   :  { %7361 = shalt.err (!%p7358_p4)
}
 0xb52   :  { %s7378_s7 = smov 128   ;;  %s7379_s1 = smov 8  }
 0xb53   :  { %6291 = dma.vmem_to_hbm [thread:$0]  %s6286_s11, 256, %s9140_s13, [#allocation4], %s7378_s7, %s7378_s7, %s7379_s1  }
 0xb54   :  { %7370 = dma.done.wait [#allocation4], 256  }
 0xb55   :  { %7371 = vsyncadd [#allocation4], 4294967040 }
 0xb56   :  { %6295 = vsyncpa [#allocation4], 1 }

</bundles_post_ra>
